<compile_context>
chip_gen: v7x
topology: tpu7x:2x2x1
jax: 0.10.0
libtpu: 0.0.40
codegen_flags: <defaults>
</compile_context>

<pallas_src>
import functools

import jax
import jax.numpy as jnp
from jax import lax
from jax.experimental import pallas as pl
from jax.experimental.pallas import tpu as pltpu


def conv1d_relu_kernel(x_ref, w_ref, b_ref, o_ref, xpad_ref, *, K, pad, chunk_b):
    """One (B, L) slab per grid step.

    x_ref:    (B, L, Cin)         bf16 input block (unpadded)
    w_ref:    (K*Cin, Cout)       bf16 weight, tap-major rows (VMEM resident)
    b_ref:    (1, Cout)           f32 bias
    o_ref:    (B, L, Cout)        output block
    xpad_ref: (B, L+2*pad, Cin)   bf16 scratch: zero-padded copy of x
    """
    B, L, Cin = x_ref.shape
    Cout = o_ref.shape[-1]

    # Fused zero-padding along L: zero only the pad rows (every step, so it is
    # correct for any grid sharding), then copy the interior.
    if pad:
        zeros_edge = jnp.zeros((B, pad, Cin), xpad_ref.dtype)
        xpad_ref[:, pl.ds(0, pad), :] = zeros_edge
        xpad_ref[:, pl.ds(pad + L, pad), :] = zeros_edge
    xpad_ref[:, pl.ds(pad, L), :] = x_ref[...]

    bias_f32 = b_ref[...].astype(jnp.float32)          # (1, Cout), hoisted

    n_chunks = B // chunk_b
    Mc = chunk_b * L

    def do_chunk(b0):
        # K accumulating MXU matmuls directly on the shifted tap windows
        # (no materialized im2col); accumulator stays in vregs for this chunk.
        acc = jnp.zeros((Mc, Cout), jnp.float32)
        for k in range(K):
            tap = xpad_ref[pl.ds(b0, chunk_b), pl.ds(k, L), :].reshape(Mc, Cin)
            acc = acc + jnp.dot(tap, w_ref[pl.ds(k * Cin, Cin), :],
                                preferred_element_type=jnp.float32)
        acc = jnp.maximum(acc + bias_f32, 0.0)
        o_ref[pl.ds(b0, chunk_b), :, :] = (
            acc.reshape(chunk_b, L, Cout).astype(o_ref.dtype))

    if n_chunks == 1:
        do_chunk(0)
    else:
        def body(c, carry):
            do_chunk(pl.multiple_of(c * chunk_b, chunk_b))
            return carry
        lax.fori_loop(0, n_chunks, body, 0, unroll=True)


def _is_multi_tensorcore_chip():
    """True on chips exposing 2 TensorCores to one kernel (v7x)."""
    try:
        kind = jax.devices()[0].device_kind.lower()
    except Exception:  # pragma: no cover - conservative fallback
        return False
    return "v7" in kind


def _pick_block_batch(N, L, *, max_m=2048, min_split_m=128):
    """Largest batch block with M = B*L <= max_m. Only on multi-TC chips do we
    insist on >= 2 grid steps (megacore sharding), and only if that keeps
    M >= min_split_m; on single-TC chips one big step avoids per-step
    overhead (the grid is a serial loop there)."""
    divisors = [d for d in range(1, N + 1) if N % d == 0]
    fit = [d for d in divisors if d * L <= max_m] or [1]
    best = max(fit)
    if _is_multi_tensorcore_chip() and N // best < 2:
        split = [d for d in fit if N // d >= 2 and d * L >= min_split_m]
        if split:
            best = max(split)
    return best


def _pick_chunk_batch(B, L, *, max_rows=128):
    """Largest divisor of the block batch whose chunk (rows = d*L) keeps the
    f32 accumulator comfortably inside the 64-vreg file (<=128 rows x 256)."""
    divs = [d for d in range(1, B + 1) if B % d == 0 and d * L <= max_rows]
    return max(divs) if divs else 1


def conv_relu_nlc(x_nlc, weight, bias, *, block_batch=None, out_dtype=None):
    """Channels-last entry point (no layout transposes).

    x_nlc:  (N, L, Cin)
    weight: (Cout, Cin, K)   — PyTorch Conv1d weight layout
    bias:   (Cout,)
    returns (N, L, Cout) in `out_dtype` (default: x_nlc.dtype).
    """
    N, L, Cin = x_nlc.shape
    Cout, Cin_w, K = weight.shape
    assert Cin == Cin_w
    pad = (K - 1) // 2

    if out_dtype is None:
        out_dtype = x_nlc.dtype
    out_bytes = jnp.dtype(out_dtype).itemsize

    if block_batch is None:
        block_batch = _pick_block_batch(N, L)
    assert N % block_batch == 0
    B = block_batch
    chunk_b = _pick_chunk_batch(B, L)

    # Glue (plain JAX): bf16 cast + tap-major weight packing.
    x_b = x_nlc.astype(jnp.bfloat16)                                   # (N, L, Cin)
    w2 = jnp.transpose(weight, (2, 1, 0)).reshape(K * Cin, Cout)       # (K*Cin, Cout)
    w2 = w2.astype(jnp.bfloat16)
    b2 = bias.reshape(1, Cout).astype(jnp.float32)

    # Explicit VMEM budget: double-buffered input/output, (assumed) 2x weight,
    # bias, plus the padded-slab scratch. Capped at 64 MiB (v7x physical).
    vmem_est = (2 * B * L * Cin * 2
                + 2 * B * L * Cout * out_bytes
                + 2 * K * Cin * Cout * 2
                + 2 * Cout * 4
                + B * (L + 2 * pad) * Cin * 2)
    vmem_limit = int(min(64 * 1024 * 1024, max(32 * 1024 * 1024, 2 * vmem_est)))

    kernel = functools.partial(conv1d_relu_kernel, K=K, pad=pad, chunk_b=chunk_b)

    return pl.pallas_call(
        kernel,
        out_shape=jax.ShapeDtypeStruct((N, L, Cout), out_dtype),
        grid_spec=pltpu.PrefetchScalarGridSpec(
            num_scalar_prefetch=0,
            grid=(N // B,),
            in_specs=[
                pl.BlockSpec((B, L, Cin), lambda n: (n, 0, 0)),
                pl.BlockSpec((K * Cin, Cout), lambda n: (0, 0)),   # constant -> resident
                pl.BlockSpec((1, Cout), lambda n: (0, 0)),
            ],
            out_specs=pl.BlockSpec((B, L, Cout), lambda n: (n, 0, 0)),
            scratch_shapes=[
                pltpu.VMEM((B, L + 2 * pad, Cin), jnp.bfloat16),   # padded slab
            ],
        ),
        compiler_params=pltpu.CompilerParams(
            dimension_semantics=("parallel",),
            vmem_limit_bytes=vmem_limit),
    )(x_b, w2, b2)


def conv_forward(x_ncl, weight, bias, *, block_batch=None, out_dtype=None):
    """PyTorch-compatible interface (NCL in, NCL out).

    x_ncl:  (N, Cin, L)
    weight: (Cout, Cin, K)
    bias:   (Cout,)
    returns (N, Cout, L)
    """
    # TODO(synk): keep the surrounding model channels-last and call
    # conv_relu_nlc directly — these two transposes are full HBM round trips
    # of the activations and dominate end-to-end time at small L.
    x_nlc = jnp.transpose(x_ncl, (0, 2, 1))                            # (N, L, Cin)
    out_nlc = conv_relu_nlc(x_nlc, weight, bias,
                            block_batch=block_batch, out_dtype=out_dtype)
    return jnp.transpose(out_nlc, (0, 2, 1))                           # (N, Cout, L)


if __name__ == "__main__":
    # Module-implied channels: Conv1d(256, 256, 5, padding=2) -> Cin=Cout=256.
    N, C, L, K = 16, 256, 16, 5

    key = jax.random.PRNGKey(0)
    kx, kw, kb = jax.random.split(key, 3)

    x = jax.random.normal(kx, (N, C, L), dtype=jnp.float32)
    # Deterministic parameter init (PyTorch Conv1d shapes).
    fan_in = C * K
    bound = 1.0 / (fan_in ** 0.5)
    weight = jax.random.uniform(kw, (C, C, K), jnp.float32, -bound, bound)
    bias = jax.random.uniform(kb, (C,), jnp.float32, -bound, bound)

    out = jax.jit(conv_forward)(x, weight, bias)
    out = jax.block_until_ready(out)
    assert out.shape == (N, C, L)

    # Sanity check against XLA's native conv + relu, on bf16-rounded inputs
    # (the kernel does the matmul in bf16 with f32 accumulation).
    xq = x.astype(jnp.bfloat16).astype(jnp.float32)
    wq = weight.astype(jnp.bfloat16).astype(jnp.float32)
    ref = jax.lax.conv_general_dilated(
        xq, wq, window_strides=(1,), padding=((2, 2),),
        dimension_numbers=("NCH", "OIH", "NCH"))
    ref = jnp.maximum(ref + bias[None, :, None], 0.0)
    err = float(jnp.max(jnp.abs(out - ref)))
    assert jnp.allclose(out, ref, atol=1e-2, rtol=1e-2), f"max abs err {err}"

    print("KERNEL_OK")
</pallas_src>

<mosaic_0001>
module attributes {stable_mosaic.version = 11 : i64} {
  func.func @conv1d_relu_kernel(%arg0: i32, %arg1: memref<16x16x256xbf16, #tpu.memory_space<vmem>>, %arg2: memref<1280x256xbf16, #tpu.memory_space<vmem>>, %arg3: memref<1x256xf32, #tpu.memory_space<vmem>>, %arg4: memref<16x16x256xf32, #tpu.memory_space<vmem>>, %arg5: memref<16x20x256xbf16, #tpu.memory_space<vmem>>) attributes {dimension_semantics = [#tpu.dimension_semantics<parallel>], iteration_bounds = array<i64: 1>, scalar_prefetch = 0 : i64, scratch_operands = 1 : i64, tpu.core_type = #tpu.core_type<tc>, window_params = [{transform_indices = @transform_0, window_bounds = array<i64: 16, 16, 256>}, {pipeline_mode = #tpu.pipeline_mode<synchronous>, transform_indices = @transform_1, window_bounds = array<i64: 1280, 256>}, {pipeline_mode = #tpu.pipeline_mode<synchronous>, transform_indices = @transform_2, window_bounds = array<i64: 1, 256>}, {transform_indices = @transform_3, window_bounds = array<i64: 16, 16, 256>}]} {
    %cst = arith.constant 0.000000e+00 : bf16
    %0 = vector.broadcast %cst : bf16 to vector<16x2x256xbf16>
    %c0 = arith.constant 0 : index
    %c0_0 = arith.constant 0 : index
    %c0_1 = arith.constant 0 : index
    %1 = vector.load %arg5[%c0, %c0_0, %c0_1] : memref<16x20x256xbf16, #tpu.memory_space<vmem>>, vector<16x2x256xbf16>
    tpu.vector_store %arg5[%c0, %c0_0, %c0_1], %0 {strides = array<i32>} : memref<16x20x256xbf16, #tpu.memory_space<vmem>>, vector<16x2x256xbf16>,
    %c0_2 = arith.constant 0 : index
    %c18 = arith.constant 18 : index
    %c0_3 = arith.constant 0 : index
    %2 = vector.load %arg5[%c0_2, %c18, %c0_3] : memref<16x20x256xbf16, #tpu.memory_space<vmem>>, vector<16x2x256xbf16>
    tpu.vector_store %arg5[%c0_2, %c18, %c0_3], %0 {strides = array<i32>} : memref<16x20x256xbf16, #tpu.memory_space<vmem>>, vector<16x2x256xbf16>,
    %c0_4 = arith.constant 0 : index
    %c0_5 = arith.constant 0 : index
    %c0_6 = arith.constant 0 : index
    %3 = vector.load %arg1[%c0_4, %c0_5, %c0_6] : memref<16x16x256xbf16, #tpu.memory_space<vmem>>, vector<16x16x256xbf16>
    %c0_7 = arith.constant 0 : index
    %c2 = arith.constant 2 : index
    %c0_8 = arith.constant 0 : index
    %4 = vector.load %arg5[%c0_7, %c2, %c0_8] : memref<16x20x256xbf16, #tpu.memory_space<vmem>>, vector<16x16x256xbf16>
    tpu.vector_store %arg5[%c0_7, %c2, %c0_8], %3 {strides = array<i32>} : memref<16x20x256xbf16, #tpu.memory_space<vmem>>, vector<16x16x256xbf16>,
    %c0_9 = arith.constant 0 : index
    %c0_10 = arith.constant 0 : index
    %5 = vector.load %arg3[%c0_9, %c0_10] : memref<1x256xf32, #tpu.memory_space<vmem>>, vector<1x256xf32>
    %c0_i32 = arith.constant 0 : i32
    %c8_i32 = arith.constant 8 : i32
    %6 = arith.muli %c0_i32, %c8_i32 : i32
    %7 = tpu.assume_multiple %6, 8 : i32
    %cst_11 = arith.constant 0.000000e+00 : f32
    %8 = vector.broadcast %cst_11 : f32 to vector<128x256xf32>
    %9 = arith.index_cast %7 : i32 to index
    %c0_12 = arith.constant 0 : index
    %c0_13 = arith.constant 0 : index
    %10 = vector.load %arg5[%9, %c0_12, %c0_13] : memref<16x20x256xbf16, #tpu.memory_space<vmem>>, vector<8x16x256xbf16>
    %11 = vector.shape_cast %10 : vector<8x16x256xbf16> to vector<128x256xbf16>
    %c0_14 = arith.constant 0 : index
    %c0_15 = arith.constant 0 : index
    %12 = vector.load %arg2[%c0_14, %c0_15] : memref<1280x256xbf16, #tpu.memory_space<vmem>>, vector<256x256xbf16>
    %cst_16 = arith.constant dense<0.000000e+00> : vector<128x256xf32>
    %13 = tpu.matmul %11, %12, %cst_16 {dimension_numbers = #tpu.dot_dimension_numbers<[1], [0], [0], [1], [0, 0, 1, 1], [], []>} : vector<128x256xbf16>, vector<256x256xbf16>, vector<128x256xf32> -> vector<128x256xf32>
    %14 = arith.addf %8, %13 : vector<128x256xf32>
    %15 = arith.index_cast %7 : i32 to index
    %c1 = arith.constant 1 : index
    %c0_17 = arith.constant 0 : index
    %16 = vector.load %arg5[%15, %c1, %c0_17] : memref<16x20x256xbf16, #tpu.memory_space<vmem>>, vector<8x16x256xbf16>
    %17 = vector.shape_cast %16 : vector<8x16x256xbf16> to vector<128x256xbf16>
    %c256 = arith.constant 256 : index
    %c0_18 = arith.constant 0 : index
    %18 = vector.load %arg2[%c256, %c0_18] : memref<1280x256xbf16, #tpu.memory_space<vmem>>, vector<256x256xbf16>
    %cst_19 = arith.constant dense<0.000000e+00> : vector<128x256xf32>
    %19 = tpu.matmul %17, %18, %cst_19 {dimension_numbers = #tpu.dot_dimension_numbers<[1], [0], [0], [1], [0, 0, 1, 1], [], []>} : vector<128x256xbf16>, vector<256x256xbf16>, vector<128x256xf32> -> vector<128x256xf32>
    %20 = arith.addf %14, %19 : vector<128x256xf32>
    %21 = arith.index_cast %7 : i32 to index
    %c2_20 = arith.constant 2 : index
    %c0_21 = arith.constant 0 : index
    %22 = vector.load %arg5[%21, %c2_20, %c0_21] : memref<16x20x256xbf16, #tpu.memory_space<vmem>>, vector<8x16x256xbf16>
    %23 = vector.shape_cast %22 : vector<8x16x256xbf16> to vector<128x256xbf16>
    %c512 = arith.constant 512 : index
    %c0_22 = arith.constant 0 : index
    %24 = vector.load %arg2[%c512, %c0_22] : memref<1280x256xbf16, #tpu.memory_space<vmem>>, vector<256x256xbf16>
    %cst_23 = arith.constant dense<0.000000e+00> : vector<128x256xf32>
    %25 = tpu.matmul %23, %24, %cst_23 {dimension_numbers = #tpu.dot_dimension_numbers<[1], [0], [0], [1], [0, 0, 1, 1], [], []>} : vector<128x256xbf16>, vector<256x256xbf16>, vector<128x256xf32> -> vector<128x256xf32>
    %26 = arith.addf %20, %25 : vector<128x256xf32>
    %27 = arith.index_cast %7 : i32 to index
    %c3 = arith.constant 3 : index
    %c0_24 = arith.constant 0 : index
    %28 = vector.load %arg5[%27, %c3, %c0_24] : memref<16x20x256xbf16, #tpu.memory_space<vmem>>, vector<8x16x256xbf16>
    %29 = vector.shape_cast %28 : vector<8x16x256xbf16> to vector<128x256xbf16>
    %c768 = arith.constant 768 : index
    %c0_25 = arith.constant 0 : index
    %30 = vector.load %arg2[%c768, %c0_25] : memref<1280x256xbf16, #tpu.memory_space<vmem>>, vector<256x256xbf16>
    %cst_26 = arith.constant dense<0.000000e+00> : vector<128x256xf32>
    %31 = tpu.matmul %29, %30, %cst_26 {dimension_numbers = #tpu.dot_dimension_numbers<[1], [0], [0], [1], [0, 0, 1, 1], [], []>} : vector<128x256xbf16>, vector<256x256xbf16>, vector<128x256xf32> -> vector<128x256xf32>
    %32 = arith.addf %26, %31 : vector<128x256xf32>
    %33 = arith.index_cast %7 : i32 to index
    %c4 = arith.constant 4 : index
    %c0_27 = arith.constant 0 : index
    %34 = vector.load %arg5[%33, %c4, %c0_27] : memref<16x20x256xbf16, #tpu.memory_space<vmem>>, vector<8x16x256xbf16>
    %35 = vector.shape_cast %34 : vector<8x16x256xbf16> to vector<128x256xbf16>
    %c1024 = arith.constant 1024 : index
    %c0_28 = arith.constant 0 : index
    %36 = vector.load %arg2[%c1024, %c0_28] : memref<1280x256xbf16, #tpu.memory_space<vmem>>, vector<256x256xbf16>
    %cst_29 = arith.constant dense<0.000000e+00> : vector<128x256xf32>
    %37 = tpu.matmul %35, %36, %cst_29 {dimension_numbers = #tpu.dot_dimension_numbers<[1], [0], [0], [1], [0, 0, 1, 1], [], []>} : vector<128x256xbf16>, vector<256x256xbf16>, vector<128x256xf32> -> vector<128x256xf32>
    %38 = arith.addf %32, %37 : vector<128x256xf32>
    %39 = vector.broadcast %5 : vector<1x256xf32> to vector<128x256xf32>
    %40 = arith.addf %38, %39 : vector<128x256xf32>
    %cst_30 = arith.constant 0.000000e+00 : f32
    %41 = vector.broadcast %cst_30 : f32 to vector<128x256xf32>
    %42 = arith.maximumf %40, %41 : vector<128x256xf32>
    %43 = vector.shape_cast %42 : vector<128x256xf32> to vector<8x16x256xf32>
    %44 = arith.index_cast %7 : i32 to index
    %c0_31 = arith.constant 0 : index
    %c0_32 = arith.constant 0 : index
    %45 = vector.load %arg4[%44, %c0_31, %c0_32] : memref<16x16x256xf32, #tpu.memory_space<vmem>>, vector<8x16x256xf32>
    tpu.vector_store %arg4[%44, %c0_31, %c0_32], %43 {strides = array<i32>} : memref<16x16x256xf32, #tpu.memory_space<vmem>>, vector<8x16x256xf32>,
    %c1_i32 = arith.constant 1 : i32
    %c8_i32_33 = arith.constant 8 : i32
    %46 = arith.muli %c1_i32, %c8_i32_33 : i32
    %47 = tpu.assume_multiple %46, 8 : i32
    %cst_34 = arith.constant 0.000000e+00 : f32
    %48 = vector.broadcast %cst_34 : f32 to vector<128x256xf32>
    %49 = arith.index_cast %47 : i32 to index
    %c0_35 = arith.constant 0 : index
    %c0_36 = arith.constant 0 : index
    %50 = vector.load %arg5[%49, %c0_35, %c0_36] : memref<16x20x256xbf16, #tpu.memory_space<vmem>>, vector<8x16x256xbf16>
    %51 = vector.shape_cast %50 : vector<8x16x256xbf16> to vector<128x256xbf16>
    %c0_37 = arith.constant 0 : index
    %c0_38 = arith.constant 0 : index
    %52 = vector.load %arg2[%c0_37, %c0_38] : memref<1280x256xbf16, #tpu.memory_space<vmem>>, vector<256x256xbf16>
    %cst_39 = arith.constant dense<0.000000e+00> : vector<128x256xf32>
    %53 = tpu.matmul %51, %52, %cst_39 {dimension_numbers = #tpu.dot_dimension_numbers<[1], [0], [0], [1], [0, 0, 1, 1], [], []>} : vector<128x256xbf16>, vector<256x256xbf16>, vector<128x256xf32> -> vector<128x256xf32>
    %54 = arith.addf %48, %53 : vector<128x256xf32>
    %55 = arith.index_cast %47 : i32 to index
    %c1_40 = arith.constant 1 : index
    %c0_41 = arith.constant 0 : index
    %56 = vector.load %arg5[%55, %c1_40, %c0_41] : memref<16x20x256xbf16, #tpu.memory_space<vmem>>, vector<8x16x256xbf16>
    %57 = vector.shape_cast %56 : vector<8x16x256xbf16> to vector<128x256xbf16>
    %c256_42 = arith.constant 256 : index
    %c0_43 = arith.constant 0 : index
    %58 = vector.load %arg2[%c256_42, %c0_43] : memref<1280x256xbf16, #tpu.memory_space<vmem>>, vector<256x256xbf16>
    %cst_44 = arith.constant dense<0.000000e+00> : vector<128x256xf32>
    %59 = tpu.matmul %57, %58, %cst_44 {dimension_numbers = #tpu.dot_dimension_numbers<[1], [0], [0], [1], [0, 0, 1, 1], [], []>} : vector<128x256xbf16>, vector<256x256xbf16>, vector<128x256xf32> -> vector<128x256xf32>
    %60 = arith.addf %54, %59 : vector<128x256xf32>
    %61 = arith.index_cast %47 : i32 to index
    %c2_45 = arith.constant 2 : index
    %c0_46 = arith.constant 0 : index
    %62 = vector.load %arg5[%61, %c2_45, %c0_46] : memref<16x20x256xbf16, #tpu.memory_space<vmem>>, vector<8x16x256xbf16>
    %63 = vector.shape_cast %62 : vector<8x16x256xbf16> to vector<128x256xbf16>
    %c512_47 = arith.constant 512 : index
    %c0_48 = arith.constant 0 : index
    %64 = vector.load %arg2[%c512_47, %c0_48] : memref<1280x256xbf16, #tpu.memory_space<vmem>>, vector<256x256xbf16>
    %cst_49 = arith.constant dense<0.000000e+00> : vector<128x256xf32>
    %65 = tpu.matmul %63, %64, %cst_49 {dimension_numbers = #tpu.dot_dimension_numbers<[1], [0], [0], [1], [0, 0, 1, 1], [], []>} : vector<128x256xbf16>, vector<256x256xbf16>, vector<128x256xf32> -> vector<128x256xf32>
    %66 = arith.addf %60, %65 : vector<128x256xf32>
    %67 = arith.index_cast %47 : i32 to index
    %c3_50 = arith.constant 3 : index
    %c0_51 = arith.constant 0 : index
    %68 = vector.load %arg5[%67, %c3_50, %c0_51] : memref<16x20x256xbf16, #tpu.memory_space<vmem>>, vector<8x16x256xbf16>
    %69 = vector.shape_cast %68 : vector<8x16x256xbf16> to vector<128x256xbf16>
    %c768_52 = arith.constant 768 : index
    %c0_53 = arith.constant 0 : index
    %70 = vector.load %arg2[%c768_52, %c0_53] : memref<1280x256xbf16, #tpu.memory_space<vmem>>, vector<256x256xbf16>
    %cst_54 = arith.constant dense<0.000000e+00> : vector<128x256xf32>
    %71 = tpu.matmul %69, %70, %cst_54 {dimension_numbers = #tpu.dot_dimension_numbers<[1], [0], [0], [1], [0, 0, 1, 1], [], []>} : vector<128x256xbf16>, vector<256x256xbf16>, vector<128x256xf32> -> vector<128x256xf32>
    %72 = arith.addf %66, %71 : vector<128x256xf32>
    %73 = arith.index_cast %47 : i32 to index
    %c4_55 = arith.constant 4 : index
    %c0_56 = arith.constant 0 : index
    %74 = vector.load %arg5[%73, %c4_55, %c0_56] : memref<16x20x256xbf16, #tpu.memory_space<vmem>>, vector<8x16x256xbf16>
    %75 = vector.shape_cast %74 : vector<8x16x256xbf16> to vector<128x256xbf16>
    %c1024_57 = arith.constant 1024 : index
    %c0_58 = arith.constant 0 : index
    %76 = vector.load %arg2[%c1024_57, %c0_58] : memref<1280x256xbf16, #tpu.memory_space<vmem>>, vector<256x256xbf16>
    %cst_59 = arith.constant dense<0.000000e+00> : vector<128x256xf32>
    %77 = tpu.matmul %75, %76, %cst_59 {dimension_numbers = #tpu.dot_dimension_numbers<[1], [0], [0], [1], [0, 0, 1, 1], [], []>} : vector<128x256xbf16>, vector<256x256xbf16>, vector<128x256xf32> -> vector<128x256xf32>
    %78 = arith.addf %72, %77 : vector<128x256xf32>
    %79 = vector.broadcast %5 : vector<1x256xf32> to vector<128x256xf32>
    %80 = arith.addf %78, %79 : vector<128x256xf32>
    %cst_60 = arith.constant 0.000000e+00 : f32
    %81 = vector.broadcast %cst_60 : f32 to vector<128x256xf32>
    %82 = arith.maximumf %80, %81 : vector<128x256xf32>
    %83 = vector.shape_cast %82 : vector<128x256xf32> to vector<8x16x256xf32>
    %84 = arith.index_cast %47 : i32 to index
    %c0_61 = arith.constant 0 : index
    %c0_62 = arith.constant 0 : index
    %85 = vector.load %arg4[%84, %c0_61, %c0_62] : memref<16x16x256xf32, #tpu.memory_space<vmem>>, vector<8x16x256xf32>
    tpu.vector_store %arg4[%84, %c0_61, %c0_62], %83 {strides = array<i32>} : memref<16x16x256xf32, #tpu.memory_space<vmem>>, vector<8x16x256xf32>,
    %c2_i32 = arith.constant 2 : i32
    return
  }
  func.func @transform_0(%arg0: i32) -> (i32, i32, i32) {
    %c0_i32 = arith.constant 0 : i32
    %c0_i32_0 = arith.constant 0 : i32
    %c0_i32_1 = arith.constant 0 : i32
    return %arg0, %c0_i32, %c0_i32_0 : i32, i32, i32
  }
  func.func @transform_1(%arg0: i32) -> (i32, i32) {
    %c0_i32 = arith.constant 0 : i32
    %c0_i32_0 = arith.constant 0 : i32
    %c0_i32_1 = arith.constant 0 : i32
    return %c0_i32, %c0_i32_0 : i32, i32
  }
  func.func @transform_2(%arg0: i32) -> (i32, i32) {
    %c0_i32 = arith.constant 0 : i32
    %c0_i32_0 = arith.constant 0 : i32
    %c0_i32_1 = arith.constant 0 : i32
    return %c0_i32, %c0_i32_0 : i32, i32
  }
  func.func @transform_3(%arg0: i32) -> (i32, i32, i32) {
    %c0_i32 = arith.constant 0 : i32
    %c0_i32_0 = arith.constant 0 : i32
    %c0_i32_1 = arith.constant 0 : i32
    return %arg0, %c0_i32, %c0_i32_0 : i32, i32, i32
  }
}

</mosaic_0001>

<bundles_post_ra>
// kernel: conv_forward.1
= control target key start
LH: loop header
LB: loop body
LE: loop exit
PB: predicated region body
PF: predicated region fallthrough
CT: control target
= control target key end

     0   :  { %v6675_v2 = vmov 0   ;;  %vm112_vm0 = vcmask 1040384   ;;  %vm113_vm1 = vcmask 1044484   ;;  %vm351_vm3 = vsmask.f32 3328  ;;  %s8760_s0 = inlined_call_operand.vmem [shape: bf16[16,16,256], index: 0, kind: input, shape index: {}]   ;;  %s8761_s1 = inlined_call_operand.vmem [shape: bf16[1280,256], index: 1, kind: input, shape index: {}]   ;;  %s8762_s2 = inlined_call_operand.vmem [shape: f32[1,256], index: 2, kind: input, shape index: {}]   ;;  %s8763_s3 = inlined_call_operand.hbm [shape: f32[16,16,256], index: 3, kind: output, shape index: {}]  }
   0x1   :  { %v6359_v0 = vld [vmem:[%s8761_s1 + $0x104] ss:$8 sps:$4 sm:$0xff]   ;;  %v6361_v1 = vld [vmem:[%s8761_s1 + $0x100] ss:$8 sps:$4 sm:$0xff]   ;;  %16 = vst [vmem:[#allocation2] sm:$0x11] %v6675_v2  ;;  %vm6753_vm2 = vmor %vm112_vm0, %vm113_vm1 }
   0x2   :  { %17 = vst [vmem:[#allocation2 + $0x18] sm:$0x11] %v6675_v2  ;;  %18 = vst [vmem:[#allocation2 + $0x30] sm:$0x11] %v6675_v2  ;;  %802 = vmatprep.subr.bf16.mxu0 %v6359_v0  ;;  %3449 = vmatprep.subr.bf16.mxu1 %v6359_v0  ;;  %v6362_v3 = vld [vmem:[%s8761_s1 + $0x114] ss:$8 sps:$4 sm:$0xff]  }
   0x3   :  { %19 = vst [vmem:[#allocation2 + $0x48] sm:$0x11] %v6675_v2  ;;  %20 = vst [vmem:[#allocation2 + $0x60] sm:$0x11] %v6675_v2  ;;  %803 = vmatpush1.bf16.msra.mxu0 %v6361_v1  ;;  %3450 = vmatpush1.bf16.msra.mxu1 %v6361_v1  ;;  %v6364_v4 = vld [vmem:[%s8761_s1 + $0x110] ss:$8 sps:$4 sm:$0xff]  }
   0x4   :  { %21 = vst [vmem:[#allocation2 + $0x78] sm:$0x11] %v6675_v2  ;;  %22 = vst [vmem:[#allocation2 + $0x90] sm:$0x11] %v6675_v2  ;;  %804 = vmatprep.subr.bf16.mxu0 %v6362_v3  ;;  %3451 = vmatprep.subr.bf16.mxu1 %v6362_v3  ;;  %v6365_v5 = vld [vmem:[%s8761_s1 + $0x124] ss:$8 sps:$4 sm:$0xff]  }
   0x5   :  { %23 = vst [vmem:[#allocation2 + $0xa8] sm:$0x11] %v6675_v2  ;;  %24 = vst [vmem:[#allocation2 + $0xc0] sm:$0x11] %v6675_v2  ;;  %v6367_v6 = vld [vmem:[%s8761_s1 + $0x120] ss:$8 sps:$4 sm:$0xff]  }
   0x6   :  { %25 = vst [vmem:[#allocation2 + $0xd8] sm:$0x11] %v6675_v2  ;;  %26 = vst [vmem:[#allocation2 + $0xf0] sm:$0x11] %v6675_v2  ;;  %v6368_v7 = vld [vmem:[%s8761_s1 + $0x134] ss:$8 sps:$4 sm:$0xff]  }
   0x7   :  { %27 = vst [vmem:[#allocation2 + $0x108] sm:$0x11] %v6675_v2  ;;  %28 = vst [vmem:[#allocation2 + $0x120] sm:$0x11] %v6675_v2  ;;  %805 = vmatpush1.bf16.msra.mxu0 %v6364_v4  ;;  %3452 = vmatpush1.bf16.msra.mxu1 %v6364_v4  ;;  %v6370_v8 = vld [vmem:[%s8761_s1 + $0x130] ss:$8 sps:$4 sm:$0xff]  }
   0x8   :  { %29 = vst [vmem:[#allocation2 + $0x138] sm:$0x11] %v6675_v2  ;;  %30 = vst [vmem:[#allocation2 + $0x150] sm:$0x11] %v6675_v2  ;;  %806 = vmatprep.subr.bf16.mxu0 %v6365_v5  ;;  %3453 = vmatprep.subr.bf16.mxu1 %v6365_v5  ;;  %v6371_v9 = vld [vmem:[%s8761_s1 + $0x144] ss:$8 sps:$4 sm:$0xff]  }
   0x9   :  { %31 = vst [vmem:[#allocation2 + $0x168] sm:$0x11] %v6675_v2  ;;  %32 = vst [vmem:[#allocation2 + $0x10] sm:$0x22] %v6675_v2  ;;  %v6373_v10 = vld [vmem:[%s8761_s1 + $0x140] ss:$8 sps:$4 sm:$0xff]  }
   0xa   :  { %33 = vst [vmem:[#allocation2 + $0x28] sm:$0x22] %v6675_v2  ;;  %34 = vst [vmem:[#allocation2 + $0x40] sm:$0x22] %v6675_v2  ;;  %v6374_v11 = vld [vmem:[%s8761_s1 + $0x154] ss:$8 sps:$4 sm:$0xff]  }
   0xb   :  { %35 = vst [vmem:[#allocation2 + $0x58] sm:$0x22] %v6675_v2  ;;  %36 = vst [vmem:[#allocation2 + $0x70] sm:$0x22] %v6675_v2  ;;  %807 = vmatpush1.bf16.msra.mxu0 %v6367_v6  ;;  %3454 = vmatpush1.bf16.msra.mxu1 %v6367_v6  ;;  %v6376_v12 = vld [vmem:[%s8761_s1 + $0x150] ss:$8 sps:$4 sm:$0xff]  }
   0xc   :  { %37 = vst [vmem:[#allocation2 + $0x88] sm:$0x22] %v6675_v2  ;;  %38 = vst [vmem:[#allocation2 + $0xa0] sm:$0x22] %v6675_v2  ;;  %808 = vmatprep.subr.bf16.mxu0 %v6368_v7  ;;  %3455 = vmatprep.subr.bf16.mxu1 %v6368_v7  ;;  %v6377_v13 = vld [vmem:[%s8761_s1 + $0x164] ss:$8 sps:$4 sm:$0xff]  }
   0xd   :  { %39 = vst [vmem:[#allocation2 + $0xb8] sm:$0x22] %v6675_v2  ;;  %40 = vst [vmem:[#allocation2 + $0xd0] sm:$0x22] %v6675_v2  ;;  %v48_v14 = vld [vmem:[%s8760_s0] sm:$0xff]  ;;  %v49_v15 = vld [vmem:[%s8760_s0 + $0x8] sm:$0xff] }
   0xe   :  { %41 = vst [vmem:[#allocation2 + $0xe8] sm:$0x22] %v6675_v2  ;;  %42 = vst [vmem:[#allocation2 + $0x100] sm:$0x22] %v6675_v2  ;;  %v6379_v16 = vld [vmem:[%s8761_s1 + $0x160] ss:$8 sps:$4 sm:$0xff]  }
   0xf   :  { %43 = vst [vmem:[#allocation2 + $0x118] sm:$0x22] %v6675_v2  ;;  %44 = vst [vmem:[#allocation2 + $0x130] sm:$0x22] %v6675_v2  ;;  %809 = vmatpush1.bf16.msra.mxu0 %v6370_v8  ;;  %3456 = vmatpush1.bf16.msra.mxu1 %v6370_v8  ;;  %v115_v17 = vrot.slane %v48_v14, 7  ;;  %v117_v18 = vrot.slane %v49_v15, 7 }
  0x10   :  { %45 = vst [vmem:[#allocation2 + $0x148] sm:$0x22] %v6675_v2  ;;  %46 = vst [vmem:[#allocation2 + $0x160] sm:$0x22] %v6675_v2  ;;  %810 = vmatprep.subr.bf16.mxu0 %v6371_v9  ;;  %3457 = vmatprep.subr.bf16.mxu1 %v6371_v9  ;;  %v64_v19 = vld [vmem:[%s8760_s0 + $0x80] sm:$0xff]  ;;  %v65_v20 = vld [vmem:[%s8760_s0 + $0x88] sm:$0xff] }
  0x11   :  { %47 = vst [vmem:[#allocation2 + $0x178] sm:$0x22] %v6675_v2  ;;  %v155_v22 = vrot.slane %v64_v19, 7  ;;  %v157_v23 = vrot.slane %v65_v20, 7  ;;  %v6380_v24 = vld [vmem:[%s8761_s1 + $0x174] ss:$8 sps:$4 sm:$0xff]  }
  0x12   :  { %v116_v25 = vrot.slane %v115_v17, 4  ;;  %v119_v26 = vrot.slane %v117_v18, 4  ;;  %243 = vst [vmem:[#allocation2] sm:$0xee] %v115_v17  ;;  %v6382_v27 = vld [vmem:[%s8761_s1 + $0x170] ss:$8 sps:$4 sm:$0xff]  }
  0x13   :  { %811 = vmatpush1.bf16.msra.mxu0 %v6373_v10  ;;  %3458 = vmatpush1.bf16.msra.mxu1 %v6373_v10  ;;  %v156_v28 = vrot.slane %v155_v22, 4  ;;  %v159_v29 = vrot.slane %v157_v23, 4  ;;  %267 = vst [vmem:[#allocation2 + $0xc0] sm:$0xee] %v155_v22  ;;  %v6383_v30 = vld [vmem:[%s8761_s1 + $0x184] ss:$8 sps:$4 sm:$0xff]  }
  0x14   :  { %812 = vmatprep.subr.bf16.mxu0 %v6374_v11  ;;  %3459 = vmatprep.subr.bf16.mxu1 %v6374_v11  ;;  %v6768_v31 = vsel %vm6753_vm2, %v116_v25, %v117_v18  ;;  %245 = vst [vmem:[#allocation2 + $0x10] sm:$0x11] %v119_v26  ;;  %v50_v32 = vld [vmem:[%s8760_s0 + $0x10] sm:$0xff]  ;;  %v51_v33 = vld [vmem:[%s8760_s0 + $0x18] sm:$0xff]  ;;  %v6385_v46 = vld [vmem:[%s8761_s1 + $0x180] ss:$8 sps:$4 sm:$0xff]  }
  0x15   :  { %244 = vst [vmem:[#allocation2 + $0x8] sm:$0xff] %v6768_v31  ;;  %v364_v34 = vshll.u32 %v6768_v31, 16  ;;  %v8793_v35 = vshrl.u32 %v6768_v31, 16  ;;  %v6781_v36 = vsel %vm6753_vm2, %v156_v28, %v157_v23  ;;  %269 = vst [vmem:[#allocation2 + $0xd0] sm:$0x11] %v159_v29  ;;  %v120_v37 = vrot.slane %v50_v32, 7 }
  0x16   :  { %v66_v38 = vld [vmem:[%s8760_s0 + $0x90] sm:$0xff]  ;;  %268 = vst [vmem:[#allocation2 + $0xc8] sm:$0xff] %v6781_v36  ;;  %v8794_v39 = vshll.u32 %v6781_v36, 16  ;;  %v8792_v40 = vshrl.u32 %v6781_v36, 16  ;;  %v122_v41 = vrot.slane %v51_v33, 7  ;;  %v67_v59 = vld [vmem:[%s8760_s0 + $0x98] sm:$0xff] }
  0x17   :  { %813 = vmatpush1.bf16.msra.mxu0 %v6376_v12  ;;  %3460 = vmatpush1.bf16.msra.mxu1 %v6376_v12  ;;  %v160_v42 = vrot.slane %v66_v38, 7  ;;  %v6791_v43 = vrot.slane %v364_v34, 5  ;;  %v370_v44 = vrot.slane %v8793_v35, 4  ;;  %v121_v45 = vrot.slane %v120_v37, 4  ;;  %246 = vst [vmem:[#allocation2 + $0x18] sm:$0xee] %v120_v37 }
  0x18   :  { %814 = vmatprep.subr.bf16.mxu0 %v6377_v13  ;;  %3461 = vmatprep.subr.bf16.mxu1 %v6377_v13  ;;  %v6800_v47 = vrot.slane %v8794_v39, 5  ;;  %v3017_v48 = vrot.slane %v8792_v40, 4  ;;  %v124_v49 = vrot.slane %v122_v41, 4  ;;  %v6386_v50 = vld [vmem:[%s8761_s1 + $0x194] ss:$8 sps:$4 sm:$0xff]   ;;  %v162_v17 = vrot.slane %v67_v59, 7 }
  0x19   :  { %270 = vst [vmem:[#allocation2 + $0xd8] sm:$0xee] %v160_v42  ;;  %v295_v51 = vld [vmem:[#allocation2] sm:$0xff]  ;;  %vm352_vm4 = vsmask.f32 7440  ;;  %v371_v52 = vor.u32 %v370_v44, %v6791_v43  ;;  %v6810_v53 = vsel %vm6753_vm2, %v121_v45, %v122_v41  ;;  %v161_v0 = vrot.slane %v160_v42, 4 }
  0x1a   :  { %v355_v54 = vshrl.u32 %v295_v51, 16  ;;  %v358_v55 = vshll.u32 %v295_v51, 16  ;;  %v2945_v56 = vld [vmem:[#allocation2 + $0xc0] sm:$0xff]  ;;  %v3018_v57 = vor.u32 %v3017_v48, %v6800_v47  ;;  %247 = vst [vmem:[#allocation2 + $0x20] sm:$0xff] %v6810_v53  ;;  %248 = vst [vmem:[#allocation2 + $0x28] sm:$0x11] %v124_v49 }
  0x1b   :  { %815 = vmatpush1.bf16.msra.mxu0 %v6379_v16  ;;  %3462 = vmatpush1.bf16.msra.mxu1 %v6379_v16  ;;  %v8790_v58 = vshll.u32 %v6810_v53, 16  ;;  %v343_v60 = vld [vmem:[#allocation2 + $0x10] sm:$0x11]  ;;  %v372_v61 = vrot.slane %v371_v52, 4  ;;  %v3002_v62 = vshrl.u32 %v2945_v56, 16  ;;  %v3005_v63 = vshll.u32 %v2945_v56, 16  ;;  %vm6824_vm5 = vmor %vm351_vm3, %vm352_vm4 }
  0x1c   :  { %816 = vmatprep.subr.bf16.mxu0 %v6380_v24  ;;  %3463 = vmatprep.subr.bf16.mxu1 %v6380_v24  ;;  %v357_v1 = vrot.slane %v355_v54, 4  ;;  %v360_v2 = vrot.slane %v358_v55, 5  ;;  %v374_v3 = vshll.u32 %v343_v60, 16  ;;  %v2993_v4 = vld [vmem:[#allocation2 + $0xd0] sm:$0x11]  ;;  %v8791_v5 = vshrl.u32 %v6810_v53, 16 }
  0x1d   :  { %v6388_v6 = vld [vmem:[%s8761_s1 + $0x190] ss:$8 sps:$4 sm:$0xff]   ;;  %v3004_v8 = vrot.slane %v3002_v62, 4  ;;  %v3007_v9 = vrot.slane %v3005_v63, 5  ;;  %v3019_v10 = vrot.slane %v3018_v57, 4  ;;  %v3021_v11 = vshll.u32 %v2993_v4, 16 }
  0x1e   :  { %v6389_v12 = vld [vmem:[%s8761_s1 + $0x1a4] ss:$8 sps:$4 sm:$0xff]   ;;  %v361_v13 = vor.u32 %v360_v2, %v357_v1  ;;  %v376_v14 = vrot.slane %v374_v3, 5  ;;  %v297_v15 = vld [vmem:[#allocation2 + $0x18] sm:$0xff]  ;;  %v390_v16 = vrot.slane %v8790_v58, 5  ;;  %v394_v26 = vrot.slane %v8791_v5, 4 }
  0x1f   :  { %817 = vmatpush1.bf16.msra.mxu0 %v6382_v27  ;;  %3464 = vmatpush1.bf16.msra.mxu1 %v6382_v27  ;;  %v3008_v18 = vor.u32 %v3007_v9, %v3004_v8  ;;  %v3023_v19 = vrot.slane %v3021_v11, 5  ;;  %v379_v20 = vshrl.u32 %v297_v15, 16  ;;  %v382_v22 = vshll.u32 %v297_v15, 16  ;;  %v6391_v23 = vld [vmem:[%s8761_s1 + $0x1a0] ss:$8 sps:$4 sm:$0xff]   ;;  %v54_v9 = vld [vmem:[%s8760_s0 + $0x30] sm:$0xff] }
  0x20   :  { %818 = vmatprep.subr.bf16.mxu0 %v6383_v30  ;;  %3465 = vmatprep.subr.bf16.mxu1 %v6383_v30  ;;  %v362_v24 = vrot.slane %v361_v13, 4  ;;  %v6838_v25 = vsel %vm6824_vm5, %v372_v61, %v376_v14  ;;  %v6844_v27 = vsel %vm6753_vm2, %v161_v0, %v162_v17  ;;  %v6392_v37 = vld [vmem:[%s8761_s1 + $0x1b4] ss:$8 sps:$4 sm:$0xff]   ;;  %v395_v41 = vor.u32 %v394_v26, %v390_v16  ;;  %v6394_v51 = vld [vmem:[%s8761_s1 + $0x1b0] ss:$8 sps:$4 sm:$0xff]   ;;  %v68_v1 = vld [vmem:[%s8760_s0 + $0xa0] sm:$0xff] }
  0x21   :  { %v3009_v28 = vrot.slane %v3008_v18, 4  ;;  %v6848_v29 = vsel %vm6824_vm5, %v3019_v10, %v3023_v19  ;;  %v344_v30 = vld [vmem:[#allocation2 + $0x28] sm:$0x11]  ;;  %v381_v32 = vrot.slane %v379_v20, 4  ;;  %v384_v33 = vrot.slane %v382_v22, 5  ;;  %271 = vst [vmem:[#allocation2 + $0xe0] sm:$0xff] %v6844_v27 }
  0x22   :  { %v6857_v38 = vsel %vm6824_vm5, %v362_v24, %v6791_v43  ;;  %v398_v42 = vshll.u32 %v344_v30, 16  ;;  %v164_v44 = vrot.slane %v162_v17, 4  ;;  %v2947_v45 = vld [vmem:[#allocation2 + $0xd8] sm:$0xff]  ;;  %v53_v43 = vld [vmem:[%s8760_s0 + $0x28] sm:$0xff]  ;;  %v396_v54 = vrot.slane %v395_v41, 4 }
  0x23   :  { %819 = vmatpush1.bf16.msra.mxu0 %v6385_v46  ;;  %3466 = vmatpush1.bf16.msra.mxu1 %v6385_v46  ;;  %v5588_v46 = vcombine.high %v6857_v38, %v6838_v25  ;;  %v6864_v48 = vsel %vm6824_vm5, %v3009_v28, %v6800_v47  ;;  %v385_v49 = vor.u32 %v384_v33, %v381_v32  ;;  %v6395_v47 = vld [vmem:[%s8761_s1 + $0x1c4] ss:$8 sps:$4 sm:$0xff]   ;;  %v3026_v57 = vshrl.u32 %v2947_v45, 16  ;;  %v55_v10 = vld [vmem:[%s8760_s0 + $0x38] sm:$0xff]  ;;  %v6397_v15 = vld [vmem:[%s8761_s1 + $0x1c0] ss:$8 sps:$4 sm:$0xff]  }
  0x24   :  { %820 = vmatprep.subr.bf16.mxu0 %v6386_v50  ;;  %3467 = vmatprep.subr.bf16.mxu1 %v6386_v50  ;;  %v52_v50 = vld [vmem:[%s8760_s0 + $0x20] sm:$0xff]  ;;  %v5844_v52 = vcombine.high %v6864_v48, %v6848_v29  ;;  %v400_v55 = vrot.slane %v398_v42, 5  ;;  %272 = vst [vmem:[#allocation2 + $0xe8] sm:$0x11] %v164_v44  ;;  %v3029_v59 = vshll.u32 %v2947_v45, 16  ;;  %v8788_v60 = vshll.u32 %v6844_v27, 16 }
  0x25   :  { %v386_v56 = vrot.slane %v385_v49, 4  ;;  %v5587_v61 = vcombine.low %v6857_v38, %v6838_v25  ;;  %v8789_v62 = vshrl.u32 %v6844_v27, 16  ;;  %v125_v63 = vrot.slane %v52_v50, 7  ;;  %v69_v2 = vld [vmem:[%s8760_s0 + $0xa8] sm:$0xff]  ;;  %834 = vmatprep.mubr.bf16.mxu0 %v5588_v46  ;;  %v6398_v20 = vld [vmem:[%s8761_s1 + $0x1d4] ss:$8 sps:$4 sm:$0xff]  }
  0x26   :  { %v127_v0 = vrot.slane %v53_v43, 7  ;;  %v5843_v3 = vcombine.low %v6864_v48, %v6848_v29  ;;  %3481 = vmatprep.mubr.bf16.mxu1 %v5844_v52  ;;  %v3028_v4 = vrot.slane %v3026_v57, 4  ;;  %v3037_v8 = vrot.slane %v8788_v60, 5  ;;  %v6400_v46 = vld [vmem:[%s8761_s1 + $0x1d0] ss:$8 sps:$4 sm:$0xff]  }
  0x27   :  { %821 = vmatpush1.bf16.msra.mxu0 %v6388_v6  ;;  %3468 = vmatpush1.bf16.msra.mxu1 %v6388_v6  ;;  %v3031_v6 = vrot.slane %v3029_v59, 5  ;;  %v6902_v11 = vsel %vm6824_vm5, %v386_v56, %v390_v16  ;;  %v3041_v13 = vrot.slane %v8789_v62, 4  ;;  %v126_v14 = vrot.slane %v125_v63, 4  ;;  %249 = vst [vmem:[#allocation2 + $0x30] sm:$0xee] %v125_v63 }
  0x28   :  { %822 = vmatprep.subr.bf16.mxu0 %v6389_v12  ;;  %3469 = vmatprep.subr.bf16.mxu1 %v6389_v12  ;;  %v6906_v12 = vsel %vm6824_vm5, %v396_v54, %v400_v55  ;;  %v129_v18 = vrot.slane %v127_v0, 4  ;;  %v165_v19 = vrot.slane %v68_v1, 7  ;;  %v167_v16 = vrot.slane %v69_v2, 7  ;;  %v6401_v52 = vld [vmem:[%s8761_s1 + $0x1e4] ss:$8 sps:$4 sm:$0xff]  }
  0x29   :  { %v3032_v17 = vor.u32 %v3031_v6, %v3028_v4  ;;  %v3042_v22 = vor.u32 %v3041_v13, %v3037_v8  ;;  %v130_v24 = vrot.slane %v54_v9, 7  ;;  %v132_v26 = vrot.slane %v55_v10, 7  ;;  %v6403_v9 = vld [vmem:[%s8761_s1 + $0x1e0] ss:$8 sps:$4 sm:$0xff]   ;;  %v6404_v10 = vld [vmem:[%s8761_s1 + $0x1f4] ss:$8 sps:$4 sm:$0xff]  }
  0x2a   :  { %251 = vst [vmem:[#allocation2 + $0x40] sm:$0x11] %v129_v18  ;;  %273 = vst [vmem:[#allocation2 + $0xf0] sm:$0xee] %v165_v19  ;;  %v169_v44 = vrot.slane %v167_v16, 4  ;;  %v5590_v13 = vcombine.high %v6902_v11, %v6906_v12 }
  0x2b   :  { %823 = vmatpush1.bf16.msra.mxu0 %v6391_v23  ;;  %3470 = vmatpush1.bf16.msra.mxu1 %v6391_v23  ;;  %v6918_v23 = vsel %vm6753_vm2, %v126_v14, %v127_v0  ;;  %v2994_v28 = vld [vmem:[#allocation2 + $0xe8] sm:$0x11]  ;;  %v3033_v30 = vrot.slane %v3032_v17, 4  ;;  %v3043_v41 = vrot.slane %v3042_v22, 4  ;;  %v131_v45 = vrot.slane %v130_v24, 4 }
  0x2c   :  { %824 = vmatprep.subr.bf16.mxu0 %v6392_v37  ;;  %3471 = vmatprep.subr.bf16.mxu1 %v6392_v37  ;;  %250 = vst [vmem:[#allocation2 + $0x38] sm:$0xff] %v6918_v23  ;;  %v8786_v32 = vshll.u32 %v6918_v23, 16  ;;  %v8787_v33 = vshrl.u32 %v6918_v23, 16  ;;  %v166_v37 = vrot.slane %v165_v19, 4  ;;  %v3045_v42 = vshll.u32 %v2994_v28, 16 }
  0x2d   :  { %252 = vst [vmem:[#allocation2 + $0x48] sm:$0xee] %v130_v24  ;;  %v6928_v49 = vsel %vm6824_vm5, %v3033_v30, %v3037_v8  ;;  %275 = vst [vmem:[#allocation2 + $0x100] sm:$0x11] %v169_v44  ;;  %v6948_v56 = vsel %vm6753_vm2, %v131_v45, %v132_v26  ;;  %v134_v63 = vrot.slane %v132_v26, 4  ;;  %v5589_v14 = vcombine.low %v6902_v11, %v6906_v12 }
  0x2e   :  { %v6932_v50 = vrot.slane %v8786_v32, 5  ;;  %v418_v43 = vrot.slane %v8787_v33, 4  ;;  %v3047_v54 = vrot.slane %v3045_v42, 5  ;;  %v299_v57 = vld [vmem:[#allocation2 + $0x30] sm:$0xff]  ;;  %253 = vst [vmem:[#allocation2 + $0x50] sm:$0xff] %v6948_v56  ;;  %v8768_v0 = vshll.u32 %v6948_v56, 16 }
  0x2f   :  { %825 = vmatpush1.bf16.msra.mxu0 %v6394_v51  ;;  %3472 = vmatpush1.bf16.msra.mxu1 %v6394_v51  ;;  %v6938_v51 = vsel %vm6753_vm2, %v166_v37, %v167_v16  ;;  %v8771_v1 = vshrl.u32 %v6948_v56, 16  ;;  %v403_v4 = vshrl.u32 %v299_v57, 16  ;;  %v406_v6 = vshll.u32 %v299_v57, 16  ;;  %254 = vst [vmem:[#allocation2 + $0x58] sm:$0x11] %v134_v63 }
  0x30   :  { %826 = vmatprep.subr.bf16.mxu0 %v6395_v47  ;;  %3473 = vmatprep.subr.bf16.mxu1 %v6395_v47  ;;  %274 = vst [vmem:[#allocation2 + $0xf8] sm:$0xff] %v6938_v51  ;;  %v8778_v55 = vshll.u32 %v6938_v51, 16  ;;  %v8779_v47 = vshrl.u32 %v6938_v51, 16  ;;  %v419_v59 = vor.u32 %v418_v43, %v6932_v50  ;;  %v6956_v2 = vsel %vm6824_vm5, %v3043_v41, %v3047_v54  ;;  %v6406_v26 = vld [vmem:[%s8761_s1 + $0x1f0] ss:$8 sps:$4 sm:$0xff]  }
  0x31   :  { %v5846_v18 = vcombine.high %v6928_v49, %v6956_v2  ;;  %v345_v19 = vld [vmem:[#allocation2 + $0x40] sm:$0x11]  ;;  %v405_v16 = vrot.slane %v403_v4, 4  ;;  %v2949_v22 = vld [vmem:[#allocation2 + $0xf0] sm:$0xff]  ;;  %v6978_v24 = vrot.slane %v8768_v0, 5  ;;  %v442_v43 = vrot.slane %v8771_v1, 4 }
  0x32   :  { %v6960_v8 = vrot.slane %v8778_v55, 5  ;;  %v3065_v17 = vrot.slane %v8779_v47, 4  ;;  %v422_v28 = vshll.u32 %v345_v19, 16  ;;  %v3050_v30 = vshrl.u32 %v2949_v22, 16  ;;  %v71_v54 = vld [vmem:[%s8760_s0 + $0xb8] sm:$0xff] }
  0x33   :  { %827 = vmatpush1.bf16.msra.mxu0 %v6397_v15  ;;  %3474 = vmatpush1.bf16.msra.mxu1 %v6397_v15  ;;  %v420_v15 = vrot.slane %v419_v59, 4  ;;  %v3053_v37 = vshll.u32 %v2949_v22, 16  ;;  %v6421_v11 = vld [vmem:[%s8761_s1 + $0x44] ss:$8 sps:$4 sm:$0xff]   ;;  %v6455_v7 = vld [vmem:[%s8761_s1 + $0x200] ss:$8 sps:$4 sm:$0xff]  }
  0x34   :  { %828 = vmatprep.subr.bf16.mxu0 %v6398_v20  ;;  %3475 = vmatprep.subr.bf16.mxu1 %v6398_v20  ;;  %v408_v20 = vrot.slane %v406_v6, 5  ;;  %v3066_v41 = vor.u32 %v3065_v17, %v6960_v8  ;;  %v301_v42 = vld [vmem:[#allocation2 + $0x48] sm:$0xff]  ;;  %v424_v57 = vrot.slane %v422_v28, 5  ;;  %v2995_v59 = vld [vmem:[#allocation2 + $0x100] sm:$0x11]  ;;  %v3052_v63 = vrot.slane %v3050_v30, 4 }
  0x35   :  { %v427_v45 = vshrl.u32 %v301_v42, 16  ;;  %v3055_v4 = vrot.slane %v3053_v37, 5  ;;  %v6409_v17 = vld [vmem:[%s8761_s1 + $0x4] ss:$8 sps:$4 sm:$0xff]   ;;  %v443_v28 = vor.u32 %v442_v43, %v6978_v24  ;;  %v6407_v43 = vld [vmem:[%s8761_s1] ss:$8 sps:$4 sm:$0xff]  }
  0x36   :  { %v409_v44 = vor.u32 %v408_v20, %v405_v16  ;;  %v3067_v6 = vrot.slane %v3066_v41, 4  ;;  %v3069_v16 = vshll.u32 %v2995_v59, 16  ;;  %v57_v37 = vld [vmem:[%s8760_s0 + $0x48] sm:$0xff] }
  0x37   :  { %829 = vmatpush1.bf16.msra.mxu0 %v6400_v46  ;;  %3476 = vmatpush1.bf16.msra.mxu1 %v6400_v46  ;;  %v430_v46 = vshll.u32 %v301_v42, 16  ;;  %v429_v20 = vrot.slane %v427_v45, 4  ;;  %v6997_v42 = vsel %vm6824_vm5, %v420_v15, %v424_v57  ;;  %v346_v15 = vld [vmem:[#allocation2 + $0x58] sm:$0x11]  ;;  %v5845_v57 = vcombine.low %v6928_v49, %v6956_v2 }
  0x38   :  { %830 = vmatprep.subr.bf16.mxu0 %v6401_v52  ;;  %3477 = vmatprep.subr.bf16.mxu1 %v6401_v52  ;;  %v70_v52 = vld [vmem:[%s8760_s0 + $0xb0] sm:$0xff]  ;;  %v410_v19 = vrot.slane %v409_v44, 4  ;;  %v3071_v44 = vrot.slane %v3069_v16, 5  ;;  %v72_v16 = vld [vmem:[%s8760_s0 + $0xc0] sm:$0xff] }
  0x39   :  { %v432_v22 = vrot.slane %v430_v46, 5  ;;  %v170_v30 = vrot.slane %v70_v52, 7  ;;  %v172_v46 = vrot.slane %v71_v54, 7  ;;  %v6412_v52 = vld [vmem:[%s8761_s1 + $0x14] ss:$8 sps:$4 sm:$0xff]  }
  0x3a   :  { %v7009_v41 = vsel %vm6824_vm5, %v410_v19, %v6932_v50 }
  0x3b   :  { %831 = vmatpush1.bf16.msra.mxu0 %v6403_v9  ;;  %3478 = vmatpush1.bf16.msra.mxu1 %v6403_v9  ;;  %v3056_v9 = vor.u32 %v3055_v4, %v3052_v63  ;;  %v433_v45 = vor.u32 %v432_v22, %v429_v20  ;;  %v5592_v50 = vcombine.high %v7009_v41, %v6997_v42  ;;  %v444_v63 = vrot.slane %v443_v28, 4 }
  0x3c   :  { %832 = vmatprep.subr.bf16.mxu0 %v6404_v10  ;;  %3479 = vmatprep.subr.bf16.mxu1 %v6404_v10  ;;  %v56_v10 = vld [vmem:[%s8760_s0 + $0x40] sm:$0xff]  ;;  %276 = vst [vmem:[#allocation2 + $0x108] sm:$0xee] %v170_v30  ;;  %v446_v4 = vshll.u32 %v346_v15, 16  ;;  %v171_v19 = vrot.slane %v170_v30, 4  ;;  %v174_v22 = vrot.slane %v172_v46, 4  ;;  %v5591_v30 = vcombine.low %v7009_v41, %v6997_v42 }
  0x3d   :  { %v3057_v59 = vrot.slane %v3056_v9, 4  ;;  %v434_v54 = vrot.slane %v433_v45, 4  ;;  %v135_v9 = vrot.slane %v56_v10, 7  ;;  %v137_v28 = vrot.slane %v57_v37, 7  ;;  %v6413_v45 = vld [vmem:[%s8761_s1 + $0x20] ss:$8 sps:$4 sm:$0xff]  }
  0x3e   :  { %v448_v25 = vrot.slane %v446_v4, 5  ;;  %v7056_v29 = vsel %vm6753_vm2, %v171_v19, %v172_v46  ;;  %278 = vst [vmem:[#allocation2 + $0x118] sm:$0x11] %v174_v22  ;;  %v6427_v42 = vld [vmem:[%s8761_s1 + $0x64] ss:$8 sps:$4 sm:$0xff]  }
  0x3f   :  { %833 = vmatpush1.bf16.msra.mxu0 %v6406_v26  ;;  %3480 = vmatpush1.bf16.msra.mxu1 %v6406_v26  ;;  %v7023_v26 = vsel %vm6824_vm5, %v3067_v6, %v3071_v44  ;;  %v7031_v20 = vsel %vm6824_vm5, %v3057_v59, %v6960_v8  ;;  %v73_v6 = vld [vmem:[%s8760_s0 + $0xc8] sm:$0xff]  ;;  %v6410_v8 = vld [vmem:[%s8761_s1 + $0x10] ss:$8 sps:$4 sm:$0xff]   ;;  %v7052_v10 = vsel %vm6824_vm5, %v434_v54, %v6978_v24  ;;  %v136_v38 = vrot.slane %v135_v9, 4 }
  0x40   :  { %1155 = vmatprep.subr.bf16.mxu0 %v6409_v17  ;;  %3802 = vmatprep.subr.bf16.mxu1 %v6409_v17  ;;  %v5848_v17 = vcombine.high %v7031_v20, %v7023_v26  ;;  %v139_v48 = vrot.slane %v137_v28, 4  ;;  %255 = vst [vmem:[#allocation2 + $0x60] sm:$0xee] %v135_v9  ;;  %v7063_v24 = vsel %vm6824_vm5, %v444_v63, %v448_v25  ;;  %277 = vst [vmem:[#allocation2 + $0x110] sm:$0xff] %v7056_v29 }
  0x41   :  { %v8764_v37 = vshll.u32 %v7056_v29, 16  ;;  %v8767_v44 = vshrl.u32 %v7056_v29, 16  ;;  %v177_v15 = vrot.slane %v73_v6, 7  ;;  %v5847_v46 = vcombine.low %v7031_v20, %v7023_v26  ;;  %v7108_v6 = vld [vmem:[%s8760_s0 + $0x58] sm:$0xff] }
  0x42   :  { %835 = vmatmul.mubr.bf16.vlgmr.msra.gmra.mrb[0].mxu0 %v5587_v61  ;;  %3482 = vmatmul.mubr.bf16.vlgmr.msra.gmra.mrb[0].mxu1 %v5843_v3  ;;  %v175_v61 = vrot.slane %v72_v16, 7  ;;  %v6415_v3 = vld [vmem:[%s8761_s1 + $0x24] ss:$8 sps:$4 sm:$0xff]   ;;  %257 = vst [vmem:[#allocation2 + $0x70] sm:$0x11] %v139_v48 }
  0x43   :  { %1156 = vmatpush1.bf16.msra.mxu0 %v6407_v43  ;;  %3803 = vmatpush1.bf16.msra.mxu1 %v6407_v43  ;;  %v5594_v43 = vcombine.high %v7052_v10, %v7063_v24  ;;  %v7088_v59 = vld [vmem:[#allocation2 + $0x108] sm:$0xff]  ;;  %v7092_v63 = vrot.slane %v8764_v37, 5  ;;  %v3089_v54 = vrot.slane %v8767_v44, 4 }
  0x44   :  { %1157 = vmatprep.subr.bf16.mxu0 %v6412_v52  ;;  %3804 = vmatprep.subr.bf16.mxu1 %v6412_v52  ;;  %v7083_v52 = vsel %vm6753_vm2, %v136_v38, %v137_v28  ;;  %279 = vst [vmem:[#allocation2 + $0x120] sm:$0xee] %v175_v61  ;;  %v3074_v16 = vshrl.u32 %v7088_v59, 16  ;;  %v3077_v22 = vshll.u32 %v7088_v59, 16  ;;  %v179_v28 = vrot.slane %v177_v15, 4 }
  0x45   :  { %844 = vmatprep.mubr.bf16.mxu0 %v5590_v13  ;;  %3491 = vmatprep.mubr.bf16.mxu1 %v5846_v18  ;;  %v176_v13 = vrot.slane %v175_v61, 4  ;;  %v58_v18 = vld [vmem:[%s8760_s0 + $0x50] sm:$0xff]  ;;  %256 = vst [vmem:[#allocation2 + $0x68] sm:$0xff] %v7083_v52  ;;  %v8765_v4 = vshll.u32 %v7083_v52, 16  ;;  %v8766_v19 = vshrl.u32 %v7083_v52, 16  ;;  %v3090_v25 = vor.u32 %v3089_v54, %v7092_v63 }
  0x46   :  { %281 = vst [vmem:[#allocation2 + $0x130] sm:$0x11] %v179_v28  ;;  %v140_v37 = vrot.slane %v58_v18, 7  ;;  %v142_v18 = vrot.slane %v7108_v6, 7 }
  0x47   :  { %1158 = vmatpush1.bf16.msra.mxu0 %v6410_v8  ;;  %3805 = vmatpush1.bf16.msra.mxu1 %v6410_v8  ;;  %v7103_v9 = vsel %vm6753_vm2, %v176_v13, %v177_v15  ;;  %v6418_v8 = vld [vmem:[%s8761_s1 + $0x34] ss:$8 sps:$4 sm:$0xff]   ;;  %v7116_v38 = vrot.slane %v8765_v4, 5  ;;  %v466_v48 = vrot.slane %v8766_v19, 4  ;;  %v3076_v15 = vrot.slane %v3074_v16, 4  ;;  %v7132_v44 = vld [vmem:[#allocation2 + $0x60] sm:$0xff] }
  0x48   :  { %8821 = vst [vmem:[#allocation6_spill] sm:$0xff] %v7103_v9  ;;  %1159 = vmatprep.subr.bf16.mxu0 %v6415_v3  ;;  %3806 = vmatprep.subr.bf16.mxu1 %v6415_v3  ;;  %280 = vst [vmem:[#allocation2 + $0x128] sm:$0xff] %v7103_v9  ;;  %v8769_v61 = vshll.u32 %v7103_v9, 16  ;;  %v6416_v3 = vld [vmem:[%s8761_s1 + $0x30] ss:$8 sps:$4 sm:$0xff]   ;;  %v3079_v13 = vrot.slane %v3077_v22, 5 }
  0x49   :  { %v8770_v54 = vshrl.u32 %v7103_v9, 16  ;;  %v2996_v4 = vld [vmem:[#allocation2 + $0x118] sm:$0x11]  ;;  %v3091_v19 = vrot.slane %v3090_v25, 4  ;;  %v467_v0 = vor.u32 %v466_v48, %v7116_v38  ;;  %v451_v2 = vshrl.u32 %v7132_v44, 16 }
  0x4a   :  { %845 = vmatmul.mubr.bf16.gmra.mrb[4].mxu0 %v5589_v14  ;;  %3492 = vmatmul.mubr.bf16.gmra.mrb[4].mxu1 %v5845_v57  ;;  %v7137_v16 = vrot.slane %v8769_v61, 5  ;;  %v3080_v12 = vor.u32 %v3079_v13, %v3076_v15  ;;  %v3093_v49 = vshll.u32 %v2996_v4, 16  ;;  %v454_v14 = vshll.u32 %v7132_v44, 16  ;;  %258 = vst [vmem:[#allocation2 + $0x78] sm:$0xee] %v140_v37 }
  0x4b   :  { %1160 = vmatpush1.bf16.msra.mxu0 %v6413_v45  ;;  %3807 = vmatpush1.bf16.msra.mxu1 %v6413_v45  ;;  %v5593_v57 = vcombine.low %v7052_v10, %v7063_v24  ;;  %v347_v22 = vld [vmem:[#allocation2 + $0x70] sm:$0x11]  ;;  %v468_v28 = vrot.slane %v467_v0, 4  ;;  %v7147_v6 = vld [vmem:[#allocation2 + $0x120] sm:$0xff]  ;;  %v3113_v45 = vrot.slane %v8770_v54, 4  ;;  %v141_v25 = vrot.slane %v140_v37, 4 }
  0x4c   :  { %1161 = vmatprep.subr.bf16.mxu0 %v6418_v8  ;;  %3808 = vmatprep.subr.bf16.mxu1 %v6418_v8  ;;  %v6419_v4 = vld [vmem:[%s8761_s1 + $0x40] ss:$8 sps:$4 sm:$0xff]   ;;  %v3081_v8 = vrot.slane %v3080_v12, 4  ;;  %v3095_v0 = vrot.slane %v3093_v49, 5  ;;  %v453_v48 = vrot.slane %v451_v2, 4  ;;  %v456_v15 = vrot.slane %v454_v14, 5 }
  0x4d   :  { %854 = vmatprep.mubr.bf16.mxu0 %v5592_v50  ;;  %3501 = vmatprep.mubr.bf16.mxu1 %v5848_v17  ;;  %v470_v13 = vshll.u32 %v347_v22, 16  ;;  %v3098_v61 = vshrl.u32 %v7147_v6, 16  ;;  %v3101_v37 = vshll.u32 %v7147_v6, 16  ;;  %v3114_v54 = vor.u32 %v3113_v45, %v7137_v16  ;;  %v74_v50 = vld [vmem:[%s8760_s0 + $0xd0] sm:$0xff]  ;;  %v7178_v14 = vld [vmem:[%s8760_s0 + $0xd8] sm:$0xff] }
  0x4e   :  { %v7169_v17 = vsel %vm6824_vm5, %v3081_v8, %v7092_v63  ;;  %v7173_v12 = vsel %vm6824_vm5, %v3091_v19, %v3095_v0  ;;  %v457_v49 = vor.u32 %v456_v15, %v453_v48  ;;  %v144_v2 = vrot.slane %v142_v18, 4  ;;  %v2997_v45 = vld [vmem:[#allocation2 + $0x130] sm:$0x11]  ;;  %v6433_v10 = vld [vmem:[%s8761_s1 + $0x84] ss:$8 sps:$4 sm:$0xff]  }
  0x4f   :  { %1162 = vmatpush1.bf16.msra.mxu0 %v6416_v3  ;;  %3809 = vmatpush1.bf16.msra.mxu1 %v6416_v3  ;;  %v6424_v3 = vld [vmem:[%s8761_s1 + $0x54] ss:$8 sps:$4 sm:$0xff]   ;;  %v5850_v63 = vcombine.high %v7169_v17, %v7173_v12  ;;  %v5849_v19 = vcombine.low %v7169_v17, %v7173_v12  ;;  %v472_v22 = vrot.slane %v470_v13, 5  ;;  %v3100_v8 = vrot.slane %v3098_v61, 4  ;;  %v6422_v0 = vld [vmem:[%s8761_s1 + $0x50] ss:$8 sps:$4 sm:$0xff]  }
  0x50   :  { %1163 = vmatprep.subr.bf16.mxu0 %v6421_v11  ;;  %3810 = vmatprep.subr.bf16.mxu1 %v6421_v11  ;;  %v458_v48 = vrot.slane %v457_v49, 4  ;;  %v3103_v15 = vrot.slane %v3101_v37, 5  ;;  %v3115_v11 = vrot.slane %v3114_v54, 4  ;;  %v3117_v1 = vshll.u32 %v2997_v45, 16  ;;  %260 = vst [vmem:[#allocation2 + $0x88] sm:$0x11] %v144_v2 }
  0x51   :  { %v7198_v61 = vsel %vm6824_vm5, %v468_v28, %v472_v22  ;;  %v7202_v13 = vsel %vm6753_vm2, %v141_v25, %v142_v18  ;;  %v7204_v37 = vld [vmem:[#allocation2 + $0x78] sm:$0xff]  ;;  %v180_v54 = vrot.slane %v74_v50, 7  ;;  %v182_v49 = vrot.slane %v7178_v14, 7  ;;  %v61_v25 = vld [vmem:[%s8760_s0 + $0x68] sm:$0xff] }
  0x52   :  { %855 = vmatmul.mubr.bf16.gmra.mrb[8].mxu0 %v5591_v30  ;;  %3502 = vmatmul.mubr.bf16.gmra.mrb[8].mxu1 %v5847_v46  ;;  %8822 = vst [vmem:[#allocation7_spill] sm:$0xff] %v7202_v13  ;;  %v7213_v41 = vsel %vm6824_vm5, %v458_v48, %v7116_v38  ;;  %v3104_v26 = vor.u32 %v3103_v15, %v3100_v8  ;;  %v3119_v20 = vrot.slane %v3117_v1, 5  ;;  %259 = vst [vmem:[#allocation2 + $0x80] sm:$0xff] %v7202_v13  ;;  %v60_v46 = vld [vmem:[%s8760_s0 + $0x60] sm:$0xff] }
  0x53   :  { %1164 = vmatpush1.bf16.msra.mxu0 %v6419_v4  ;;  %3811 = vmatpush1.bf16.msra.mxu1 %v6419_v4  ;;  %v475_v30 = vshrl.u32 %v7204_v37, 16  ;;  %v5596_v18 = vcombine.high %v7213_v41, %v7198_v61  ;;  %v5595_v28 = vcombine.low %v7213_v41, %v7198_v61  ;;  %v478_v38 = vshll.u32 %v7204_v37, 16  ;;  %282 = vst [vmem:[#allocation2 + $0x138] sm:$0xee] %v180_v54 }
  0x54   :  { %1165 = vmatprep.subr.bf16.mxu0 %v6424_v3  ;;  %3812 = vmatprep.subr.bf16.mxu1 %v6424_v3  ;;  %v8772_v1 = vshll.u32 %v7202_v13, 16  ;;  %v3105_v4 = vrot.slane %v3104_v26, 4  ;;  %v7234_v50 = vsel %vm6824_vm5, %v3115_v11, %v3119_v20  ;;  %v8775_v14 = vshrl.u32 %v7202_v13, 16  ;;  %v76_v3 = vld [vmem:[%s8760_s0 + $0xe0] sm:$0xff] }
  0x55   :  { %864 = vmatprep.mubr.bf16.mxu0 %v5594_v43  ;;  %3511 = vmatprep.mubr.bf16.mxu1 %v5850_v63  ;;  %v477_v2 = vrot.slane %v475_v30, 4  ;;  %v480_v22 = vrot.slane %v478_v38, 5  ;;  %v181_v8 = vrot.slane %v180_v54, 4  ;;  %v184_v48 = vrot.slane %v182_v49, 4  ;;  %v6425_v43 = vld [vmem:[%s8761_s1 + $0x60] ss:$8 sps:$4 sm:$0xff]  }
  0x56   :  { %v486_v45 = vrot.slane %v8772_v1, 5  ;;  %v7248_v63 = vsel %vm6824_vm5, %v3105_v4, %v7137_v16  ;;  %v490_v15 = vrot.slane %v8775_v14, 4  ;;  %v145_v11 = vrot.slane %v60_v46, 7  ;;  %v6428_v46 = vld [vmem:[%s8761_s1 + $0x70] ss:$8 sps:$4 sm:$0xff]  }
  0x57   :  { %1166 = vmatpush1.bf16.msra.mxu0 %v6422_v0  ;;  %3813 = vmatpush1.bf16.msra.mxu1 %v6422_v0  ;;  %v147_v26 = vrot.slane %v61_v25, 7  ;;  %v6430_v0 = vld [vmem:[%s8761_s1 + $0x74] ss:$8 sps:$4 sm:$0xff]   ;;  %v5852_v54 = vcombine.high %v7248_v63, %v7234_v50  ;;  %v5851_v20 = vcombine.low %v7248_v63, %v7234_v50  ;;  %v348_v30 = vld [vmem:[#allocation2 + $0x88] sm:$0x11]  ;;  %v481_v16 = vor.u32 %v480_v22, %v477_v2 }
  0x58   :  { %1167 = vmatprep.subr.bf16.mxu0 %v6427_v42  ;;  %3814 = vmatprep.subr.bf16.mxu1 %v6427_v42  ;;  %284 = vst [vmem:[#allocation2 + $0x148] sm:$0x11] %v184_v48  ;;  %v185_v38 = vrot.slane %v76_v3, 7  ;;  %v491_v25 = vor.u32 %v490_v15, %v486_v45  ;;  %v494_v42 = vshll.u32 %v348_v30, 16  ;;  %v7264_v4 = vsel %vm6753_vm2, %v181_v8, %v182_v49  ;;  %v7310_v30 = vld [vmem:[%s8760_s0 + $0x70] sm:$0xff] }
  0x59   :  { %8823 = vst [vmem:[#allocation8_spill] sm:$0xff] %v7264_v4  ;;  %v146_v1 = vrot.slane %v145_v11, 4  ;;  %261 = vst [vmem:[#allocation2 + $0x90] sm:$0xee] %v145_v11  ;;  %v482_v2 = vrot.slane %v481_v16, 4  ;;  %v8773_v3 = vshll.u32 %v7264_v4, 16 }
  0x5a   :  { %865 = vmatmul.mubr.bf16.gmra.mrb[12].mxu0 %v5593_v57  ;;  %3512 = vmatmul.mubr.bf16.gmra.mrb[12].mxu1 %v5849_v19  ;;  %283 = vst [vmem:[#allocation2 + $0x140] sm:$0xff] %v7264_v4  ;;  %v8774_v22 = vshrl.u32 %v7264_v4, 16  ;;  %v149_v48 = vrot.slane %v147_v26, 4  ;;  %285 = vst [vmem:[#allocation2 + $0x150] sm:$0xee] %v185_v38  ;;  %v492_v24 = vrot.slane %v491_v25, 4 }
  0x5b   :  { %1168 = vmatpush1.bf16.msra.mxu0 %v6425_v43  ;;  %3815 = vmatpush1.bf16.msra.mxu1 %v6425_v43  ;;  %v496_v57 = vrot.slane %v494_v42, 5  ;;  %v7278_v49 = vld [vmem:[#allocation2 + $0x138] sm:$0xff]  ;;  %v7282_v17 = vsel %vm6753_vm2, %v146_v1, %v147_v26  ;;  %v186_v12 = vrot.slane %v185_v38, 4  ;;  %v7286_v19 = vsel %vm6824_vm5, %v482_v2, %v486_v45  ;;  %v77_v1 = vld [vmem:[%s8760_s0 + $0xe8] sm:$0xff] }
  0x5c   :  { %8824 = vst [vmem:[#allocation9_spill] sm:$0xff] %v7282_v17  ;;  %1169 = vmatprep.subr.bf16.mxu0 %v6430_v0  ;;  %3816 = vmatprep.subr.bf16.mxu1 %v6430_v0  ;;  %v3122_v8 = vshrl.u32 %v7278_v49, 16  ;;  %v3125_v43 = vshll.u32 %v7278_v49, 16  ;;  %v3133_v15 = vrot.slane %v8773_v3, 5  ;;  %262 = vst [vmem:[#allocation2 + $0x98] sm:$0xff] %v7282_v17  ;;  %v3137_v11 = vrot.slane %v8774_v22, 4 }
  0x5d   :  { %263 = vst [vmem:[#allocation2 + $0xa0] sm:$0x11] %v149_v48  ;;  %874 = vmatprep.mubr.bf16.mxu0 %v5596_v18  ;;  %3521 = vmatprep.mubr.bf16.mxu1 %v5852_v54  ;;  %v7301_v45 = vsel %vm6824_vm5, %v492_v24, %v496_v57  ;;  %v8776_v26 = vshll.u32 %v7282_v17, 16  ;;  %v8777_v0 = vshrl.u32 %v7282_v17, 16  ;;  %v7315_v18 = vld [vmem:[%s8760_s0 + $0x78] sm:$0xff]  ;;  %v187_v3 = vrot.slane %v77_v1, 7 }
  0x5e   :  { %v6431_v54 = vld [vmem:[%s8761_s1 + $0x80] ss:$8 sps:$4 sm:$0xff]   ;;  %v5598_v16 = vcombine.high %v7286_v19, %v7301_v45  ;;  %v3124_v38 = vrot.slane %v3122_v8, 4  ;;  %v3127_v25 = vrot.slane %v3125_v43, 5  ;;  %v5597_v42 = vcombine.low %v7286_v19, %v7301_v45  ;;  %v6436_v8 = vld [vmem:[%s8761_s1 + $0x94] ss:$8 sps:$4 sm:$0xff]  }
  0x5f   :  { %1170 = vmatpush1.bf16.msra.mxu0 %v6428_v46  ;;  %3817 = vmatpush1.bf16.msra.mxu1 %v6428_v46  ;;  %v2998_v2 = vld [vmem:[#allocation2 + $0x148] sm:$0x11]  ;;  %v3138_v48 = vor.u32 %v3137_v11, %v3133_v15  ;;  %v7326_v24 = vrot.slane %v8776_v26, 5  ;;  %v514_v57 = vrot.slane %v8777_v0, 4  ;;  %v150_v46 = vrot.slane %v7310_v30, 7 }
  0x60   :  { %1171 = vmatprep.subr.bf16.mxu0 %v6433_v10  ;;  %3818 = vmatprep.subr.bf16.mxu1 %v6433_v10  ;;  %v3128_v43 = vor.u32 %v3127_v25, %v3124_v38  ;;  %v3141_v22 = vshll.u32 %v2998_v2, 16  ;;  %v7333_v14 = vld [vmem:[#allocation2 + $0x90] sm:$0xff]  ;;  %v152_v11 = vrot.slane %v7315_v18, 7  ;;  %v6439_v38 = vld [vmem:[%s8761_s1 + $0xa4] ss:$8 sps:$4 sm:$0xff]   ;;  %v7356_v25 = vsel %vm6753_vm2, %v186_v12, %v187_v3 }
  0x61   :  { %v6434_v26 = vld [vmem:[%s8761_s1 + $0x90] ss:$8 sps:$4 sm:$0xff]   ;;  %v3139_v0 = vrot.slane %v3138_v48, 4  ;;  %v499_v1 = vshrl.u32 %v7333_v14, 16  ;;  %v502_v10 = vshll.u32 %v7333_v14, 16  ;;  %v515_v55 = vor.u32 %v514_v57, %v7326_v24  ;;  %8825 = vst [vmem:[#allocation10_spill] sm:$0xff] %v7356_v25 }
  0x62   :  { %v7343_v47 = vld [vmem:[#allocation2 + $0x150] sm:$0xff]  ;;  %875 = vmatmul.mubr.bf16.gmra.mrb[16].mxu0 %v5595_v28  ;;  %3522 = vmatmul.mubr.bf16.gmra.mrb[16].mxu1 %v5851_v20  ;;  %v3129_v30 = vrot.slane %v3128_v43, 4  ;;  %v3143_v18 = vrot.slane %v3141_v22, 5  ;;  %v189_v2 = vrot.slane %v187_v3, 4  ;;  %264 = vst [vmem:[#allocation2 + $0xa8] sm:$0xee] %v150_v46 }
  0x63   :  { %1172 = vmatpush1.bf16.msra.mxu0 %v6431_v54  ;;  %3819 = vmatpush1.bf16.msra.mxu1 %v6431_v54  ;;  %v501_v41 = vrot.slane %v499_v1, 4  ;;  %v504_v28 = vrot.slane %v502_v10, 5  ;;  %v516_v48 = vrot.slane %v515_v55, 4  ;;  %286 = vst [vmem:[#allocation2 + $0x158] sm:$0xff] %v7356_v25  ;;  %v3146_v50 = vshrl.u32 %v7343_v47, 16  ;;  %v78_v55 = vld [vmem:[%s8760_s0 + $0xf0] sm:$0xff] }
  0x64   :  { %v349_v61 = vld [vmem:[#allocation2 + $0xa0] sm:$0x11]  ;;  %1173 = vmatprep.subr.bf16.mxu0 %v6436_v8  ;;  %3820 = vmatprep.subr.bf16.mxu1 %v6436_v8  ;;  %v3134_v63 = vsel %vm6824_vm5, %v3129_v30, %v3133_v15  ;;  %v3144_v20 = vsel %vm6824_vm5, %v3139_v0, %v3143_v18  ;;  %287 = vst [vmem:[#allocation2 + $0x160] sm:$0x11] %v189_v2  ;;  %v3149_v22 = vshll.u32 %v7343_v47, 16  ;;  %v8784_v15 = vshll.u32 %v7356_v25, 16 }
  0x65   :  { %v518_v3 = vshll.u32 %v349_v61, 16  ;;  %884 = vmatprep.mubr.bf16.mxu0 %v5598_v16  ;;  %v5854_v12 = vcombine.high %v3134_v63, %v3144_v20  ;;  %v5853_v54 = vcombine.low %v3134_v63, %v3144_v20  ;;  %v505_v57 = vor.u32 %v504_v28, %v501_v41  ;;  %v79_v0 = vld [vmem:[%s8760_s0 + $0xf8] sm:$0xff]  ;;  %v6437_v16 = vld [vmem:[%s8761_s1 + $0xa0] ss:$8 sps:$4 sm:$0xff]  }
  0x66   :  { %v3148_v43 = vrot.slane %v3146_v50, 4  ;;  %v3151_v1 = vrot.slane %v3149_v22, 5  ;;  %v8785_v10 = vshrl.u32 %v7356_v25, 16  ;;  %v151_v18 = vrot.slane %v150_v46, 4  ;;  %v6442_v41 = vld [vmem:[%s8761_s1 + $0xb4] ss:$8 sps:$4 sm:$0xff]  }
  0x67   :  { %v520_v8 = vrot.slane %v518_v3, 5  ;;  %1174 = vmatpush1.bf16.msra.mxu0 %v6434_v26  ;;  %3821 = vmatpush1.bf16.msra.mxu1 %v6434_v26  ;;  %v506_v30 = vrot.slane %v505_v57, 4  ;;  %v154_v2 = vrot.slane %v152_v11, 4  ;;  %v190_v61 = vrot.slane %v78_v55, 7 }
  0x68   :  { %3531 = vmatprep.mubr.bf16.mxu1 %v5854_v12  ;;  %1175 = vmatprep.subr.bf16.mxu0 %v6439_v38  ;;  %v3152_v50 = vor.u32 %v3151_v1, %v3148_v43  ;;  %v3157_v26 = vrot.slane %v8784_v15, 5  ;;  %v3161_v63 = vrot.slane %v8785_v10, 4  ;;  %v7390_v20 = vsel %vm6753_vm2, %v151_v18, %v152_v11 }
  0x69   :  { %v521_v28 = vsel %vm6824_vm5, %v516_v48, %v520_v8  ;;  %3822 = vmatprep.subr.bf16.mxu1 %v6439_v38  ;;  %v511_v46 = vsel %vm6824_vm5, %v506_v30, %v7326_v24  ;;  %8826 = vst [vmem:[#allocation11_spill] sm:$0xff] %v7390_v20  ;;  %266 = vst [vmem:[#allocation2 + $0xb8] sm:$0x11] %v154_v2  ;;  %v7392_v3 = vld [vmem:[#allocation2 + $0xa8] sm:$0xff]  ;;  %v191_v48 = vrot.slane %v190_v61, 4  ;;  %v192_v22 = vrot.slane %v79_v0, 7 }
  0x6a   :  { %288 = vst [vmem:[#allocation2 + $0x168] sm:$0xee] %v190_v61  ;;  %885 = vmatmul.mubr.bf16.gmra.mrb[20].mxu0 %v5597_v42  ;;  %3532 = vmatmul.mubr.bf16.gmra.mrb[20].mxu1 %v5853_v54  ;;  %v6440_v38 = vld [vmem:[%s8761_s1 + $0xb0] ss:$8 sps:$4 sm:$0xff]   ;;  %v5600_v24 = vcombine.high %v511_v46, %v521_v28  ;;  %v3153_v55 = vrot.slane %v3152_v50, 4  ;;  %v3162_v12 = vor.u32 %v3161_v63, %v3157_v26  ;;  %265 = vst [vmem:[#allocation2 + $0xb0] sm:$0xff] %v7390_v20 }
  0x6b   :  { %v5599_v11 = vcombine.low %v511_v46, %v521_v28  ;;  %1176 = vmatpush1.bf16.msra.mxu0 %v6437_v16  ;;  %3823 = vmatpush1.bf16.msra.mxu1 %v6437_v16  ;;  %v7401_v57 = vld [vmem:[#allocation2 + $0x160] sm:$0x11]  ;;  %v523_v43 = vshrl.u32 %v7392_v3, 16  ;;  %v526_v19 = vshll.u32 %v7392_v3, 16  ;;  %v8782_v45 = vshll.u32 %v7390_v20, 16 }
  0x6c   :  { %v8783_v42 = vshrl.u32 %v7390_v20, 16  ;;  %1177 = vmatprep.subr.bf16.mxu0 %v6442_v41  ;;  %3824 = vmatprep.subr.bf16.mxu1 %v6442_v41  ;;  %v3158_v54 = vsel %vm6824_vm5, %v3153_v55, %v3157_v26  ;;  %v3163_v8 = vrot.slane %v3162_v12, 4  ;;  %v3165_v1 = vshll.u32 %v7401_v57, 16  ;;  %v6445_v0 = vld [vmem:[%s8761_s1 + $0xc4] ss:$8 sps:$4 sm:$0xff]  }
  0x6d   :  { %v7415_v16 = vsel %vm6753_vm2, %v191_v48, %v192_v22  ;;  %894 = vmatprep.mubr.bf16.mxu0 %v5600_v24  ;;  %v525_v30 = vrot.slane %v523_v43, 4  ;;  %v528_v18 = vrot.slane %v526_v19, 5  ;;  %v534_v2 = vrot.slane %v8782_v45, 5  ;;  %v6443_v28 = vld [vmem:[%s8761_s1 + $0xc0] ss:$8 sps:$4 sm:$0xff]  }
  0x6e   :  { %v538_v61 = vrot.slane %v8783_v42, 4  ;;  %289 = vst [vmem:[#allocation2 + $0x170] sm:$0xff] %v7415_v16  ;;  %v3167_v41 = vrot.slane %v3165_v1, 5  ;;  %v194_v50 = vrot.slane %v192_v22, 4  ;;  %v8780_v21 = vshll.u32 %v7415_v16, 16 }
  0x6f   :  { %v8781_v26 = vshrl.u32 %v7415_v16, 16  ;;  %1178 = vmatpush1.bf16.msra.mxu0 %v6440_v38  ;;  %3825 = vmatpush1.bf16.msra.mxu1 %v6440_v38  ;;  %v6448_v63 = vld [vmem:[%s8761_s1 + $0xd4] ss:$8 sps:$4 sm:$0xff]   ;;  %v529_v46 = vor.u32 %v528_v18, %v525_v30 }
  0x70   :  { %v539_v48 = vor.u32 %v538_v61, %v534_v2  ;;  %v3168_v24 = vsel %vm6824_vm5, %v3163_v8, %v3167_v41  ;;  %1179 = vmatprep.subr.bf16.mxu0 %v6445_v0  ;;  %3826 = vmatprep.subr.bf16.mxu1 %v6445_v0  ;;  %v7432_v55 = vld [vmem:[#allocation2 + $0xb8] sm:$0x11]  ;;  %290 = vst [vmem:[#allocation2 + $0x178] sm:$0x11] %v194_v50  ;;  %v3181_v12 = vrot.slane %v8780_v21, 5 }
  0x71   :  { %v7434_v22 = vld [vmem:[#allocation2 + $0x168] sm:$0xff]  ;;  %v3185_v38 = vrot.slane %v8781_v26, 4  ;;  %v5856_v43 = vcombine.high %v3158_v54, %v3168_v24  ;;  %v5855_v19 = vcombine.low %v3158_v54, %v3168_v24  ;;  %v530_v1 = vrot.slane %v529_v46, 4  ;;  %v6446_v61 = vld [vmem:[%s8761_s1 + $0xd0] ss:$8 sps:$4 sm:$0xff]  }
  0x72   :  { %895 = vmatmul.mubr.bf16.gmra.mrb[24].mxu0 %v5599_v11  ;;  %v540_v30 = vrot.slane %v539_v48, 4  ;;  %v542_v8 = vshll.u32 %v7432_v55, 16  ;;  %v3170_v0 = vshrl.u32 %v7434_v22, 16  ;;  %v3173_v18 = vshll.u32 %v7434_v22, 16  ;;  %v6451_v48 = vld [vmem:[%s8761_s1 + $0xe4] ss:$8 sps:$4 sm:$0xff]  }
  0x73   :  { %3541 = vmatprep.mubr.bf16.mxu1 %v5856_v43  ;;  %1180 = vmatpush1.bf16.msra.mxu0 %v6443_v28  ;;  %v3186_v41 = vor.u32 %v3185_v38, %v3181_v12  ;;  %v535_v54 = vsel %vm6824_vm5, %v530_v1, %v534_v2  ;;  %v6449_v38 = vld [vmem:[%s8761_s1 + $0xe0] ss:$8 sps:$4 sm:$0xff]  }
  0x74   :  { %3542 = vmatmul.mubr.bf16.gmra.mrb[24].mxu1 %v5855_v19  ;;  %1181 = vmatprep.subr.bf16.mxu0 %v6448_v63  ;;  %v544_v11 = vrot.slane %v542_v8, 5  ;;  %v3172_v50 = vrot.slane %v3170_v0, 4  ;;  %v3175_v46 = vrot.slane %v3173_v18, 5  ;;  %v6454_v8 = vld [vmem:[%s8761_s1 + $0xf4] ss:$8 sps:$4 sm:$0xff]   ;;  %v7461_v0 = vld [vmem:[#allocation2 + $0x8] sm:$0xff] }
  0x75   :  { %3827 = vmatpush1.bf16.msra.mxu1 %v6443_v28  ;;  %v6600_v28 = vld [vmem:[#allocation2] sm:$0xff]  ;;  %v3187_v18 = vrot.slane %v3186_v41, 4 }
  0x76   :  { %3828 = vmatprep.subr.bf16.mxu1 %v6448_v63  ;;  %v545_v24 = vsel %vm6824_vm5, %v540_v30, %v544_v11  ;;  %v3176_v43 = vor.u32 %v3175_v46, %v3172_v50  ;;  %v5636_v63 = vcombine.high %v6600_v28, %v7461_v0  ;;  %v6452_v46 = vld [vmem:[%s8761_s1 + $0xf0] ss:$8 sps:$4 sm:$0xff]  }
  0x77   :  { %1182 = vmatpush1.bf16.msra.mxu0 %v6446_v61  ;;  %v5602_v19 = vcombine.high %v535_v54, %v545_v24  ;;  %v7456_v2 = vld [vmem:[#allocation2 + $0x178] sm:$0x11]  ;;  %v5601_v1 = vcombine.low %v535_v54, %v545_v24 }
  0x78   :  { %v3177_v30 = vrot.slane %v3176_v43, 4  ;;  %v3189_v11 = vshll.u32 %v7456_v2, 16  ;;  %1183 = vmatprep.subr.bf16.mxu0 %v6451_v48 }
  0x79   :  { %3829 = vmatpush1.bf16.msra.mxu1 %v6446_v61  ;;  %904 = vmatprep.mubr.bf16.mxu0 %v5602_v19  ;;  %v6457_v61 = vld [vmem:[%s8761_s1 + $0x204] ss:$8 sps:$4 sm:$0xff]  }
  0x7a   :  { %v3182_v50 = vsel %vm6824_vm5, %v3177_v30, %v3181_v12  ;;  %v3191_v54 = vrot.slane %v3189_v11, 5  ;;  %905 = vmatmul.mubr.bf16.gmra.mrb[28].mxu0 %v5601_v1  ;;  %3830 = vmatprep.subr.bf16.mxu1 %v6451_v48  ;;  %v7475_v12 = vld [vmem:[#allocation2 + $0xc8] sm:$0xff]  ;;  %v6602_v48 = vld [vmem:[#allocation2 + $0xc0] sm:$0xff]  ;;  %v5635_v1 = vcombine.low %v6600_v28, %v7461_v0  ;;  %v6604_v30 = vld [vmem:[#allocation2 + $0x18] sm:$0xff] }
  0x7b   :  { %1184 = vmatpush1.bf16.msra.mxu0 %v6449_v38  ;;  %1187 = vmatprep.mubr.bf16.mxu0 %v5636_v63  ;;  %v5892_v19 = vcombine.high %v6602_v48, %v7475_v12  ;;  %v7482_v63 = vld [vmem:[#allocation2 + $0x20] sm:$0xff]  ;;  %v5891_v28 = vcombine.low %v6602_v48, %v7475_v12  ;;  %v6608_v48 = vld [vmem:[#allocation2 + $0x30] sm:$0xff] }
  0x7c   :  { %v3192_v41 = vsel %vm6824_vm5, %v3187_v18, %v3191_v54  ;;  %1185 = vmatprep.subr.bf16.mxu0 %v6454_v8  ;;  %v5638_v18 = vcombine.high %v6604_v30, %v7482_v63  ;;  %v6463_v11 = vld [vmem:[%s8761_s1 + $0x224] ss:$8 sps:$4 sm:$0xff]   ;;  %v6606_v54 = vld [vmem:[#allocation2 + $0xd8] sm:$0xff] }
  0x7d   :  { %v5858_v24 = vcombine.high %v3182_v50, %v3192_v41  ;;  %v5857_v43 = vcombine.low %v3182_v50, %v3192_v41  ;;  %3831 = vmatpush1.bf16.msra.mxu1 %v6449_v38  ;;  %v6460_v38 = vld [vmem:[%s8761_s1 + $0x214] ss:$8 sps:$4 sm:$0xff]   ;;  %v7495_v50 = vld [vmem:[#allocation2 + $0xe0] sm:$0xff]  ;;  %v5637_v41 = vcombine.low %v6604_v30, %v7482_v63 }
  0x7e   :  { %3832 = vmatprep.subr.bf16.mxu1 %v6454_v8  ;;  %v6458_v8 = vld [vmem:[%s8761_s1 + $0x210] ss:$8 sps:$4 sm:$0xff]   ;;  %v5893_v30 = vcombine.low %v6606_v54, %v7495_v50 }
  0x7f   :  { %3551 = vmatprep.mubr.bf16.mxu1 %v5858_v24  ;;  %1186 = vmatpush1.bf16.msra.mxu0 %v6452_v46  ;;  %v6466_v24 = vld [vmem:[%s8761_s1 + $0x234] ss:$8 sps:$4 sm:$0xff]  }
  0x80   :  { %3552 = vmatmul.mubr.bf16.gmra.mrb[28].mxu1 %v5857_v43  ;;  %1607 = vmatprep.subr.bf16.mxu0 %v6457_v61  ;;  %v7505_v43 = vld [vmem:[#allocation2 + $0x38] sm:$0xff] }
  0x81   :  { %3833 = vmatpush1.bf16.msra.mxu1 %v6452_v46  ;;  %3834 = vmatprep.mubr.bf16.mxu1 %v5892_v19  ;;  %v5894_v46 = vcombine.high %v6606_v54, %v7495_v50  ;;  %v5640_v19 = vcombine.high %v6608_v48, %v7505_v43  ;;  %v7522_v54 = vld [vmem:[#allocation2 + $0x50] sm:$0xff] }
  0x82   :  { %1188 = vmatmul.mubr.bf16.vlgmr.msra.gmra.mrb[0].mxu0 %v5635_v1  ;;  %4251 = vmatprep.subr.bf16.mxu1 %v6457_v61  ;;  %v6461_v61 = vld [vmem:[%s8761_s1 + $0x220] ss:$8 sps:$4 sm:$0xff]   ;;  %v6464_v1 = vld [vmem:[%s8761_s1 + $0x230] ss:$8 sps:$4 sm:$0xff]  }
  0x83   :  { %1608 = vmatpush1.bf16.msra.mxu0 %v6455_v7  ;;  %1197 = vmatprep.mubr.bf16.mxu0 %v5638_v18  ;;  %v6469_v18 = vld [vmem:[%s8761_s1 + $0x244] ss:$8 sps:$4 sm:$0xff]  }
  0x84   :  { %1609 = vmatprep.subr.bf16.mxu0 %v6460_v38 }
  0x87   :  { %1610 = vmatpush1.bf16.msra.mxu0 %v6458_v8 }
  0x88   :  { %3835 = vmatmul.mubr.bf16.vlgmr.msra.gmra.mrb[0].mxu1 %v5891_v28  ;;  %1611 = vmatprep.subr.bf16.mxu0 %v6463_v11  ;;  %v7515_v28 = vld [vmem:[#allocation2 + $0xf8] sm:$0xff] }
  0x89   :  { %4252 = vmatpush1.bf16.msra.mxu1 %v6455_v7  ;;  %3844 = vmatprep.mubr.bf16.mxu1 %v5894_v46  ;;  %v6610_v7 = vld [vmem:[#allocation2 + $0xf0] sm:$0xff]  ;;  %v5639_v46 = vcombine.low %v6608_v48, %v7505_v43 }
  0x8a   :  { %4253 = vmatprep.subr.bf16.mxu1 %v6460_v38  ;;  %1198 = vmatmul.mubr.bf16.gmra.mrb[4].mxu0 %v5637_v41  ;;  %v5896_v38 = vcombine.high %v6610_v7, %v7515_v28  ;;  %v6467_v41 = vld [vmem:[%s8761_s1 + $0x240] ss:$8 sps:$4 sm:$0xff]   ;;  %v5895_v48 = vcombine.low %v6610_v7, %v7515_v28  ;;  %v7549_v7 = vld [vmem:[#allocation2 + $0x110] sm:$0xff] }
  0x8b   :  { %1612 = vmatpush1.bf16.msra.mxu0 %v6461_v61  ;;  %1207 = vmatprep.mubr.bf16.mxu0 %v5640_v19  ;;  %v6612_v19 = vld [vmem:[#allocation2 + $0x48] sm:$0xff] }
  0x8c   :  { %1613 = vmatprep.subr.bf16.mxu0 %v6466_v24  ;;  %v5642_v21 = vcombine.high %v6612_v19, %v7522_v54 }
  0x8d   :  { %4254 = vmatpush1.bf16.msra.mxu1 %v6458_v8  ;;  %v6472_v8 = vld [vmem:[%s8761_s1 + $0x254] ss:$8 sps:$4 sm:$0xff]  }
  0x8e   :  { %4255 = vmatprep.subr.bf16.mxu1 %v6463_v11  ;;  %v6470_v11 = vld [vmem:[%s8761_s1 + $0x250] ss:$8 sps:$4 sm:$0xff]  }
  0x8f   :  { %1614 = vmatpush1.bf16.msra.mxu0 %v6464_v1 }
  0x90   :  { %3845 = vmatmul.mubr.bf16.gmra.mrb[4].mxu1 %v5893_v30  ;;  %1615 = vmatprep.subr.bf16.mxu0 %v6469_v18  ;;  %v6475_v30 = vld [vmem:[%s8761_s1 + $0x264] ss:$8 sps:$4 sm:$0xff]  }
  0x91   :  { %4256 = vmatpush1.bf16.msra.mxu1 %v6461_v61  ;;  %3854 = vmatprep.mubr.bf16.mxu1 %v5896_v38  ;;  %v5898_v61 = vcombine.high %v7088_v59, %v7056_v29  ;;  %v6473_v38 = vld [vmem:[%s8761_s1 + $0x260] ss:$8 sps:$4 sm:$0xff]  }
  0x92   :  { %4257 = vmatprep.subr.bf16.mxu1 %v6466_v24  ;;  %1208 = vmatmul.mubr.bf16.gmra.mrb[8].mxu0 %v5639_v46  ;;  %v5641_v24 = vcombine.low %v6612_v19, %v7522_v54  ;;  %v5897_v46 = vcombine.low %v7088_v59, %v7549_v7  ;;  %v6481_v19 = vld [vmem:[%s8761_s1 + $0x284] ss:$8 sps:$4 sm:$0xff]   ;;  %v6484_v59 = vld [vmem:[%s8761_s1 + $0x294] ss:$8 sps:$4 sm:$0xff]  }
  0x93   :  { %1616 = vmatpush1.bf16.msra.mxu0 %v6467_v41  ;;  %1217 = vmatprep.mubr.bf16.mxu0 %v5642_v21  ;;  %v5644_v21 = vcombine.high %v7132_v44, %v7083_v52 }
  0x94   :  { %1617 = vmatprep.subr.bf16.mxu0 %v6472_v8 }
  0x95   :  { %4258 = vmatpush1.bf16.msra.mxu1 %v6464_v1  ;;  %v6478_v1 = vld [vmem:[%s8761_s1 + $0x274] ss:$8 sps:$4 sm:$0xff]  }
  0x96   :  { %4259 = vmatprep.subr.bf16.mxu1 %v6469_v18  ;;  %v6476_v18 = vld [vmem:[%s8761_s1 + $0x270] ss:$8 sps:$4 sm:$0xff]  }
  0x97   :  { %1618 = vmatpush1.bf16.msra.mxu0 %v6470_v11 }
  0x98   :  { %3855 = vmatmul.mubr.bf16.gmra.mrb[8].mxu1 %v5895_v48  ;;  %1619 = vmatprep.subr.bf16.mxu0 %v6475_v30  ;;  %v6479_v48 = vld [vmem:[%s8761_s1 + $0x280] ss:$8 sps:$4 sm:$0xff]  }
  0x99   :  { %4260 = vmatpush1.bf16.msra.mxu1 %v6467_v41  ;;  %3864 = vmatprep.mubr.bf16.mxu1 %v5898_v61  ;;  %v5900_v41 = vcombine.high %v7147_v6, %v7103_v9  ;;  %v5646_v61 = vcombine.high %v7204_v37, %v7202_v13 }
  0x9a   :  { %4261 = vmatprep.subr.bf16.mxu1 %v6472_v8  ;;  %1218 = vmatmul.mubr.bf16.gmra.mrb[12].mxu0 %v5641_v24  ;;  %v5643_v8 = vcombine.low %v7132_v44, %v7083_v52  ;;  %v6482_v44 = vld [vmem:[%s8761_s1 + $0x290] ss:$8 sps:$4 sm:$0xff]  }
  0x9b   :  { %1620 = vmatpush1.bf16.msra.mxu0 %v6473_v38  ;;  %1227 = vmatprep.mubr.bf16.mxu0 %v5644_v21  ;;  %v5645_v21 = vcombine.low %v7204_v37, %v7202_v13 }
  0x9c   :  { %1621 = vmatprep.subr.bf16.mxu0 %v6478_v1 }
  0x9d   :  { %4262 = vmatpush1.bf16.msra.mxu1 %v6470_v11  ;;  %v6487_v11 = vld [vmem:[%s8761_s1 + $0x2a4] ss:$8 sps:$4 sm:$0xff]  }
  0x9e   :  { %4263 = vmatprep.subr.bf16.mxu1 %v6475_v30  ;;  %v7574_v30 = vld [vmem:[#allocation2 + $0x128] sm:$0xff] }
  0x9f   :  { %1622 = vmatpush1.bf16.msra.mxu0 %v6476_v18  ;;  %v5899_v24 = vcombine.low %v7147_v6, %v7574_v30  ;;  %v6490_v6 = vld [vmem:[%s8761_s1 + $0x2b4] ss:$8 sps:$4 sm:$0xff]  }
  0xa0   :  { %3865 = vmatmul.mubr.bf16.gmra.mrb[12].mxu1 %v5897_v46  ;;  %1623 = vmatprep.subr.bf16.mxu0 %v6481_v19  ;;  %v5648_v46 = vcombine.high %v7333_v14, %v7282_v17 }
  0xa1   :  { %4264 = vmatpush1.bf16.msra.mxu1 %v6473_v38  ;;  %3874 = vmatprep.mubr.bf16.mxu1 %v5900_v41  ;;  %v5902_v38 = vcombine.high %v7278_v49, %v7264_v4 }
  0xa2   :  { %4265 = vmatprep.subr.bf16.mxu1 %v6478_v1  ;;  %1228 = vmatmul.mubr.bf16.gmra.mrb[16].mxu0 %v5643_v8  ;;  %v6485_v1 = vld [vmem:[%s8761_s1 + $0x2a0] ss:$8 sps:$4 sm:$0xff]  }
  0xa3   :  { %1624 = vmatpush1.bf16.msra.mxu0 %v6479_v48  ;;  %1237 = vmatprep.mubr.bf16.mxu0 %v5646_v61 }
  0xa4   :  { %1625 = vmatprep.subr.bf16.mxu0 %v6484_v59 }
  0xa5   :  { %4266 = vmatpush1.bf16.msra.mxu1 %v6476_v18 }
  0xa6   :  { %4267 = vmatprep.subr.bf16.mxu1 %v6481_v19 }
  0xa7   :  { %1626 = vmatpush1.bf16.msra.mxu0 %v6482_v44 }
  0xa8   :  { %3875 = vmatmul.mubr.bf16.gmra.mrb[16].mxu1 %v5899_v24  ;;  %1627 = vmatprep.subr.bf16.mxu0 %v6487_v11 }
  0xa9   :  { %8 = vsyncpa [#allocation4], 0  ;;  %4268 = vmatpush1.bf16.msra.mxu1 %v6479_v48  ;;  %3884 = vmatprep.mubr.bf16.mxu1 %v5902_v38  ;;  %v6488_v37 = vld [vmem:[%s8761_s1 + $0x2b0] ss:$8 sps:$4 sm:$0xff]   ;;  %v5901_v18 = vcombine.low %v7278_v49, %v7264_v4  ;;  %v6493_v19 = vld [vmem:[%s8761_s1 + $0x2c4] ss:$8 sps:$4 sm:$0xff]   ;;  %v5904_v8 = vcombine.high %v7343_v47, %v7356_v25  ;;  %v5649_v45 = vcombine.low %v7392_v3, %v7390_v20 }
  0xaa   :  { %4269 = vmatprep.subr.bf16.mxu1 %v6484_v59  ;;  %1238 = vmatmul.mubr.bf16.gmra.mrb[20].mxu0 %v5645_v21  ;;  %v1297_v41 = vrot.slane %v7461_v0, 5  ;;  %v7601_v48 = vld [vmem:[#allocation2] sm:$0xee]  ;;  %v5647_v59 = vcombine.low %v7333_v14, %v7282_v17  ;;  %vm1292_vm6 = vcmask 1042432   ;;  %vm1293_vm7 = vcmask 1046532   ;;  %v6622_v60 = vld [vmem:[#allocation2 + $0x68] sm:$0xff] }
  0xab   :  { %1628 = vmatpush1.bf16.msra.mxu0 %v6485_v1  ;;  %1247 = vmatprep.mubr.bf16.mxu0 %v5648_v46  ;;  %v6491_v49 = vld [vmem:[%s8761_s1 + $0x2c0] ss:$8 sps:$4 sm:$0xff]   ;;  %v5650_v0 = vcombine.high %v7392_v3, %v7390_v20  ;;  %v6615_v61 = vld [vmem:[#allocation2 + $0x10] sm:$0x11]  ;;  %v5683_v14 = vrot.slane %v7601_v48, 9  ;;  %vm7614_vm8 = vmor %vm1292_vm6, %vm1293_vm7  ;;  %v3941_v21 = vrot.slane %v7475_v12, 5 }
  0xac   :  { %1629 = vmatprep.subr.bf16.mxu0 %v6490_v6  ;;  %v1299_v24 = vrot.slane %v1297_v41, 4  ;;  %v6494_v46 = vld [vmem:[%s8761_s1 + $0x2d0] ss:$8 sps:$4 sm:$0xff]   ;;  %v3948_v15 = vrot.slane %v7495_v50, 5  ;;  %v1311_v50 = vrot.slane %v7505_v43, 5  ;;  %v6626_v5 = vld [vmem:[#allocation2 + $0x140] sm:$0xff] }
  0xad   :  { %4270 = vmatpush1.bf16.msra.mxu1 %v6482_v44  ;;  %v1300_v44 = vrot.slane %v6615_v61, 5  ;;  %v7636_v61 = vld [vmem:[#allocation2 + $0x18] sm:$0xee]  ;;  %v7737_v33 = vld [vmem:[#allocation2 + $0x60] sm:$0xee]  ;;  %v8831_v4 = vshll.u32 %v6781_v36, 16 }
  0xae   :  { %4271 = vmatprep.subr.bf16.mxu1 %v6487_v11  ;;  %v6496_v11 = vld [vmem:[%s8761_s1 + $0x2d4] ss:$8 sps:$4 sm:$0xff]   ;;  %v6500_v10 = vld [vmem:[%s8761_s1 + $0x2f0] ss:$8 sps:$4 sm:$0xff]   ;;  %vm1760_vm9 = vsmask.f32 2304 }
  0xaf   :  { %1630 = vmatpush1.bf16.msra.mxu0 %v6488_v37  ;;  %v1301_v12 = vsel %vm7614_vm8, %v1299_v24, %v1300_v44  ;;  %v6502_v44 = vld [vmem:[%s8761_s1 + $0x2f4] ss:$8 sps:$4 sm:$0xff]   ;;  %v6617_v24 = vld [vmem:[#allocation2 + $0x28] sm:$0x11]  ;;  %v7796_v13 = vrot.slane %v8831_v4, 6  ;;  %vm2372_vm12 = vcmask 1041408  }
  0xb0   :  { %3885 = vmatmul.mubr.bf16.gmra.mrb[20].mxu1 %v5901_v18  ;;  %1631 = vmatprep.subr.bf16.mxu0 %v6493_v19  ;;  %v7622_v18 = vld [vmem:[#allocation2 + $0xc0] sm:$0xee]  ;;  %v1307_v3 = vrot.slane %v6617_v24, 5  ;;  %v7656_v32 = vld [vmem:[#allocation2 + $0xd8] sm:$0xee]  ;;  %vm2373_vm13 = vcmask 1045508  }
  0xb1   :  { %4272 = vmatpush1.bf16.msra.mxu1 %v6485_v1  ;;  %3894 = vmatprep.mubr.bf16.mxu1 %v5904_v8  ;;  %v5903_v1 = vcombine.low %v7343_v47, %v7356_v25  ;;  %v6499_v8 = vld [vmem:[%s8761_s1 + $0x2e4] ss:$8 sps:$4 sm:$0xff]   ;;  %v6616_v47 = vld [vmem:[#allocation2 + $0xd0] sm:$0x11]  ;;  %v5939_v42 = vrot.slane %v7622_v18, 9  ;;  %vm8572_vm14 = vmor %vm2372_vm12, %vm2373_vm13 }
  0xb2   :  { %4273 = vmatprep.subr.bf16.mxu1 %v6490_v6  ;;  %1248 = vmatmul.mubr.bf16.gmra.mrb[24].mxu0 %v5647_v59  ;;  %v1298_v6 = vsel %vm7614_vm8, %v5683_v14, %v1297_v41  ;;  %v1304_v59 = vrot.slane %v7482_v63, 5  ;;  %v3944_v26 = vrot.slane %v6616_v47, 5  ;;  %v3943_v41 = vrot.slane %v3941_v21, 4  ;;  %v6497_v63 = vld [vmem:[%s8761_s1 + $0x2e0] ss:$8 sps:$4 sm:$0xff]  }
  0xb3   :  { %1632 = vmatpush1.bf16.msra.mxu0 %v6491_v49  ;;  %1257 = vmatprep.mubr.bf16.mxu0 %v5650_v0  ;;  %v5906_v0 = vcombine.high %v7434_v22, %v7415_v16  ;;  %v3942_v47 = vsel %vm7614_vm8, %v5939_v42, %v3941_v21  ;;  %v7670_v21 = vld [vmem:[#allocation2 + $0x30] sm:$0xee]  ;;  %v6625_v58 = vld [vmem:[#allocation2 + $0x70] sm:$0x11]  ;;  %v6628_v25 = vld [vmem:[#allocation2 + $0x88] sm:$0x11] }
  0xb4   :  { %1633 = vmatprep.subr.bf16.mxu0 %v6496_v11  ;;  %v1306_v14 = vrot.slane %v1304_v59, 4  ;;  %v6508_v43 = vld [vmem:[%s8761_s1 + $0x314] ss:$8 sps:$4 sm:$0xff]   ;;  %v1335_v17 = vrot.slane %v6628_v25, 5  ;;  %vm1761_vm10 = vsmask.f32 6416 }
  0xb5   :  { %4274 = vmatpush1.bf16.msra.mxu1 %v6488_v37  ;;  %v5692_v37 = vcombine.high %v1298_v6, %v1301_v12  ;;  %v6627_v40 = vld [vmem:[#allocation2 + $0x130] sm:$0x11]  ;;  %vm8021_vm11 = vmor %vm1760_vm9, %vm1761_vm10 }
  0xb6   :  { %4275 = vmatprep.subr.bf16.mxu1 %v6493_v19  ;;  %v5684_v19 = vrot.slane %v7636_v61, 9  ;;  %v3972_v35 = vrot.slane %v6627_v40, 5 }
  0xb7   :  { %1634 = vmatpush1.bf16.msra.mxu0 %v6494_v46 }
  0xb8   :  { %3895 = vmatmul.mubr.bf16.gmra.mrb[24].mxu1 %v5903_v1  ;;  %1635 = vmatprep.subr.bf16.mxu0 %v6499_v8  ;;  %v3945_v1 = vsel %vm7614_vm8, %v3943_v41, %v3944_v26  ;;  %v7665_v42 = vsel %vm7614_vm8, %v5684_v19, %v1304_v59  ;;  %v1308_v26 = vsel %vm7614_vm8, %v1306_v14, %v1307_v3  ;;  %v3950_v41 = vrot.slane %v3948_v15, 4  ;;  %v6503_v59 = vld [vmem:[%s8761_s1 + $0x300] ss:$8 sps:$4 sm:$0xff]  }
  0xb9   :  { %4276 = vmatpush1.bf16.msra.mxu1 %v6491_v49  ;;  %3904 = vmatprep.mubr.bf16.mxu1 %v5906_v0  ;;  %v5905_v49 = vcombine.low %v7434_v22, %v7415_v16  ;;  %v5691_v22 = vcombine.low %v1298_v6, %v1301_v12  ;;  %v5940_v0 = vrot.slane %v7656_v32, 9  ;;  %v5694_v19 = vcombine.high %v7665_v42, %v1308_v26  ;;  %v6619_v6 = vld [vmem:[#allocation2 + $0x40] sm:$0x11] }
  0xba   :  { %4277 = vmatprep.subr.bf16.mxu1 %v6496_v11  ;;  %1258 = vmatmul.mubr.bf16.gmra.mrb[28].mxu0 %v5649_v45  ;;  %v6505_v45 = vld [vmem:[%s8761_s1 + $0x304] ss:$8 sps:$4 sm:$0xff]   ;;  %v5948_v11 = vcombine.high %v3942_v47, %v3945_v1  ;;  %v1314_v12 = vrot.slane %v6619_v6, 5 }
  0xbb   :  { %1636 = vmatpush1.bf16.msra.mxu0 %v6497_v63  ;;  %1639 = vmatprep.mubr.bf16.mxu0 %v5692_v37  ;;  %v6618_v37 = vld [vmem:[#allocation2 + $0xe8] sm:$0x11]  ;;  %v7683_v14 = vsel %vm7614_vm8, %v5940_v0, %v3948_v15  ;;  %v7726_v6 = vld [vmem:[#allocation2 + $0x108] sm:$0xee] }
  0xbc   :  { %1637 = vmatprep.subr.bf16.mxu0 %v6502_v44  ;;  %v3951_v24 = vrot.slane %v6618_v37, 5  ;;  %v6506_v37 = vld [vmem:[%s8761_s1 + $0x310] ss:$8 sps:$4 sm:$0xff]   ;;  %v6511_v15 = vld [vmem:[%s8761_s1 + $0x324] ss:$8 sps:$4 sm:$0xff]  }
  0xbd   :  { %4278 = vmatpush1.bf16.msra.mxu1 %v6494_v46  ;;  %v5685_v46 = vrot.slane %v7670_v21, 9 }
  0xbe   :  { %4279 = vmatprep.subr.bf16.mxu1 %v6499_v8  ;;  %v1313_v8 = vrot.slane %v1311_v50, 4  ;;  %v7687_v3 = vsel %vm7614_vm8, %v3950_v41, %v3951_v24 }
  0xbf   :  { %1638 = vmatpush1.bf16.msra.mxu0 %v6500_v10  ;;  %v5950_v0 = vcombine.high %v7683_v14, %v7687_v3 }
  0xc0   :  { %3905 = vmatmul.mubr.bf16.gmra.mrb[28].mxu1 %v5905_v49  ;;  %2203 = vmatprep.subr.bf16.mxu0 %v6505_v45  ;;  %v3955_v49 = vrot.slane %v7515_v28, 5  ;;  %v7704_v28 = vsel %vm7614_vm8, %v1313_v8, %v1314_v12  ;;  %v3962_v12 = vrot.slane %v7549_v7, 5  ;;  %v5949_v7 = vcombine.low %v7683_v14, %v7687_v3  ;;  %v7766_v3 = vld [vmem:[#allocation2 + $0x120] sm:$0xee] }
  0xc1   :  { %4280 = vmatpush1.bf16.msra.mxu1 %v6497_v63  ;;  %4283 = vmatprep.mubr.bf16.mxu1 %v5948_v11  ;;  %v7693_v63 = vld [vmem:[#allocation2 + $0xf0] sm:$0xee]  ;;  %v7700_v11 = vsel %vm7614_vm8, %v5685_v46, %v1311_v50  ;;  %v6620_v50 = vld [vmem:[#allocation2 + $0x100] sm:$0x11] }
  0xc2   :  { %4281 = vmatprep.subr.bf16.mxu1 %v6502_v44  ;;  %1640 = vmatmul.mubr.bf16.vlgmr.msra.gmra.mrb[0].mxu0 %v5691_v22  ;;  %v5947_v44 = vcombine.low %v3942_v47, %v3945_v1  ;;  %v1318_v22 = vrot.slane %v7522_v54, 5  ;;  %v7709_v47 = vld [vmem:[#allocation2 + $0x48] sm:$0xee]  ;;  %v5693_v1 = vcombine.low %v7665_v42, %v1308_v26  ;;  %v5941_v41 = vrot.slane %v7693_v63, 9  ;;  %v6621_v26 = vld [vmem:[#allocation2 + $0x58] sm:$0x11] }
  0xc3   :  { %2204 = vmatpush1.bf16.msra.mxu0 %v6503_v59  ;;  %1649 = vmatprep.mubr.bf16.mxu0 %v5694_v19  ;;  %v3957_v24 = vrot.slane %v3955_v49, 4  ;;  %v3958_v19 = vrot.slane %v6620_v50, 5  ;;  %v7716_v46 = vld [vmem:[%s8761_s1 + $0x320] ss:$8 sps:$4 sm:$0xff]   ;;  %v5696_v54 = vcombine.high %v7700_v11, %v7704_v28  ;;  %v1321_v8 = vrot.slane %v6621_v26, 5 }
  0xc4   :  { %2205 = vmatprep.subr.bf16.mxu0 %v6508_v43  ;;  %v1320_v42 = vrot.slane %v1318_v22, 4  ;;  %v7731_v50 = vsel %vm7614_vm8, %v5941_v41, %v3955_v49  ;;  %v1325_v26 = vrot.slane %v6622_v60, 5  ;;  %v5942_v49 = vrot.slane %v7726_v6, 9 }
  0xc5   :  { %4282 = vmatpush1.bf16.msra.mxu1 %v6500_v10  ;;  %v7721_v10 = vld [vmem:[%s8761_s1 + $0x334] ss:$8 sps:$4 sm:$0xff]  }
  0xc6   :  { %4844 = vmatprep.subr.bf16.mxu1 %v6505_v45  ;;  %v5686_v45 = vrot.slane %v7709_v47, 9  ;;  %v7764_v14 = vsel %vm7614_vm8, %v1320_v42, %v1321_v8  ;;  %v5695_v42 = vcombine.low %v7700_v11, %v7704_v28  ;;  %v1327_v8 = vrot.slane %v1325_v26, 4  ;;  %v7785_v11 = vld [vmem:[#allocation2 + $0x138] sm:$0xee] }
  0xc7   :  { %2206 = vmatpush1.bf16.msra.mxu0 %v6506_v37  ;;  %8830 = vst [vmem:[#allocation13_spill] sm:$0xff] %v7785_v11  ;;  %v7801_v40 = vsel %vm7614_vm8, %v5942_v49, %v3962_v12  ;;  %v5944_v25 = vrot.slane %v7785_v11, 9 }
  0xc8   :  { %4284 = vmatmul.mubr.bf16.vlgmr.msra.gmra.mrb[0].mxu1 %v5947_v44  ;;  %2207 = vmatprep.subr.bf16.mxu0 %v6511_v15  ;;  %v7735_v44 = vsel %vm7614_vm8, %v3957_v24, %v3958_v19  ;;  %v7760_v60 = vsel %vm7614_vm8, %v5686_v45, %v1318_v22  ;;  %v3964_v19 = vrot.slane %v3962_v12, 4  ;;  %v5687_v22 = vrot.slane %v7737_v33, 9  ;;  %v7772_v45 = vld [vmem:[#allocation2 + $0x78] sm:$0xee]  ;;  %v6629_v12 = vld [vmem:[#allocation2 + $0x148] sm:$0x11] }
  0xc9   :  { %4845 = vmatpush1.bf16.msra.mxu1 %v6503_v59  ;;  %4293 = vmatprep.mubr.bf16.mxu1 %v5950_v0  ;;  %v7741_v59 = vrot.slane %v364_v34, 6  ;;  %v7756_v34 = vld [vmem:[%s8761_s1 + $0x344] ss:$8 sps:$4 sm:$0xff]   ;;  %v3969_v0 = vrot.slane %v7574_v30, 5  ;;  %v5952_v24 = vcombine.high %v7731_v50, %v7735_v44  ;;  %8829 = vst [vmem:[#allocation12_spill] sm:$0xff] %v7772_v45  ;;  %v1328_v30 = vrot.slane %v6625_v58, 5 }
  0xca   :  { %4846 = vmatprep.subr.bf16.mxu1 %v6508_v43  ;;  %1650 = vmatmul.mubr.bf16.gmra.mrb[4].mxu0 %v5693_v1  ;;  %v7749_v43 = vld [vmem:[%s8761_s1 + $0x330] ss:$8 sps:$4 sm:$0xff]   ;;  %v6623_v1 = vld [vmem:[#allocation2 + $0x80] sm:$0xff]  ;;  %v7791_v58 = vld [vmem:[%s8761_s1 + $0x354] ss:$8 sps:$4 sm:$0xff]   ;;  %v5688_v28 = vrot.slane %v7772_v45, 9  ;;  %v7809_v9 = vsel %vm7614_vm8, %v5687_v22, %v1325_v26 }
  0xcb   :  { %2208 = vmatpush1.bf16.msra.mxu0 %v7716_v46  ;;  %1659 = vmatprep.mubr.bf16.mxu0 %v5696_v54  ;;  %v1332_v41 = vrot.slane %v6623_v1, 5  ;;  %v6624_v54 = vld [vmem:[#allocation2 + $0x118] sm:$0x11]  ;;  %v3976_v1 = vrot.slane %v6626_v5, 5  ;;  %v3971_v5 = vrot.slane %v3969_v0, 4  ;;  %v7814_v4 = vsel %vm7614_vm8, %v1327_v8, %v1328_v30 }
  0xcc   :  { %2209 = vmatprep.subr.bf16.mxu0 %v7721_v10  ;;  %v3965_v62 = vrot.slane %v6624_v54, 5  ;;  %v5698_v54 = vcombine.high %v7760_v60, %v7764_v14  ;;  %v3979_v49 = vrot.slane %v6629_v12, 5  ;;  %v7823_v26 = vld [vmem:[%s8761_s1 + $0x350] ss:$8 sps:$4 sm:$0xff]   ;;  %v7891_v12 = vld [vmem:[%s8761_s1 + $0x374] ss:$8 sps:$4 sm:$0xff]  }
  0xcd   :  { %4847 = vmatpush1.bf16.msra.mxu1 %v6506_v37  ;;  %v7780_v37 = vld [vmem:[%s8761_s1 + $0x340] ss:$8 sps:$4 sm:$0xff]   ;;  %v1334_v39 = vrot.slane %v1332_v41, 4  ;;  %v7833_v22 = vld [vmem:[#allocation2 + $0x150] sm:$0xee] }
  0xce   :  { %4848 = vmatprep.subr.bf16.mxu1 %v6511_v15  ;;  %v5943_v15 = vrot.slane %v7766_v3, 9  ;;  %8833 = vst [vmem:[#allocation15_spill] sm:$0xff] %v7833_v22  ;;  %v7900_v30 = vld [vmem:[#allocation2 + $0x168] sm:$0xee] }
  0xcf   :  { %2210 = vmatpush1.bf16.msra.mxu0 %v7749_v43 }
  0xd0   :  { %4294 = vmatmul.mubr.bf16.gmra.mrb[4].mxu1 %v5949_v7  ;;  %2211 = vmatprep.subr.bf16.mxu0 %v7756_v34  ;;  %v7805_v7 = vsel %vm7614_vm8, %v3964_v19, %v3965_v62  ;;  %v5951_v62 = vcombine.low %v7731_v50, %v7735_v44  ;;  %v7831_v19 = vld [vmem:[#allocation2 + $0x90] sm:$0xee]  ;;  %v7839_v50 = vld [vmem:[%s8761_s1 + $0x364] ss:$8 sps:$4 sm:$0xff]   ;;  %v7843_v44 = vsel %vm7614_vm8, %v3971_v5, %v3972_v35 }
  0xd1   :  { %4849 = vmatpush1.bf16.msra.mxu1 %v7716_v46  ;;  %4303 = vmatprep.mubr.bf16.mxu1 %v5952_v24  ;;  %v3978_v46 = vrot.slane %v3976_v1, 4  ;;  %v7829_v24 = vsel %vm7614_vm8, %v5943_v15, %v3969_v0  ;;  %8832 = vst [vmem:[#allocation14_spill] sm:$0xff] %v7831_v19  ;;  %v6630_v0 = vld [vmem:[#allocation2 + $0x98] sm:$0xff]  ;;  %v5954_v8 = vcombine.high %v7801_v40, %v7805_v7  ;;  %v5945_v15 = vrot.slane %v7833_v22, 9  ;;  %v7871_v5 = vld [vmem:[#allocation2 + $0xa8] sm:$0xee] }
  0xd2   :  { %4850 = vmatprep.subr.bf16.mxu1 %v7721_v10  ;;  %1660 = vmatmul.mubr.bf16.gmra.mrb[8].mxu0 %v5695_v42  ;;  %v5697_v10 = vcombine.low %v7760_v60, %v7764_v14  ;;  %v7847_v60 = vsel %vm7614_vm8, %v5688_v28, %v1332_v41  ;;  %v7851_v14 = vsel %vm7614_vm8, %v1334_v39, %v1335_v17  ;;  %v1339_v42 = vrot.slane %v6630_v0, 5 }
  0xd3   :  { %2212 = vmatpush1.bf16.msra.mxu0 %v7780_v37  ;;  %1669 = vmatprep.mubr.bf16.mxu0 %v5698_v54  ;;  %v5700_v35 = vcombine.high %v7809_v9, %v7814_v4  ;;  %v6631_v54 = vld [vmem:[#allocation2 + $0x158] sm:$0xff]  ;;  %v7863_v39 = vsel %vm7614_vm8, %v5944_v25, %v3976_v1  ;;  %v7867_v17 = vsel %vm7614_vm8, %v3978_v46, %v3979_v49  ;;  %v3986_v1 = vrot.slane %v7401_v57, 5  ;;  %v1752_v49 = vld [vmem:[#allocation2 + $0x10] sm:$0x33] }
  0xd4   :  { %2213 = vmatprep.subr.bf16.mxu0 %v7791_v58  ;;  %v3983_v41 = vrot.slane %v6631_v54, 5  ;;  %8834 = vst [vmem:[#allocation16_spill] sm:$0xff] %v7871_v5  ;;  %v1341_v0 = vrot.slane %v1339_v42, 4  ;;  %v6632_v54 = vld [vmem:[#allocation2 + $0xa0] sm:$0x11]  ;;  %v5690_v46 = vrot.slane %v7871_v5, 9 }
  0xd5   :  { %4851 = vmatpush1.bf16.msra.mxu1 %v7749_v43  ;;  %v5689_v43 = vrot.slane %v7831_v19, 9  ;;  %v1342_v28 = vrot.slane %v6632_v54, 5  ;;  %v1764_v22 = vshrl.u32 %v7601_v48, 16  ;;  %v7907_v57 = vld [vmem:[%s8761_s1 + $0x370] ss:$8 sps:$4 sm:$0xff]   ;;  %v1778_v11 = vshrl.u32 %v1752_v49, 16 }
  0xd6   :  { %4852 = vmatprep.subr.bf16.mxu1 %v7756_v34  ;;  %v7877_v34 = vld [vmem:[%s8761_s1 + $0x360] ss:$8 sps:$4 sm:$0xff]   ;;  %v3985_v25 = vrot.slane %v3983_v41, 4  ;;  %v7917_v54 = vsel %vm7614_vm8, %v5945_v15, %v3983_v41  ;;  %v4396_v5 = vld [vmem:[#allocation2 + $0xd0] sm:$0x33] }
  0xd7   :  { %2214 = vmatpush1.bf16.msra.mxu0 %v7823_v26  ;;  %v6529_v41 = vld [vmem:[%s8761_s1 + $0x384] ss:$8 sps:$4 sm:$0xff]   ;;  %v1766_v15 = vrot.slane %v1764_v22, 5  ;;  %v4419_v45 = vshrl.u32 %v4396_v5, 16 }
  0xd8   :  { %4304 = vmatmul.mubr.bf16.gmra.mrb[8].mxu1 %v5951_v62  ;;  %2215 = vmatprep.subr.bf16.mxu0 %v7839_v50  ;;  %v1349_v62 = vrot.slane %v7432_v55, 5  ;;  %v3993_v55 = vrot.slane %v7456_v2, 5 }
  0xd9   :  { %4853 = vmatpush1.bf16.msra.mxu1 %v7780_v37  ;;  %4313 = vmatprep.mubr.bf16.mxu1 %v5954_v8  ;;  %v7913_v8 = vsel %vm7614_vm8, %v5689_v43, %v1339_v42  ;;  %v4405_v37 = vshrl.u32 %v7622_v18, 16  ;;  %v4408_v42 = vshll.u32 %v7622_v18, 16  ;;  %v7939_v18 = vsel %vm7614_vm8, %v3985_v25, %v3986_v1 }
  0xda   :  { %4854 = vmatprep.subr.bf16.mxu1 %v7791_v58  ;;  %1670 = vmatmul.mubr.bf16.gmra.mrb[12].mxu0 %v5697_v10  ;;  %v1767_v58 = vshll.u32 %v7601_v48, 16  ;;  %v1346_v10 = vrot.slane %v7390_v20, 5  ;;  %v7931_v48 = vsel %vm7614_vm8, %v1341_v0, %v1342_v28  ;;  %v8835_v20 = vshrl.u32 %v6768_v31, 16 }
  0xdb   :  { %2216 = vmatpush1.bf16.msra.mxu0 %v7877_v34  ;;  %1679 = vmatprep.mubr.bf16.mxu0 %v5700_v35  ;;  %v1781_v0 = vshll.u32 %v1752_v49, 16  ;;  %v8836_v35 = vshrl.u32 %v6781_v36, 16  ;;  %v4407_v1 = vrot.slane %v4405_v37, 5  ;;  %v4410_v22 = vrot.slane %v4408_v42, 6  ;;  %v6532_v36 = vld [vmem:[%s8761_s1 + $0x394] ss:$8 sps:$4 sm:$0xff]  }
  0xdc   :  { %2217 = vmatprep.subr.bf16.mxu0 %v7891_v12  ;;  %v1772_v19 = vrot.slane %v8835_v20, 5  ;;  %v1769_v28 = vrot.slane %v1767_v58, 6  ;;  %v4422_v25 = vshll.u32 %v4396_v5, 16  ;;  %v1787_v31 = vshrl.u32 %v7636_v61, 16 }
  0xdd   :  { %4855 = vmatpush1.bf16.msra.mxu1 %v7823_v26  ;;  %v4413_v43 = vrot.slane %v8836_v35, 5  ;;  %v6527_v26 = vld [vmem:[%s8761_s1 + $0x380] ss:$8 sps:$4 sm:$0xff]   ;;  %v8837_v20 = vcombine.low %v7801_v40, %v7805_v7  ;;  %v1348_v37 = vrot.slane %v1346_v10, 4  ;;  %v1790_v5 = vshll.u32 %v7636_v61, 16 }
  0xde   :  { %4856 = vmatprep.subr.bf16.mxu1 %v7839_v50  ;;  %v5704_v50 = vcombine.high %v7913_v8, %v7931_v48  ;;  %v8838_v40 = vcombine.high %v7829_v24, %v7843_v44  ;;  %v7970_v58 = vsel %vm7614_vm8, %v5690_v46, %v1346_v10  ;;  %v7973_v42 = vor.u32 %v7741_v59, %v1772_v19  ;;  %v6530_v59 = vld [vmem:[%s8761_s1 + $0x390] ss:$8 sps:$4 sm:$0xff]  }
  0xdf   :  { %2218 = vmatpush1.bf16.msra.mxu0 %v7907_v57  ;;  %v7975_v35 = vrot.slane %v1778_v11, 5  ;;  %v8839_v61 = vcombine.low %v7809_v9, %v7814_v4  ;;  %v4415_v49 = vor.u32 %v7796_v13, %v4413_v43  ;;  %v4421_v7 = vrot.slane %v4419_v45, 5  ;;  %v6535_v13 = vld [vmem:[%s8761_s1 + $0x3a4] ss:$8 sps:$4 sm:$0xff]  }
  0xe0   :  { %4314 = vmatmul.mubr.bf16.gmra.mrb[12].mxu1 %v8837_v20  ;;  %2219 = vmatprep.subr.bf16.mxu0 %v6529_v41  ;;  %v7977_v20 = vld [vmem:[#allocation2 + $0x28] sm:$0x33]  ;;  %v8840_v11 = vcombine.high %v7847_v60, %v7851_v14  ;;  %v4411_v19 = vor.u32 %v4410_v22, %v4407_v1  ;;  %v4424_v46 = vrot.slane %v4422_v25, 6  ;;  %v8841_v9 = vshrl.u32 %v6810_v53, 16 }
  0xe1   :  { %4857 = vmatpush1.bf16.msra.mxu1 %v7877_v34  ;;  %4323 = vmatprep.mubr.bf16.mxu1 %v8838_v40  ;;  %v1770_v34 = vor.u32 %v1769_v28, %v1766_v15  ;;  %v1783_v40 = vrot.slane %v1781_v0, 6  ;;  %v1792_v45 = vrot.slane %v1790_v5, 6  ;;  %v8842_v10 = vshll.u32 %v6810_v53, 16 }
  0xe2   :  { %4858 = vmatprep.subr.bf16.mxu1 %v7891_v12  ;;  %1680 = vmatmul.mubr.bf16.gmra.mrb[16].mxu0 %v8839_v61  ;;  %v1789_v12 = vrot.slane %v1787_v31, 5  ;;  %v1795_v4 = vrot.slane %v8841_v9, 5  ;;  %v1801_v15 = vshrl.u32 %v7977_v20, 16  ;;  %v1804_v28 = vshll.u32 %v7977_v20, 16 }
  0xe3   :  { %2220 = vmatpush1.bf16.msra.mxu0 %v6527_v26  ;;  %1689 = vmatprep.mubr.bf16.mxu0 %v8840_v11  ;;  %v1796_v43 = vrot.slane %v8842_v10, 6  ;;  %v8002_v0 = vsel %vm7614_vm8, %v1348_v37, %v1349_v62  ;;  %v8843_v1 = vrot.slane %v7415_v16, 5  ;;  %v1776_v25 = vrot.slane %v7973_v42, 4  ;;  %v6533_v62 = vld [vmem:[%s8761_s1 + $0x3a0] ss:$8 sps:$4 sm:$0xff]  }
  0xe4   :  { %2221 = vmatprep.subr.bf16.mxu0 %v6532_v36  ;;  %v1784_v53 = vor.u32 %v1783_v40, %v7975_v35  ;;  %v4428_v31 = vshrl.u32 %v7656_v32, 16  ;;  %v4431_v5 = vshll.u32 %v7656_v32, 16  ;;  %v4412_v37 = vrot.slane %v4411_v19, 4  ;;  %v6538_v35 = vld [vmem:[%s8761_s1 + $0x3b4] ss:$8 sps:$4 sm:$0xff]  }
  0xe5   :  { %4859 = vmatpush1.bf16.msra.mxu1 %v7907_v57  ;;  %v3992_v22 = vrot.slane %v8843_v1, 4  ;;  %v1771_v57 = vrot.slane %v1770_v34, 4  ;;  %v4417_v61 = vrot.slane %v4415_v49, 4  ;;  %v4425_v11 = vor.u32 %v4424_v46, %v4421_v7 }
  0xe6   :  { %4860 = vmatprep.subr.bf16.mxu1 %v6529_v41  ;;  %v8844_v41 = vcombine.low %v7829_v24, %v7843_v44  ;;  %v1793_v40 = vor.u32 %v1792_v45, %v1789_v12  ;;  %v1797_v34 = vor.u32 %v1796_v43, %v1795_v4  ;;  %v1803_v19 = vrot.slane %v1801_v15, 5  ;;  %v8051_v43 = vld [vmem:[#allocation2 + $0xe8] sm:$0x33] }
  0xe7   :  { %2222 = vmatpush1.bf16.msra.mxu0 %v6530_v59  ;;  %v1806_v9 = vrot.slane %v1804_v28, 6  ;;  %v8847_v24 = vcombine.high %v7863_v39, %v7867_v17  ;;  %v5959_v44 = vcombine.low %v7917_v54, %v7939_v18  ;;  %v5706_v7 = vcombine.high %v7970_v58, %v8002_v0 }
  0xe8   :  { %4324 = vmatmul.mubr.bf16.gmra.mrb[16].mxu1 %v8844_v41  ;;  %2223 = vmatprep.subr.bf16.mxu0 %v6535_v13  ;;  %v8848_v46 = vmov %v8843_v1  ;;  %v8849_v10 = vrot.slane %v7900_v30, 9  ;;  %v8047_v4 = vsel %vm7614_vm8, %v3992_v22, %v3993_v55  ;;  %v5705_v45 = vcombine.low %v7970_v58, %v8002_v0 }
  0xe9   :  { %4861 = vmatpush1.bf16.msra.mxu1 %v6527_v26  ;;  %4333 = vmatprep.mubr.bf16.mxu1 %v8847_v24  ;;  %v8850_v26 = vcombine.low %v7847_v60, %v7851_v14  ;;  %v4430_v15 = vrot.slane %v4428_v31, 5  ;;  %v4433_v28 = vrot.slane %v4431_v5, 6  ;;  %v8062_v2 = vsel %vm8021_vm11, %v1771_v57, %v7973_v42  ;;  %v6541_v14 = vld [vmem:[%s8761_s1 + $0x3c4] ss:$8 sps:$4 sm:$0xff]  }
  0xea   :  { %v8038_v12 = vsel %vm7614_vm8, %v8849_v10, %v8848_v46  ;;  %4862 = vmatprep.subr.bf16.mxu1 %v6532_v36  ;;  %v6536_v36 = vld [vmem:[%s8761_s1 + $0x3b0] ss:$8 sps:$4 sm:$0xff]   ;;  %v8066_v38 = vsel %vm8021_vm11, %v1776_v25, %v1784_v53  ;;  %v8070_v60 = vsel %vm8021_vm11, %v4412_v37, %v4415_v49  ;;  %v8077_v55 = vsel %vm8021_vm11, %v4417_v61, %v4425_v11 }
  0xeb   :  { %1690 = vmatmul.mubr.bf16.gmra.mrb[20].mxu0 %v8850_v26  ;;  %v1799_v42 = vrot.slane %v1797_v34, 4  ;;  %v1807_v1 = vor.u32 %v1806_v9, %v1803_v19  ;;  %v8851_v22 = vshrl.u32 %v6844_v27, 16  ;;  %v8852_v53 = vshll.u32 %v6844_v27, 16  ;;  %v6539_v27 = vld [vmem:[%s8761_s1 + $0x3c0] ss:$8 sps:$4 sm:$0xff]  }
  0xec   :  { %2224 = vmatpush1.bf16.msra.mxu0 %v6533_v62  ;;  %1699 = vmatprep.mubr.bf16.mxu0 %v5704_v50  ;;  %v1794_v50 = vrot.slane %v1793_v40, 4  ;;  %v4442_v31 = vshrl.u32 %v8051_v43, 16  ;;  %v4445_v5 = vshll.u32 %v8051_v43, 16  ;;  %v5962_v57 = vcombine.high %v8038_v12, %v8047_v4  ;;  %v6544_v9 = vld [vmem:[%s8761_s1 + $0x3d4] ss:$8 sps:$4 sm:$0xff]  }
  0xed   :  { %2225 = vmatprep.subr.bf16.mxu0 %v6538_v35  ;;  %4863 = vmatpush1.bf16.msra.mxu1 %v6530_v59  ;;  %v4436_v25 = vrot.slane %v8851_v22, 5  ;;  %v4437_v49 = vrot.slane %v8852_v53, 6  ;;  %v4434_v61 = vor.u32 %v4433_v28, %v4430_v15  ;;  %v5740_v11 = vcombine.high %v8062_v2, %v8066_v38  ;;  %v8139_v22 = vld [vmem:[#allocation2 + $0x100] sm:$0x33] }
  0xee   :  { %4864 = vmatprep.subr.bf16.mxu1 %v6535_v13  ;;  %v1810_v41 = vshrl.u32 %v7670_v21, 16  ;;  %v1813_v40 = vshll.u32 %v7670_v21, 16  ;;  %v8853_v19 = vcombine.low %v7863_v39, %v7867_v17  ;;  %v8108_v24 = vsel %vm8021_vm11, %v1794_v50, %v1797_v34  ;;  %v8122_v17 = vld [vmem:[%s8761_s1 + $0x3d0] ss:$8 sps:$4 sm:$0xff]  }
  0xef   :  { %v8112_v46 = vsel %vm8021_vm11, %v1799_v42, %v1807_v1  ;;  %v4451_v10 = vshrl.u32 %v7693_v63, 16  ;;  %v4454_v21 = vshll.u32 %v7693_v63, 16  ;;  %v8854_v39 = vcombine.high %v7917_v54, %v7939_v18  ;;  %v8132_v63 = vld [vmem:[#allocation2 + $0x40] sm:$0x33] }
  0xf0   :  { %2226 = vmatpush1.bf16.msra.mxu0 %v6536_v36  ;;  %4334 = vmatmul.mubr.bf16.gmra.mrb[20].mxu1 %v8853_v19  ;;  %v8126_v26 = vor.u32 %v4437_v49, %v4436_v25  ;;  %v8128_v15 = vrot.slane %v4442_v31, 5  ;;  %v8130_v28 = vrot.slane %v4445_v5, 6  ;;  %v4435_v50 = vrot.slane %v4434_v61, 4 }
  0xf1   :  { %2227 = vmatprep.subr.bf16.mxu0 %v6541_v14  ;;  %4865 = vmatpush1.bf16.msra.mxu1 %v6533_v62  ;;  %v8855_v62 = vcombine.low %v7913_v8, %v7931_v48  ;;  %v8856_v42 = vshrl.u32 %v6918_v23, 16  ;;  %v1833_v25 = vshrl.u32 %v7709_v47, 16  ;;  %v1836_v53 = vshll.u32 %v7709_v47, 16 }
  0xf2   :  { %4343 = vmatprep.mubr.bf16.mxu1 %v8854_v39  ;;  %4866 = vmatprep.subr.bf16.mxu1 %v6538_v35  ;;  %v8146_v35 = vld [vmem:[%s8761_s1 + $0x3e4] ss:$8 sps:$4 sm:$0xff]   ;;  %v1812_v48 = vrot.slane %v1810_v41, 5  ;;  %v1815_v49 = vrot.slane %v1813_v40, 6  ;;  %v8857_v31 = vshll.u32 %v6918_v23, 16  ;;  %v1824_v61 = vshrl.u32 %v8132_v63, 16 }
  0xf3   :  { %1700 = vmatmul.mubr.bf16.gmra.mrb[24].mxu0 %v8855_v62  ;;  %v1818_v1 = vrot.slane %v8856_v42, 5  ;;  %v1827_v47 = vshll.u32 %v8132_v63, 16  ;;  %v4453_v19 = vrot.slane %v4451_v10, 5  ;;  %v8154_v39 = vld [vmem:[#allocation2 + $0x58] sm:$0x33]  ;;  %v8858_v62 = vshrl.u32 %v6938_v51, 16 }
  0xf4   :  { %2228 = vmatpush1.bf16.msra.mxu0 %v6539_v27  ;;  %1709 = vmatprep.mubr.bf16.mxu0 %v5706_v7  ;;  %v1819_v5 = vrot.slane %v8857_v31, 6  ;;  %v4456_v7 = vrot.slane %v4454_v21, 6  ;;  %v8859_v13 = vshll.u32 %v6938_v51, 16  ;;  %v4465_v40 = vshrl.u32 %v8139_v22, 16  ;;  %v6545_v51 = vld [vmem:[%s8761_s1 + $0x3e0] ss:$8 sps:$4 sm:$0xff]  }
  0xf5   :  { %2229 = vmatprep.subr.bf16.mxu0 %v6544_v9  ;;  %4867 = vmatpush1.bf16.msra.mxu1 %v6536_v36  ;;  %v4459_v42 = vrot.slane %v8858_v62, 5  ;;  %v4468_v23 = vshll.u32 %v8139_v22, 16  ;;  %v1835_v31 = vrot.slane %v1833_v25, 5  ;;  %v1838_v8 = vrot.slane %v1836_v53, 6 }
  0xf6   :  { %v4460_v41 = vrot.slane %v8859_v13, 6  ;;  %4868 = vmatprep.subr.bf16.mxu1 %v6541_v14  ;;  %v8860_v59 = vshrl.u32 %v6948_v56, 16  ;;  %v8861_v21 = vshll.u32 %v6948_v56, 16  ;;  %v4440_v36 = vrot.slane %v8126_v26, 4  ;;  %v6550_v56 = vld [vmem:[%s8761_s1 + $0x3f4] ss:$8 sps:$4 sm:$0xff]  }
  0xf7   :  { %v4448_v13 = vor.u32 %v8130_v28, %v8128_v15  ;;  %v1847_v14 = vshrl.u32 %v8154_v39, 16  ;;  %v1850_v25 = vshll.u32 %v8154_v39, 16  ;;  %v1820_v53 = vor.u32 %v1819_v5, %v1818_v1 }
  0xf8   :  { %v1841_v10 = vrot.slane %v8860_v59, 5  ;;  %v1842_v34 = vrot.slane %v8861_v21, 6  ;;  %2230 = vmatpush1.bf16.msra.mxu0 %v8122_v17  ;;  %4344 = vmatmul.mubr.bf16.gmra.mrb[24].mxu1 %v5959_v44  ;;  %v1816_v59 = vor.u32 %v1815_v49, %v1812_v48  ;;  %v1826_v62 = vrot.slane %v1824_v61, 5  ;;  %v8210_v49 = vld [vmem:[#allocation2 + $0x118] sm:$0x33] }
  0xf9   :  { %2231 = vmatprep.subr.bf16.mxu0 %v8146_v35  ;;  %v1829_v21 = vrot.slane %v1827_v47, 6  ;;  %4869 = vmatpush1.bf16.msra.mxu1 %v6539_v27  ;;  %v4457_v15 = vor.u32 %v4456_v7, %v4453_v19  ;;  %v4461_v28 = vor.u32 %v4460_v41, %v4459_v42  ;;  %v4467_v37 = vrot.slane %v4465_v40, 5  ;;  %v6551_v40 = vld [vmem:[%s8761_s1 + $0x400] ss:$8 sps:$4 sm:$0xff]  }
  0xfa   :  { %4353 = vmatprep.mubr.bf16.mxu1 %v5962_v57  ;;  %v4470_v54 = vrot.slane %v4468_v23, 6  ;;  %4870 = vmatprep.subr.bf16.mxu1 %v6544_v9  ;;  %v1839_v18 = vor.u32 %v1838_v8, %v1835_v31  ;;  %v1843_v44 = vor.u32 %v1842_v34, %v1841_v10  ;;  %v4474_v1 = vshrl.u32 %v7726_v6, 16  ;;  %v6548_v57 = vld [vmem:[%s8761_s1 + $0x3f0] ss:$8 sps:$4 sm:$0xff]  }
  0xfb   :  { %1710 = vmatmul.mubr.bf16.gmra.mrb[28].mxu0 %v5705_v45  ;;  %v4477_v48 = vshll.u32 %v7726_v6, 16  ;;  %v8199_v58 = vsel %vm8021_vm11, %v4435_v50, %v8126_v26  ;;  %v5741_v0 = vcombine.low %v8108_v24, %v8112_v46  ;;  %v1849_v45 = vrot.slane %v1847_v14, 5  ;;  %v6553_v6 = vld [vmem:[%s8761_s1 + $0x404] ss:$8 sps:$4 sm:$0xff]  }
  0xfc   :  { %2232 = vmatpush1.bf16.msra.mxu0 %v6545_v51  ;;  %2235 = vmatprep.mubr.bf16.mxu0 %v5740_v11  ;;  %v1852_v27 = vrot.slane %v1850_v25, 6  ;;  %v8208_v9 = vsel %vm8021_vm11, %v4440_v36, %v4448_v13  ;;  %v1817_v11 = vrot.slane %v1816_v59, 4  ;;  %v1822_v34 = vrot.slane %v1820_v53, 4  ;;  %v6556_v36 = vld [vmem:[%s8761_s1 + $0x414] ss:$8 sps:$4 sm:$0xff]  }
  0xfd   :  { %2233 = vmatprep.subr.bf16.mxu0 %v6550_v56  ;;  %v1830_v8 = vor.u32 %v1829_v21, %v1826_v62  ;;  %4871 = vmatpush1.bf16.msra.mxu1 %v8122_v17  ;;  %v4458_v26 = vrot.slane %v4457_v15, 4  ;;  %v4463_v50 = vrot.slane %v4461_v28, 4  ;;  %v4471_v5 = vor.u32 %v4470_v54, %v4467_v37  ;;  %v8261_v15 = vld [vmem:[#allocation2 + $0x70] sm:$0x33] }
  0xfe   :  { %v8862_v61 = vshrl.u32 %v7056_v29, 16  ;;  %4872 = vmatprep.subr.bf16.mxu1 %v8146_v35  ;;  %v1840_v19 = vrot.slane %v1839_v18, 4  ;;  %v1845_v7 = vrot.slane %v1843_v44, 4  ;;  %v4476_v42 = vrot.slane %v4474_v1, 5 }
  0xff   :  { %v4479_v41 = vrot.slane %v4477_v48, 6  ;;  %v1853_v23 = vor.u32 %v1852_v27, %v1849_v45  ;;  %v8863_v17 = vshll.u32 %v7056_v29, 16  ;;  %v4488_v37 = vshrl.u32 %v8210_v49, 16 }
 0x100   :  { %v4482_v47 = vrot.slane %v8862_v61, 5  ;;  %2234 = vmatpush1.bf16.msra.mxu0 %v6548_v57  ;;  %v4491_v10 = vshll.u32 %v8210_v49, 16  ;;  %v8864_v35 = vcombine.low %v8038_v12, %v8047_v4  ;;  %v5998_v13 = vcombine.high %v8199_v58, %v8208_v9  ;;  %v8289_v61 = vld [vmem:[%s8761_s1 + $0x420] ss:$8 sps:$4 sm:$0xff]  }
 0x101   :  { %v4483_v31 = vrot.slane %v8863_v17, 6  ;;  %2687 = vmatprep.subr.bf16.mxu0 %v6553_v6  ;;  %v5997_v29 = vcombine.low %v8199_v58, %v8208_v9  ;;  %v1856_v14 = vshrl.u32 %v7737_v33, 16  ;;  %v1859_v25 = vshll.u32 %v7737_v33, 16  ;;  %4873 = vmatpush1.bf16.msra.mxu1 %v6545_v51 }
 0x102   :  { %4354 = vmatmul.mubr.bf16.gmra.mrb[28].mxu1 %v8864_v35  ;;  %v8865_v12 = vcombine.high %v8070_v60, %v8077_v55  ;;  %v8240_v4 = vsel %vm8021_vm11, %v1817_v11, %v1820_v53  ;;  %v8244_v59 = vsel %vm8021_vm11, %v1822_v34, %v1830_v8  ;;  %v8248_v62 = vsel %vm8021_vm11, %v4458_v26, %v4461_v28 }
 0x103   :  { %4874 = vmatprep.subr.bf16.mxu1 %v6550_v56  ;;  %v8866_v33 = vcombine.low %v8062_v2, %v8066_v38  ;;  %v8255_v51 = vsel %vm8021_vm11, %v4463_v50, %v4471_v5  ;;  %v8259_v53 = vsel %vm8021_vm11, %v1840_v19, %v1843_v44  ;;  %v4480_v21 = vor.u32 %v4479_v41, %v4476_v42  ;;  %v6554_v56 = vld [vmem:[%s8761_s1 + $0x410] ss:$8 sps:$4 sm:$0xff]   ;;  %v6559_v44 = vld [vmem:[%s8761_s1 + $0x424] ss:$8 sps:$4 sm:$0xff]  }
 0x104   :  { %4876 = vmatprep.mubr.bf16.mxu1 %v8865_v12  ;;  %v8867_v2 = vcombine.high %v8108_v24, %v8112_v46  ;;  %v8271_v38 = vsel %vm8021_vm11, %v1845_v7, %v1853_v23  ;;  %v8273_v28 = vor.u32 %v4483_v31, %v4482_v47  ;;  %v4490_v54 = vrot.slane %v4488_v37, 5  ;;  %v8301_v7 = vld [vmem:[#allocation2 + $0x130] sm:$0x33]  ;;  %v8875_v46 = vld [vmem:[#allocation7_spill] sm:$0xff] }
 0x105   :  { %2236 = vmatmul.mubr.bf16.vlgmr.msra.gmra.mrb[0].mxu0 %v8866_v33  ;;  %v4493_v18 = vrot.slane %v4491_v10, 6  ;;  %v1858_v1 = vrot.slane %v1856_v14, 5  ;;  %v1861_v48 = vrot.slane %v1859_v25, 6  ;;  %v8868_v45 = vshrl.u32 %v7083_v52, 16  ;;  %4875 = vmatpush1.bf16.msra.mxu1 %v6548_v57  ;;  %v8870_v42 = vld [vmem:[#allocation12_spill] sm:$0xff] }
 0x106   :  { %2688 = vmatpush1.bf16.msra.mxu0 %v6551_v40  ;;  %2245 = vmatprep.mubr.bf16.mxu0 %v8867_v2  ;;  %v8869_v11 = vshll.u32 %v7083_v52, 16  ;;  %v1870_v8 = vshrl.u32 %v8261_v15, 16  ;;  %v1873_v26 = vshll.u32 %v8261_v15, 16  ;;  %v4497_v50 = vshrl.u32 %v7766_v3, 16  ;;  %v6562_v31 = vld [vmem:[%s8761_s1 + $0x434] ss:$8 sps:$4 sm:$0xff]  }
 0x107   :  { %2689 = vmatprep.subr.bf16.mxu0 %v6556_v36  ;;  %v1864_v27 = vrot.slane %v8868_v45, 5  ;;  %v4500_v5 = vshll.u32 %v7766_v3, 16  ;;  %5325 = vmatprep.subr.bf16.mxu1 %v6553_v6  ;;  %v5744_v47 = vcombine.high %v8240_v4, %v8244_v59  ;;  %v6000_v52 = vcombine.high %v8248_v62, %v8255_v51 }
 0x108   :  { %v1865_v34 = vrot.slane %v8869_v11, 6  ;;  %v5743_v57 = vcombine.low %v8240_v4, %v8244_v59  ;;  %v5999_v19 = vcombine.low %v8248_v62, %v8255_v51  ;;  %v5746_v3 = vcombine.high %v8259_v53, %v8271_v38 }
 0x109   :  { %v4481_v6 = vrot.slane %v4480_v21, 4  ;;  %v1879_v41 = vshrl.u32 %v8870_v42, 16  ;;  %v1882_v23 = vshll.u32 %v8870_v42, 16  ;;  %v8871_v17 = vcombine.low %v8070_v60, %v8077_v55  ;;  %v8320_v55 = vld [vmem:[#allocation2 + $0x88] sm:$0x33]  ;;  %v8872_v21 = vld [vmem:[#allocation6_spill] sm:$0xff] }
 0x10a   :  { %2690 = vmatpush1.bf16.msra.mxu0 %v6554_v56  ;;  %v4486_v37 = vrot.slane %v8273_v28, 4  ;;  %v4494_v10 = vor.u32 %v4493_v18, %v4490_v54  ;;  %v1862_v35 = vor.u32 %v1861_v48, %v1858_v1  ;;  %v8312_v14 = vor.u32 %v1865_v34, %v1864_v27  ;;  %v6565_v34 = vld [vmem:[%s8761_s1 + $0x444] ss:$8 sps:$4 sm:$0xff]  }
 0x10b   :  { %4877 = vmatmul.mubr.bf16.vlgmr.msra.gmra.mrb[0].mxu1 %v8871_v17  ;;  %2691 = vmatprep.subr.bf16.mxu0 %v6559_v44  ;;  %v8314_v25 = vrot.slane %v1870_v8, 5  ;;  %v8316_v12 = vrot.slane %v1873_v26, 6  ;;  %v8318_v33 = vrot.slane %v4497_v50, 5  ;;  %v4502_v60 = vrot.slane %v4500_v5, 6  ;;  %v8878_v50 = vld [vmem:[#allocation13_spill] sm:$0xff] }
 0x10c   :  { %5326 = vmatpush1.bf16.msra.mxu1 %v6551_v40  ;;  %4886 = vmatprep.mubr.bf16.mxu1 %v5998_v13  ;;  %v8873_v2 = vshrl.u32 %v8872_v21, 16  ;;  %v8874_v40 = vshll.u32 %v8872_v21, 16  ;;  %v4511_v18 = vshrl.u32 %v8301_v7, 16  ;;  %v4514_v1 = vshll.u32 %v8301_v7, 16 }
 0x10d   :  { %5327 = vmatprep.subr.bf16.mxu1 %v6556_v36  ;;  %2246 = vmatmul.mubr.bf16.gmra.mrb[4].mxu0 %v5741_v0  ;;  %v6560_v36 = vld [vmem:[%s8761_s1 + $0x430] ss:$8 sps:$4 sm:$0xff]   ;;  %v1881_v48 = vrot.slane %v1879_v41, 5  ;;  %v1884_v24 = vrot.slane %v1882_v23, 6  ;;  %v8876_v0 = vshrl.u32 %v8875_v46, 16  ;;  %v8877_v27 = vshll.u32 %v8875_v46, 16 }
 0x10e   :  { %v4505_v54 = vrot.slane %v8873_v2, 5  ;;  %v4506_v13 = vrot.slane %v8874_v40, 6  ;;  %2692 = vmatpush1.bf16.msra.mxu0 %v8289_v61  ;;  %2255 = vmatprep.mubr.bf16.mxu0 %v5744_v47  ;;  %v1893_v8 = vshrl.u32 %v8320_v55, 16  ;;  %v1896_v26 = vshll.u32 %v8320_v55, 16  ;;  %v8363_v46 = vld [vmem:[#allocation2 + $0x148] sm:$0x33] }
 0x10f   :  { %v1887_v45 = vrot.slane %v8876_v0, 5  ;;  %v1888_v11 = vrot.slane %v8877_v27, 6  ;;  %2693 = vmatprep.subr.bf16.mxu0 %v6562_v31  ;;  %v4520_v5 = vshrl.u32 %v8878_v50, 16  ;;  %v4523_v47 = vshll.u32 %v8878_v50, 16  ;;  %v6571_v27 = vld [vmem:[%s8761_s1 + $0x464] ss:$8 sps:$4 sm:$0xff]  }
 0x110   :  { %5328 = vmatpush1.bf16.msra.mxu1 %v6554_v56  ;;  %v8349_v42 = vsel %vm8021_vm11, %v4481_v6, %v8273_v28  ;;  %v8353_v41 = vsel %vm8021_vm11, %v4486_v37, %v4494_v10  ;;  %v1863_v23 = vrot.slane %v1862_v35, 4  ;;  %v1868_v17 = vrot.slane %v8312_v14, 4  ;;  %v6563_v28 = vld [vmem:[%s8761_s1 + $0x440] ss:$8 sps:$4 sm:$0xff]  }
 0x111   :  { %5329 = vmatprep.subr.bf16.mxu1 %v6559_v44  ;;  %v1876_v21 = vor.u32 %v8316_v12, %v8314_v25  ;;  %v4503_v2 = vor.u32 %v4502_v60, %v8318_v33  ;;  %v8359_v40 = vor.u32 %v4506_v13, %v4505_v54  ;;  %v8361_v56 = vrot.slane %v4511_v18, 5  ;;  %v8879_v44 = vld [vmem:[#allocation8_spill] sm:$0xff] }
 0x112   :  { %2694 = vmatpush1.bf16.msra.mxu0 %v6560_v36  ;;  %v4516_v6 = vrot.slane %v4514_v1, 6  ;;  %v1885_v37 = vor.u32 %v1884_v24, %v1881_v48  ;;  %v1889_v10 = vor.u32 %v1888_v11, %v1887_v45  ;;  %v8880_v35 = vshrl.u32 %v8879_v44, 16  ;;  %v6568_v25 = vld [vmem:[%s8761_s1 + $0x454] ss:$8 sps:$4 sm:$0xff]   ;;  %v8410_v45 = vld [vmem:[#allocation2 + $0xa0] sm:$0x33] }
 0x113   :  { %4887 = vmatmul.mubr.bf16.gmra.mrb[4].mxu1 %v5997_v29  ;;  %2695 = vmatprep.subr.bf16.mxu0 %v6565_v34  ;;  %v1895_v12 = vrot.slane %v1893_v8, 5  ;;  %v1898_v33 = vrot.slane %v1896_v26, 6  ;;  %v4522_v60 = vrot.slane %v4520_v5, 5  ;;  %v4525_v54 = vrot.slane %v4523_v47, 6  ;;  %v8882_v29 = vld [vmem:[#allocation14_spill] sm:$0xff] }
 0x114   :  { %v4528_v0 = vrot.slane %v8880_v35, 5  ;;  %5330 = vmatpush1.bf16.msra.mxu1 %v8289_v61  ;;  %4896 = vmatprep.mubr.bf16.mxu1 %v6000_v52  ;;  %v8881_v13 = vshll.u32 %v8879_v44, 16  ;;  %v4534_v58 = vshrl.u32 %v8363_v46, 16  ;;  %v4537_v9 = vshll.u32 %v8363_v46, 16 }
 0x115   :  { %v1902_v1 = vshrl.u32 %v8882_v29, 16  ;;  %5331 = vmatprep.subr.bf16.mxu1 %v6562_v31  ;;  %2256 = vmatmul.mubr.bf16.gmra.mrb[8].mxu0 %v5743_v57  ;;  %v6002_v61 = vcombine.high %v8349_v42, %v8353_v41  ;;  %v5745_v52 = vcombine.low %v8259_v53, %v8271_v38  ;;  %v8395_v48 = vsel %vm8021_vm11, %v1863_v23, %v8312_v14  ;;  %v6566_v31 = vld [vmem:[%s8761_s1 + $0x450] ss:$8 sps:$4 sm:$0xff]  }
 0x116   :  { %v4529_v18 = vrot.slane %v8881_v13, 6  ;;  %v1905_v24 = vshll.u32 %v8882_v29, 16  ;;  %2696 = vmatpush1.bf16.msra.mxu0 %v6563_v28  ;;  %2265 = vmatprep.mubr.bf16.mxu0 %v5746_v3  ;;  %v8406_v4 = vsel %vm8021_vm11, %v1868_v17, %v1876_v21  ;;  %v4504_v59 = vrot.slane %v4503_v2, 4  ;;  %v8883_v23 = vld [vmem:[#allocation9_spill] sm:$0xff] }
 0x117   :  { %v4509_v57 = vrot.slane %v8359_v40, 4  ;;  %v4517_v14 = vor.u32 %v4516_v6, %v8361_v56  ;;  %2697 = vmatprep.subr.bf16.mxu0 %v6568_v25  ;;  %v1886_v11 = vrot.slane %v1885_v37, 4  ;;  %v1891_v8 = vrot.slane %v1889_v10, 4  ;;  %v6569_v37 = vld [vmem:[%s8761_s1 + $0x460] ss:$8 sps:$4 sm:$0xff]  }
 0x118   :  { %v1899_v53 = vor.u32 %v1898_v33, %v1895_v12  ;;  %v4526_v38 = vor.u32 %v4525_v54, %v4522_v60  ;;  %5332 = vmatpush1.bf16.msra.mxu1 %v6560_v36  ;;  %v4530_v3 = vor.u32 %v4529_v18, %v4528_v0  ;;  %v4536_v26 = vrot.slane %v4534_v58, 5  ;;  %v6574_v33 = vld [vmem:[%s8761_s1 + $0x474] ss:$8 sps:$4 sm:$0xff]   ;;  %v8453_v58 = vld [vmem:[#allocation2 + $0x160] sm:$0x33] }
 0x119   :  { %v4539_v50 = vrot.slane %v4537_v9, 6  ;;  %v1904_v5 = vrot.slane %v1902_v1, 5  ;;  %5333 = vmatprep.subr.bf16.mxu1 %v6565_v34  ;;  %v1907_v47 = vrot.slane %v1905_v24, 6  ;;  %v8884_v17 = vshrl.u32 %v8883_v23, 16  ;;  %v8886_v34 = vld [vmem:[#allocation15_spill] sm:$0xff]  ;;  %v8887_v1 = vld [vmem:[#allocation16_spill] sm:$0xff] }
 0x11a   :  { %v8885_v2 = vshll.u32 %v8883_v23, 16  ;;  %v1916_v6 = vshrl.u32 %v8410_v45, 16  ;;  %2698 = vmatpush1.bf16.msra.mxu0 %v6566_v31  ;;  %v5748_v36 = vcombine.high %v8395_v48, %v8406_v4  ;;  %v1919_v44 = vshll.u32 %v8410_v45, 16  ;;  %v6577_v24 = vld [vmem:[%s8761_s1 + $0x484] ss:$8 sps:$4 sm:$0xff]  }
 0x11b   :  { %v1910_v21 = vrot.slane %v8884_v17, 5  ;;  %v4543_v35 = vshrl.u32 %v8886_v34, 16  ;;  %v4546_v0 = vshll.u32 %v8886_v34, 16  ;;  %4897 = vmatmul.mubr.bf16.gmra.mrb[8].mxu1 %v5999_v19  ;;  %2699 = vmatprep.subr.bf16.mxu0 %v6571_v27  ;;  %v6001_v12 = vcombine.low %v8349_v42, %v8353_v41  ;;  %v6575_v23 = vld [vmem:[%s8761_s1 + $0x480] ss:$8 sps:$4 sm:$0xff]  }
 0x11c   :  { %v1911_v56 = vrot.slane %v8885_v2, 6  ;;  %v8439_v60 = vsel %vm8021_vm11, %v4504_v59, %v8359_v40  ;;  %v8443_v54 = vsel %vm8021_vm11, %v4509_v57, %v4517_v14  ;;  %5334 = vmatpush1.bf16.msra.mxu1 %v6563_v28  ;;  %4906 = vmatprep.mubr.bf16.mxu1 %v6002_v61  ;;  %v8447_v62 = vsel %vm8021_vm11, %v1886_v11, %v1889_v10  ;;  %v6572_v28 = vld [vmem:[%s8761_s1 + $0x470] ss:$8 sps:$4 sm:$0xff]   ;;  %v8888_v14 = vld [vmem:[#allocation10_spill] sm:$0xff] }
 0x11d   :  { %v8451_v51 = vsel %vm8021_vm11, %v1891_v8, %v1899_v53  ;;  %v4527_v19 = vrot.slane %v4526_v38, 4  ;;  %v4532_v42 = vrot.slane %v4530_v3, 4  ;;  %5335 = vmatprep.subr.bf16.mxu1 %v6568_v25  ;;  %2266 = vmatmul.mubr.bf16.gmra.mrb[12].mxu0 %v5745_v52  ;;  %v4540_v41 = vor.u32 %v4539_v50, %v4536_v26 }
 0x11e   :  { %v1908_v40 = vor.u32 %v1907_v47, %v1904_v5  ;;  %v1912_v13 = vor.u32 %v1911_v56, %v1910_v21  ;;  %v1918_v18 = vrot.slane %v1916_v6, 5  ;;  %2700 = vmatpush1.bf16.msra.mxu0 %v6569_v37  ;;  %2275 = vmatprep.mubr.bf16.mxu0 %v5748_v36  ;;  %v1921_v10 = vrot.slane %v1919_v44, 6  ;;  %v8891_v56 = vld [vmem:[#allocation11_spill] sm:$0xff] }
 0x11f   :  { %v4545_v9 = vrot.slane %v4543_v35, 5  ;;  %v4548_v29 = vrot.slane %v4546_v0, 6  ;;  %v1925_v61 = vshrl.u32 %v8887_v1, 16  ;;  %2701 = vmatprep.subr.bf16.mxu0 %v6574_v33  ;;  %v6004_v25 = vcombine.high %v8439_v60, %v8443_v54 }
 0x120   :  { %v5747_v52 = vcombine.low %v8395_v48, %v8406_v4  ;;  %v5750_v59 = vcombine.high %v8447_v62, %v8451_v51  ;;  %v1928_v57 = vshll.u32 %v8887_v1, 16  ;;  %5336 = vmatpush1.bf16.msra.mxu1 %v6566_v31  ;;  %v8889_v11 = vshrl.u32 %v8888_v14, 16  ;;  %v8475_v4 = vld [vmem:[#allocation2 + $0xb8] sm:$0x33] }
 0x121   :  { %v8890_v53 = vshll.u32 %v8888_v14, 16  ;;  %v4557_v26 = vshrl.u32 %v8453_v58, 16  ;;  %v4560_v48 = vshll.u32 %v8453_v58, 16  ;;  %5337 = vmatprep.subr.bf16.mxu1 %v6571_v27  ;;  %v8479_v50 = vsel %vm8021_vm11, %v4527_v19, %v4530_v3  ;;  %v6580_v3 = vld [vmem:[%s8761_s1 + $0x494] ss:$8 sps:$4 sm:$0xff]  }
 0x122   :  { %v4551_v8 = vrot.slane %v8889_v11, 5  ;;  %v8483_v31 = vsel %vm8021_vm11, %v4532_v42, %v4540_v41  ;;  %v1909_v5 = vrot.slane %v1908_v40, 4  ;;  %v1914_v47 = vrot.slane %v1912_v13, 4  ;;  %2702 = vmatpush1.bf16.msra.mxu0 %v6572_v28 }
 0x123   :  { %v4552_v38 = vrot.slane %v8890_v53, 6  ;;  %v1922_v17 = vor.u32 %v1921_v10, %v1918_v18  ;;  %v4549_v21 = vor.u32 %v4548_v29, %v4545_v9  ;;  %v1927_v2 = vrot.slane %v1925_v61, 5  ;;  %4907 = vmatmul.mubr.bf16.gmra.mrb[12].mxu1 %v6001_v12  ;;  %2703 = vmatprep.subr.bf16.mxu0 %v6577_v24 }
 0x124   :  { %v8892_v27 = vshrl.u32 %v8891_v56, 16  ;;  %v1930_v36 = vrot.slane %v1928_v57, 6  ;;  %v8893_v44 = vshll.u32 %v8891_v56, 16  ;;  %v1939_v35 = vshrl.u32 %v8475_v4, 16  ;;  %5338 = vmatpush1.bf16.msra.mxu1 %v6569_v37  ;;  %4916 = vmatprep.mubr.bf16.mxu1 %v6004_v25  ;;  %v6578_v37 = vld [vmem:[%s8761_s1 + $0x490] ss:$8 sps:$4 sm:$0xff]  }
 0x125   :  { %v1942_v0 = vshll.u32 %v8475_v4, 16  ;;  %v4553_v19 = vor.u32 %v4552_v38, %v4551_v8  ;;  %v4559_v42 = vrot.slane %v4557_v26, 5  ;;  %v4562_v41 = vrot.slane %v4560_v48, 6  ;;  %5339 = vmatprep.subr.bf16.mxu1 %v6574_v33  ;;  %2276 = vmatmul.mubr.bf16.gmra.mrb[16].mxu0 %v5747_v52 }
 0x126   :  { %v1933_v6 = vrot.slane %v8892_v27, 5  ;;  %v1934_v34 = vrot.slane %v8893_v44, 6  ;;  %v4566_v12 = vshrl.u32 %v7900_v30, 16  ;;  %v6003_v40 = vcombine.low %v8439_v60, %v8443_v54  ;;  %2704 = vmatpush1.bf16.msra.mxu0 %v6575_v23  ;;  %2285 = vmatprep.mubr.bf16.mxu0 %v5750_v59 }
 0x127   :  { %v5749_v18 = vcombine.low %v8447_v62, %v8451_v51  ;;  %v4569_v10 = vshll.u32 %v7900_v30, 16  ;;  %v6006_v9 = vcombine.high %v8479_v50, %v8483_v31  ;;  %v8510_v33 = vsel %vm8021_vm11, %v1909_v5, %v1912_v13  ;;  %v8516_v62 = vld [vmem:[#allocation2 + $0x178] sm:$0x33]  ;;  %2705 = vmatprep.subr.bf16.mxu0 %v6580_v3  ;;  %v6583_v30 = vld [vmem:[%s8761_s1 + $0x4a4] ss:$8 sps:$4 sm:$0xff]  }
 0x128   :  { %v8514_v60 = vsel %vm8021_vm11, %v1914_v47, %v1922_v17  ;;  %v4550_v54 = vrot.slane %v4549_v21, 4  ;;  %v1931_v51 = vor.u32 %v1930_v36, %v1927_v2  ;;  %v1935_v29 = vor.u32 %v1934_v34, %v1933_v6  ;;  %5340 = vmatpush1.bf16.msra.mxu1 %v6572_v28  ;;  %v6581_v28 = vld [vmem:[%s8761_s1 + $0x4a0] ss:$8 sps:$4 sm:$0xff]   ;;  %v6589_v36 = vld [vmem:[%s8761_s1 + $0x4c4] ss:$8 sps:$4 sm:$0xff]  }
 0x129   :  { %v1941_v1 = vrot.slane %v1939_v35, 5  ;;  %v1944_v61 = vrot.slane %v1942_v0, 6  ;;  %v4555_v25 = vrot.slane %v4553_v19, 4  ;;  %v4563_v13 = vor.u32 %v4562_v41, %v4559_v42  ;;  %5341 = vmatprep.subr.bf16.mxu1 %v6577_v24  ;;  %v6586_v24 = vld [vmem:[%s8761_s1 + $0x4b4] ss:$8 sps:$4 sm:$0xff]   ;;  %v6633_v34 = vld [vmem:[#allocation2 + $0x8] sm:$0xff] }
 0x12a   :  { %v4568_v52 = vrot.slane %v4566_v12, 5  ;;  %v8894_v59 = vshrl.u32 %v7415_v16, 16  ;;  %v4571_v14 = vrot.slane %v4569_v10, 6  ;;  %v8895_v11 = vshll.u32 %v7415_v16, 16  ;;  %2706 = vmatpush1.bf16.msra.mxu0 %v6578_v37  ;;  %v6587_v12 = vld [vmem:[%s8761_s1 + $0x4c0] ss:$8 sps:$4 sm:$0xff]  }
 0x12b   :  { %v4580_v53 = vshrl.u32 %v8516_v62, 16  ;;  %v4583_v38 = vshll.u32 %v8516_v62, 16  ;;  %v5752_v26 = vcombine.high %v8510_v33, %v8514_v60  ;;  %4917 = vmatmul.mubr.bf16.gmra.mrb[16].mxu1 %v6003_v40  ;;  %2707 = vmatprep.subr.bf16.mxu0 %v6583_v30  ;;  %v1932_v16 = vrot.slane %v1931_v51, 4  ;;  %v6635_v51 = vld [vmem:[#allocation2 + $0xc8] sm:$0xff] }
 0x12c   :  { %v4574_v57 = vrot.slane %v8894_v59, 5  ;;  %v4575_v8 = vrot.slane %v8895_v11, 6  ;;  %v1937_v48 = vrot.slane %v1935_v29, 4  ;;  %v1945_v5 = vor.u32 %v1944_v61, %v1941_v1  ;;  %5342 = vmatpush1.bf16.msra.mxu1 %v6575_v23  ;;  %4926 = vmatprep.mubr.bf16.mxu1 %v6006_v9  ;;  %v6584_v23 = vld [vmem:[%s8761_s1 + $0x4b0] ss:$8 sps:$4 sm:$0xff]   ;;  %v6636_v59 = vld [vmem:[#allocation2 + $0x20] sm:$0xff] }
 0x12d   :  { %v8537_v47 = vsel %vm8021_vm11, %v4550_v54, %v4553_v19  ;;  %v8541_v17 = vsel %vm8021_vm11, %v4555_v25, %v4563_v13  ;;  %5343 = vmatprep.subr.bf16.mxu1 %v6580_v3  ;;  %2286 = vmatmul.mubr.bf16.gmra.mrb[20].mxu0 %v5749_v18  ;;  %v4572_v21 = vor.u32 %v4571_v14, %v4568_v52  ;;  %v4582_v56 = vrot.slane %v4580_v53, 5  ;;  %v6592_v18 = vld [vmem:[%s8761_s1 + $0x4d4] ss:$8 sps:$4 sm:$0xff]   ;;  %v6590_v1 = vld [vmem:[%s8761_s1 + $0x4d0] ss:$8 sps:$4 sm:$0xff]  }
 0x12e   :  { %v4576_v2 = vor.u32 %v4575_v8, %v4574_v57  ;;  %v4585_v27 = vrot.slane %v4583_v38, 6  ;;  %2708 = vmatpush1.bf16.msra.mxu0 %v6581_v28  ;;  %2295 = vmatprep.mubr.bf16.mxu0 %v5752_v26  ;;  %v6005_v6 = vcombine.low %v8479_v50, %v8483_v31  ;;  %v8553_v3 = vsel %vm8021_vm11, %v1932_v16, %v1935_v29  ;;  %v2348_v31 = vld [vmem:[#allocation2] sm:$0xcc]  ;;  %v6634_v9 = vld [vmem:[#allocation2 + $0x10] sm:$0x33] }
 0x12f   :  { %2709 = vmatprep.subr.bf16.mxu0 %v6586_v24  ;;  %v8557_v44 = vsel %vm8021_vm11, %v1937_v48, %v1945_v5  ;;  %v2377_v35 = vrot.slane %v6633_v34, 6  ;;  %v6008_v0 = vcombine.high %v8537_v47, %v8541_v17  ;;  %v5751_v50 = vcombine.low %v8510_v33, %v8514_v60  ;;  %v4989_v61 = vld [vmem:[#allocation2 + $0xc0] sm:$0xcc]  ;;  %v2349_v11 = vld [vmem:[#allocation2 + $0x18] sm:$0xcc] }
 0x130   :  { %5344 = vmatpush1.bf16.msra.mxu1 %v6578_v37  ;;  %v4573_v19 = vrot.slane %v4572_v21, 4  ;;  %v4578_v42 = vrot.slane %v4576_v2, 4  ;;  %v4586_v41 = vor.u32 %v4585_v27, %v4582_v56  ;;  %v5754_v40 = vcombine.high %v8553_v3, %v8557_v44  ;;  %v6595_v13 = vld [vmem:[%s8761_s1 + $0x4e4] ss:$8 sps:$4 sm:$0xff]   ;;  %v6598_v48 = vld [vmem:[%s8761_s1 + $0x4f4] ss:$8 sps:$4 sm:$0xff]  }
 0x131   :  { %5345 = vmatprep.subr.bf16.mxu1 %v6583_v30  ;;  %v5787_v10 = vrot.slane %v2348_v31, 10  ;;  %v2379_v37 = vrot.slane %v2377_v35, 4  ;;  %v2380_v33 = vrot.slane %v6634_v9, 6  ;;  %v5015_v29 = vrot.slane %v6635_v51, 6  ;;  %v6638_v56 = vld [vmem:[#allocation2 + $0xe0] sm:$0xff]  ;;  %v6640_v9 = vld [vmem:[#allocation2 + $0xf8] sm:$0xff] }
 0x132   :  { %2710 = vmatpush1.bf16.msra.mxu0 %v6584_v23  ;;  %v4577_v54 = vsel %vm8021_vm11, %v4573_v19, %v4576_v2  ;;  %v4587_v30 = vsel %vm8021_vm11, %v4578_v42, %v4586_v41  ;;  %v6007_v25 = vcombine.low %v8537_v47, %v8541_v17  ;;  %v2384_v57 = vrot.slane %v6636_v59, 6  ;;  %v6641_v51 = vld [vmem:[#allocation2 + $0x50] sm:$0xff] }
 0x133   :  { %4927 = vmatmul.mubr.bf16.gmra.mrb[20].mxu1 %v6005_v6  ;;  %2711 = vmatprep.subr.bf16.mxu0 %v6589_v36  ;;  %v2378_v32 = vsel %vm8572_vm14, %v5787_v10, %v2377_v35  ;;  %v2381_v52 = vsel %vm8572_vm14, %v2379_v37, %v2380_v33  ;;  %v6010_v14 = vcombine.high %v4577_v54, %v4587_v30  ;;  %v6043_v53 = vrot.slane %v4989_v61, 10  ;;  %v4990_v6 = vld [vmem:[#allocation2 + $0xd8] sm:$0xcc]  ;;  %v2351_v61 = vld [vmem:[#allocation2 + $0x48] sm:$0xcc] }
 0x134   :  { %5346 = vmatpush1.bf16.msra.mxu1 %v6581_v28  ;;  %4936 = vmatprep.mubr.bf16.mxu1 %v6008_v0  ;;  %v5753_v8 = vcombine.low %v8553_v3, %v8557_v44  ;;  %v5017_v38 = vrot.slane %v5015_v29, 4  ;;  %v6637_v28 = vld [vmem:[#allocation2 + $0xd0] sm:$0x33]  ;;  %v5796_v16 = vcombine.high %v2378_v32, %v2381_v52  ;;  %v5788_v5 = vrot.slane %v2349_v11, 10  ;;  %v6639_v44 = vld [vmem:[#allocation2 + $0x38] sm:$0xff] }
 0x135   :  { %5347 = vmatprep.subr.bf16.mxu1 %v6586_v24  ;;  %2296 = vmatmul.mubr.bf16.gmra.mrb[24].mxu0 %v5751_v50  ;;  %v5018_v26 = vrot.slane %v6637_v28, 6  ;;  %v6593_v24 = vld [vmem:[%s8761_s1 + $0x4e0] ss:$8 sps:$4 sm:$0xff]   ;;  %v2386_v47 = vrot.slane %v2384_v57, 4  ;;  %v2387_v17 = vrot.slane %v7977_v20, 6  ;;  %v5016_v21 = vsel %vm8572_vm14, %v6043_v53, %v5015_v29 }
 0x136   :  { %2712 = vmatpush1.bf16.msra.mxu0 %v6587_v12  ;;  %2305 = vmatprep.mubr.bf16.mxu0 %v5754_v40  ;;  %v5022_v27 = vrot.slane %v6638_v56, 6  ;;  %v6009_v20 = vcombine.low %v4577_v54, %v4587_v30  ;;  %v2391_v34 = vrot.slane %v6639_v44, 6  ;;  %v2350_v0 = vld [vmem:[#allocation2 + $0x30] sm:$0xcc]  ;;  %v5795_v50 = vcombine.low %v2378_v32, %v2381_v52  ;;  %v6644_v44 = vld [vmem:[#allocation2 + $0x128] sm:$0xff] }
 0x137   :  { %2713 = vmatprep.subr.bf16.mxu0 %v6592_v18  ;;  %v5019_v2 = vsel %vm8572_vm14, %v5017_v38, %v5018_v26  ;;  %v2388_v3 = vsel %vm8572_vm14, %v2386_v47, %v2387_v17  ;;  %v6044_v31 = vrot.slane %v4990_v6, 10  ;;  %v5025_v42 = vrot.slane %v8051_v43, 6  ;;  %v4991_v43 = vld [vmem:[#allocation2 + $0xf0] sm:$0xcc]  ;;  %v4992_v26 = vld [vmem:[#allocation2 + $0x108] sm:$0xcc] }
 0x138   :  { %5348 = vmatpush1.bf16.msra.mxu1 %v6584_v23  ;;  %v6596_v23 = vld [vmem:[%s8761_s1 + $0x4f0] ss:$8 sps:$4 sm:$0xff]   ;;  %v6052_v35 = vcombine.high %v5016_v21, %v5019_v2  ;;  %v5024_v19 = vrot.slane %v5022_v27, 4  ;;  %v2393_v40 = vrot.slane %v2391_v34, 4  ;;  %v5029_v33 = vrot.slane %v6640_v9, 6 }
 0x139   :  { %5349 = vmatprep.subr.bf16.mxu1 %v6589_v36  ;;  %v2385_v36 = vsel %vm8572_vm14, %v5788_v5, %v2384_v57  ;;  %v5023_v10 = vsel %vm8572_vm14, %v6044_v31, %v5022_v27  ;;  %v6051_v54 = vcombine.low %v5016_v21, %v5019_v2  ;;  %v2398_v29 = vrot.slane %v6641_v51, 6  ;;  %v6642_v38 = vld [vmem:[#allocation2 + $0x110] sm:$0xff]  ;;  %v2352_v47 = vld [vmem:[#allocation2 + $0x60] sm:$0xcc]  ;;  %v4994_v51 = vld [vmem:[#allocation2 + $0x138] sm:$0xcc] }
 0x13a   :  { %2714 = vmatpush1.bf16.msra.mxu0 %v6590_v1  ;;  %v5798_v41 = vcombine.high %v2385_v36, %v2388_v3  ;;  %v5026_v37 = vsel %vm8572_vm14, %v5024_v19, %v5025_v42  ;;  %v5031_v32 = vrot.slane %v5029_v33, 4  ;;  %v5032_v52 = vrot.slane %v8139_v22, 6  ;;  %v2353_v42 = vld [vmem:[#allocation2 + $0x78] sm:$0xcc] }
 0x13b   :  { %4937 = vmatmul.mubr.bf16.gmra.mrb[24].mxu1 %v6007_v25  ;;  %2715 = vmatprep.subr.bf16.mxu0 %v6595_v13  ;;  %v5797_v25 = vcombine.low %v2385_v36, %v2388_v3  ;;  %v5790_v57 = vrot.slane %v2351_v61, 10  ;;  %v2401_v11 = vrot.slane %v8154_v39, 6  ;;  %v5036_v28 = vrot.slane %v6642_v38, 6  ;;  %v6643_v39 = vld [vmem:[#allocation2 + $0x68] sm:$0xff] }
 0x13c   :  { %5350 = vmatpush1.bf16.msra.mxu1 %v6587_v12  ;;  %4946 = vmatprep.mubr.bf16.mxu1 %v6010_v14  ;;  %v5789_v12 = vrot.slane %v2350_v0, 10  ;;  %v2400_v14 = vrot.slane %v2398_v29, 4  ;;  %v5033_v53 = vsel %vm8572_vm14, %v5031_v32, %v5032_v52  ;;  %v6046_v21 = vrot.slane %v4992_v26, 10  ;;  %v6648_v26 = vld [vmem:[#allocation2 + $0x158] sm:$0xff] }
 0x13d   :  { %5351 = vmatprep.subr.bf16.mxu1 %v6592_v18  ;;  %2306 = vmatmul.mubr.bf16.gmra.mrb[28].mxu0 %v5753_v8  ;;  %v2394_v18 = vrot.slane %v8132_v63, 6  ;;  %v2399_v22 = vsel %vm8572_vm14, %v5790_v57, %v2398_v29  ;;  %v5038_v2 = vrot.slane %v5036_v28, 4  ;;  %v5039_v56 = vrot.slane %v8210_v49, 6 }
 0x13e   :  { %2716 = vmatpush1.bf16.msra.mxu0 %v6593_v24  ;;  %2719 = vmatprep.mubr.bf16.mxu0 %v5796_v16  ;;  %v2392_v30 = vsel %vm8572_vm14, %v5789_v12, %v2391_v34  ;;  %v2402_v16 = vsel %vm8572_vm14, %v2400_v14, %v2401_v11  ;;  %v5037_v36 = vsel %vm8572_vm14, %v6046_v21, %v5036_v28  ;;  %v5043_v34 = vrot.slane %v6644_v44, 6  ;;  %v6650_v44 = vld [vmem:[#allocation2 + $0x170] sm:$0xff] }
 0x13f   :  { %2717 = vmatprep.subr.bf16.mxu0 %v6598_v48  ;;  %v2395_v63 = vsel %vm8572_vm14, %v2393_v40, %v2394_v18  ;;  %v5802_v27 = vcombine.high %v2399_v22, %v2402_v16  ;;  %v5040_v3 = vsel %vm8572_vm14, %v5038_v2, %v5039_v56  ;;  %v5046_v18 = vrot.slane %v8301_v7, 6 }
 0x140   :  { %5352 = vmatpush1.bf16.msra.mxu1 %v6590_v1  ;;  %v6054_v1 = vcombine.high %v5023_v10, %v5026_v37  ;;  %v5800_v59 = vcombine.high %v2392_v30, %v2395_v63  ;;  %v5799_v17 = vcombine.low %v2392_v30, %v2395_v63  ;;  %v6058_v19 = vcombine.high %v5037_v36, %v5040_v3  ;;  %v6646_v30 = vld [vmem:[#allocation2 + $0x140] sm:$0xff] }
 0x141   :  { %5353 = vmatprep.subr.bf16.mxu1 %v6595_v13  ;;  %v6045_v13 = vrot.slane %v4991_v43, 10  ;;  %v5045_v40 = vrot.slane %v5043_v34, 4  ;;  %v5050_v63 = vrot.slane %v6646_v30, 6  ;;  %v6057_v29 = vcombine.low %v5037_v36, %v5040_v3 }
 0x142   :  { %2718 = vmatpush1.bf16.msra.mxu0 %v6596_v23  ;;  %v6048_v52 = vrot.slane %v4994_v51, 10  ;;  %v5053_v57 = vrot.slane %v8363_v46, 6  ;;  %v5060_v56 = vrot.slane %v8453_v58, 6 }
 0x143   :  { %4947 = vmatmul.mubr.bf16.gmra.mrb[28].mxu1 %v6009_v20  ;;  %v5030_v8 = vsel %vm8572_vm14, %v6045_v13, %v5029_v33  ;;  %v2408_v20 = vrot.slane %v8261_v15, 6  ;;  %v6645_v15 = vld [vmem:[#allocation2 + $0x80] sm:$0xff]  ;;  %v2415_v33 = vrot.slane %v8320_v55, 6  ;;  %v6647_v55 = vld [vmem:[#allocation2 + $0x98] sm:$0xff]  ;;  %v2354_v13 = vld [vmem:[#allocation2 + $0x90] sm:$0xcc] }
 0x144   :  { %5354 = vmatpush1.bf16.msra.mxu1 %v6593_v24  ;;  %5357 = vmatprep.mubr.bf16.mxu1 %v6052_v35  ;;  %v6053_v24 = vcombine.low %v5023_v10, %v5026_v37  ;;  %v6056_v5 = vcombine.high %v5030_v8, %v5033_v53  ;;  %v4993_v35 = vld [vmem:[#allocation2 + $0x120] sm:$0xcc]  ;;  %v6055_v0 = vcombine.low %v5030_v8, %v5033_v53  ;;  %v2412_v31 = vrot.slane %v6645_v15, 6 }
 0x145   :  { %5355 = vmatprep.subr.bf16.mxu1 %v6598_v48  ;;  %2720 = vmatmul.mubr.bf16.vlgmr.msra.gmra.mrb[0].mxu0 %v5795_v50  ;;  %v2405_v48 = vrot.slane %v6643_v39, 6  ;;  %v6047_v12 = vrot.slane %v4993_v35, 10  ;;  %v5792_v37 = vrot.slane %v2353_v42, 10  ;;  %v2419_v61 = vrot.slane %v6647_v55, 6  ;;  %v4996_v35 = vld [vmem:[#allocation2 + $0x168] sm:$0xcc] }
 0x146   :  { %2729 = vmatprep.mubr.bf16.mxu0 %v5798_v41  ;;  %v5801_v41 = vcombine.low %v2399_v22, %v2402_v16  ;;  %v2414_v9 = vrot.slane %v2412_v31, 4  ;;  %v5793_v11 = vrot.slane %v2354_v13, 10  ;;  %v2422_v53 = vrot.slane %v8410_v45, 6  ;;  %v4995_v22 = vld [vmem:[#allocation2 + $0x150] sm:$0xcc] }
 0x147   :  { %v2407_v6 = vrot.slane %v2405_v48, 4  ;;  %v5044_v43 = vsel %vm8572_vm14, %v6047_v12, %v5043_v34  ;;  %v2413_v7 = vsel %vm8572_vm14, %v5792_v37, %v2412_v31  ;;  %v2421_v8 = vrot.slane %v2419_v61, 4  ;;  %v6649_v45 = vld [vmem:[#allocation2 + $0xb0] sm:$0xff] }
 0x148   :  { %5356 = vmatpush1.bf16.msra.mxu1 %v6596_v23  ;;  %v5791_v23 = vrot.slane %v2352_v47, 10  ;;  %v5051_v38 = vsel %vm8572_vm14, %v6048_v52, %v5050_v63  ;;  %v2420_v46 = vsel %vm8572_vm14, %v5793_v11, %v2419_v61  ;;  %v2355_v47 = vld [vmem:[#allocation2 + $0xa8] sm:$0xcc]  ;;  %v6049_v21 = vrot.slane %v4995_v22, 10 }
 0x149   :  { %v2409_v50 = vsel %vm8572_vm14, %v2407_v6, %v2408_v20  ;;  %v2423_v39 = vsel %vm8572_vm14, %v2421_v8, %v2422_v53  ;;  %v2429_v20 = vrot.slane %v8475_v4, 6  ;;  %v5064_v34 = vrot.slane %v6650_v44, 6 }
 0x14a   :  { %v2406_v49 = vsel %vm8572_vm14, %v5791_v23, %v2405_v48  ;;  %v2426_v48 = vrot.slane %v6649_v45, 6  ;;  %v5794_v23 = vrot.slane %v2355_v47, 10  ;;  %v6050_v15 = vrot.slane %v4996_v35, 10 }
 0x14b   :  { %5358 = vmatmul.mubr.bf16.vlgmr.msra.gmra.mrb[0].mxu1 %v6051_v54  ;;  %v5804_v10 = vcombine.high %v2406_v49, %v2409_v50  ;;  %v5047_v54 = vsel %vm8572_vm14, %v5045_v40, %v5046_v18  ;;  %v5803_v32 = vcombine.low %v2406_v49, %v2409_v50  ;;  %v5807_v50 = vcombine.low %v2420_v46, %v2423_v39 }
 0x14c   :  { %5367 = vmatprep.mubr.bf16.mxu1 %v6054_v1  ;;  %v2416_v1 = vsel %vm8572_vm14, %v2414_v9, %v2415_v33  ;;  %v6059_v16 = vcombine.low %v5044_v43, %v5047_v54  ;;  %v2428_v6 = vrot.slane %v2426_v48, 4  ;;  %v2427_v58 = vsel %vm8572_vm14, %v5794_v23, %v2426_v48 }
 0x14d   :  { %2730 = vmatmul.mubr.bf16.gmra.mrb[4].mxu0 %v5797_v25  ;;  %v6060_v25 = vcombine.high %v5044_v43, %v5047_v54  ;;  %v5806_v14 = vcombine.high %v2413_v7, %v2416_v1  ;;  %v5066_v31 = vrot.slane %v5064_v34, 4  ;;  %v291_v43 = vld [vmem:[%s8762_s2] sm:$0x3]  ;;  %s6676_s2 = smov [#allocation3]  }
 0x14e   :  { %2739 = vmatprep.mubr.bf16.mxu0 %v5800_v59  ;;  %v5052_v59 = vrot.slane %v5050_v63, 4  ;;  %v2430_v49 = vsel %vm8572_vm14, %v2428_v6, %v2429_v20  ;;  %s5574_s11 = sshll.u32 %s6676_s2, 4  ;;  %s5575_s11 = int_to_ptr.vmem [resolvable:$true] %s5574_s11 }
 0x14f   :  { %v5810_v42 = vcombine.high %v2427_v58, %v2430_v49  ;;  %s6651_s12 = scalar_lea.vmem %s5575_s11, 8192  ;;  %p6656_p1 = scmp.lt.s32.totalorder %s5575_s11, %s5575_s11 }
 0x150   :  { %v5054_v28 = vsel %vm8572_vm14, %v5052_v59, %v5053_v57  ;;  %p6652_p0 = scmp.ne.s32.totalorder %s5575_s11, %s6651_s12  ;;  %p6657_p2 = scmp.lt.s32.totalorder %s6651_s12, %s6651_s12 }
 0x152   :  { %p6658_p3 = por %p6657_p2, %p6656_p1 }
 0x153   :  { %5368 = vmatmul.mubr.bf16.gmra.mrb[4].mxu1 %v6053_v24  ;;  %v5057_v24 = vrot.slane %v6648_v26, 6 }
 0x154   :  { %5377 = vmatprep.mubr.bf16.mxu1 %v6056_v5  ;;  %v6062_v5 = vcombine.high %v5051_v38, %v5054_v28  ;;  %p6659_p4 = pnand %p6658_p3, %p6652_p0 }
 0x155   :  { %2740 = vmatmul.mubr.bf16.gmra.mrb[8].mxu0 %v5799_v17  ;;  %v5805_v17 = vcombine.low %v2413_v7, %v2416_v1  ;;  %v5059_v2 = vrot.slane %v5057_v24, 4  ;;  %v5058_v36 = vsel %vm8572_vm14, %v6049_v21, %v5057_v24 }
 0x156   :  { %2749 = vmatprep.mubr.bf16.mxu0 %v5802_v27  ;;  %v5808_v27 = vcombine.high %v2420_v46, %v2423_v39 }
 0x157   :  { %v5061_v3 = vsel %vm8572_vm14, %v5059_v2, %v5060_v56 }
 0x158   :  { %v6064_v4 = vcombine.high %v5058_v36, %v5061_v3  ;;  %v6063_v40 = vcombine.low %v5058_v36, %v5061_v3 }
 0x15b   :  { %5378 = vmatmul.mubr.bf16.gmra.mrb[8].mxu1 %v6055_v0  ;;  %v6061_v0 = vcombine.low %v5051_v38, %v5054_v28 }
 0x15c   :  { %5387 = vmatprep.mubr.bf16.mxu1 %v6058_v19  ;;  %v5067_v19 = vrot.slane %v8516_v62, 6  ;;  %v2833_v62 = vlaneseq }
 0x15d   :  { %2750 = vmatmul.mubr.bf16.gmra.mrb[12].mxu0 %v5801_v41  ;;  %v5065_v41 = vsel %vm8572_vm14, %v6050_v15, %v5064_v34 }
 0x15e   :  { %2759 = vmatprep.mubr.bf16.mxu0 %v5804_v10  ;;  %v5068_v12 = vsel %vm8572_vm14, %v5066_v31, %v5067_v19  ;;  %v5809_v10 = vcombine.low %v2427_v58, %v2430_v49  ;;  %v2834_v9 = vshrl.u32 %v2833_v62, 7 }
 0x15f   :  { %v6066_v18 = vcombine.high %v5065_v41, %v5068_v12  ;;  %v6065_v37 = vcombine.low %v5065_v41, %v5068_v12 }
 0x160   :  { %v2835_v33 = vsub.s32 0, %v2834_v9  ;;  %v2839_v54 = vsub.s32 1, %v2834_v9 }
 0x162   :  { %v8680_v30 = vrot.slane %v291_v43, %v2835_v33  ;;  %v8682_v60 = vrot.slane %v291_v43, %v2839_v54 }
 0x163   :  { %5388 = vmatmul.mubr.bf16.gmra.mrb[12].mxu1 %v6057_v29 }
 0x164   :  { %5397 = vmatprep.mubr.bf16.mxu1 %v6060_v25 }
 0x165   :  { %2760 = vmatmul.mubr.bf16.gmra.mrb[16].mxu0 %v5803_v32 }
 0x166   :  { %2769 = vmatprep.mubr.bf16.mxu0 %v5806_v14 }
 0x16b   :  { %5398 = vmatmul.mubr.bf16.gmra.mrb[16].mxu1 %v6059_v16 }
 0x16c   :  { %5407 = vmatprep.mubr.bf16.mxu1 %v6062_v5 }
 0x16d   :  { %2770 = vmatmul.mubr.bf16.gmra.mrb[20].mxu0 %v5805_v17 }
 0x16e   :  { %2779 = vmatprep.mubr.bf16.mxu0 %v5808_v27 }
 0x173   :  { %5408 = vmatmul.mubr.bf16.gmra.mrb[20].mxu1 %v6061_v0 }
 0x174   :  { %5417 = vmatprep.mubr.bf16.mxu1 %v6064_v4 }
 0x175   :  { %2780 = vmatmul.mubr.bf16.gmra.mrb[24].mxu0 %v5807_v50 }
 0x176   :  { %2789 = vmatprep.mubr.bf16.mxu0 %v5810_v42 }
 0x17b   :  { %5418 = vmatmul.mubr.bf16.gmra.mrb[24].mxu1 %v6063_v40 }
 0x17c   :  { %5427 = vmatprep.mubr.bf16.mxu1 %v6066_v18 }
 0x17d   :  { %2790 = vmatmul.mubr.bf16.gmra.mrb[28].mxu0 %v5809_v10 }
 0x183   :  { %5428 = vmatmul.mubr.bf16.gmra.mrb[28].mxu1 %v6065_v37 }
 0x218   :  { %v2721_v63 = vpop.f32.mrb[0].mxu0 }
 0x219   :  { %v2843_v51 = vadd.f32 %v8680_v30, %v2721_v63  ;;  %v2723_v29 = vpop.f32.mrb[1].mxu0 }
 0x21a   :  { %v2844_v7 = vadd.f32 %v8682_v60, %v2723_v29  ;;  %v2725_v1 = vpop.f32.mrb[2].mxu0 }
 0x21b   :  { %v2875_v55 = vmax.f32 %v2843_v51, 0.0  ;;  %v2845_v61 = vadd.f32 %v8680_v30, %v2725_v1  ;;  %v2727_v25 = vpop.f32.mrb[3].mxu0 }
 0x21c   :  { %v2876_v13 = vmax.f32 %v2844_v7, 0.0  ;;  %v2846_v32 = vadd.f32 %v8682_v60, %v2727_v25 }
 0x21d   :  { %2910 = vst [vmem:[#allocation3] sm:$0xff] %v2875_v55  ;;  %v2877_v52 = vmax.f32 %v2845_v61, 0.0 }
 0x21e   :  { %v5359_v59 = vpop.f32.mrb[0].mxu1  ;;  %2911 = vst [vmem:[#allocation3 + $0x8] sm:$0xff] %v2876_v13  ;;  %v2878_v57 = vmax.f32 %v2846_v32, 0.0 }
 0x21f   :  { %v5470_v14 = vadd.f32 %v5359_v59, %v8680_v30  ;;  %v5361_v11 = vpop.f32.mrb[1].mxu1  ;;  %2912 = vst [vmem:[#allocation3 + $0x10] sm:$0xff] %v2877_v52 }
 0x220   :  { %v5471_v8 = vadd.f32 %v5361_v11, %v8682_v60  ;;  %v5363_v53 = vpop.f32.mrb[2].mxu1  ;;  %2913 = vst [vmem:[#allocation3 + $0x18] sm:$0xff] %v2878_v57  ;;  %v2731_v38 = vpop.f32.mrb[4].mxu0 }
 0x221   :  { %v5502_v28 = vmax.f32 %v5470_v14, 0.0  ;;  %v5472_v26 = vadd.f32 %v5363_v53, %v8680_v30  ;;  %v5365_v24 = vpop.f32.mrb[3].mxu1  ;;  %v2847_v22 = vadd.f32 %v8680_v30, %v2731_v38  ;;  %v2733_v16 = vpop.f32.mrb[5].mxu0 }
 0x222   :  { %v5503_v46 = vmax.f32 %v5471_v8, 0.0  ;;  %v5473_v39 = vadd.f32 %v5365_v24, %v8682_v60  ;;  %v2848_v45 = vadd.f32 %v8682_v60, %v2733_v16  ;;  %v2735_v48 = vpop.f32.mrb[6].mxu0 }
 0x223   :  { %5537 = vst [vmem:[#allocation3 + $0x100] sm:$0xff] %v5502_v28  ;;  %v5504_v5 = vmax.f32 %v5472_v26, 0.0  ;;  %v2879_v47 = vmax.f32 %v2847_v22, 0.0  ;;  %v2849_v17 = vadd.f32 %v8680_v30, %v2735_v48  ;;  %v2737_v21 = vpop.f32.mrb[7].mxu0 }
 0x224   :  { %5538 = vst [vmem:[#allocation3 + $0x108] sm:$0xff] %v5503_v46  ;;  %v5505_v2 = vmax.f32 %v5473_v39, 0.0  ;;  %v2880_v56 = vmax.f32 %v2848_v45, 0.0  ;;  %v2850_v27 = vadd.f32 %v8682_v60, %v2737_v21 }
 0x225   :  { %5539 = vst [vmem:[#allocation3 + $0x110] sm:$0xff] %v5504_v5  ;;  %2914 = vst [vmem:[#allocation3 + $0x20] sm:$0xff] %v2879_v47  ;;  %v2881_v23 = vmax.f32 %v2849_v17, 0.0 }
 0x226   :  { %5540 = vst [vmem:[#allocation3 + $0x118] sm:$0xff] %v5505_v2  ;;  %v5369_v6 = vpop.f32.mrb[4].mxu1  ;;  %2915 = vst [vmem:[#allocation3 + $0x28] sm:$0xff] %v2880_v56  ;;  %v2882_v20 = vmax.f32 %v2850_v27, 0.0 }
 0x227   :  { %v5474_v36 = vadd.f32 %v5369_v6, %v8680_v30  ;;  %v5371_v3 = vpop.f32.mrb[5].mxu1  ;;  %2916 = vst [vmem:[#allocation3 + $0x30] sm:$0xff] %v2881_v23 }
 0x228   :  { %v5475_v44 = vadd.f32 %v5371_v3, %v8682_v60  ;;  %v5373_v34 = vpop.f32.mrb[6].mxu1  ;;  %2917 = vst [vmem:[#allocation3 + $0x38] sm:$0xff] %v2882_v20  ;;  %v2741_v35 = vpop.f32.mrb[8].mxu0 }
 0x229   :  { %v5506_v0 = vmax.f32 %v5474_v36, 0.0  ;;  %v5476_v58 = vadd.f32 %v5373_v34, %v8680_v30  ;;  %v5375_v49 = vpop.f32.mrb[7].mxu1  ;;  %v2851_v4 = vadd.f32 %v8680_v30, %v2741_v35  ;;  %v2743_v50 = vpop.f32.mrb[9].mxu0 }
 0x22a   :  { %v5507_v15 = vmax.f32 %v5475_v44, 0.0  ;;  %v5477_v31 = vadd.f32 %v5375_v49, %v8682_v60  ;;  %v2852_v19 = vadd.f32 %v8682_v60, %v2743_v50  ;;  %v2745_v42 = vpop.f32.mrb[10].mxu0 }
 0x22b   :  { %5541 = vst [vmem:[#allocation3 + $0x120] sm:$0xff] %v5506_v0  ;;  %v5508_v41 = vmax.f32 %v5476_v58, 0.0  ;;  %v2883_v12 = vmax.f32 %v2851_v4, 0.0  ;;  %v2853_v40 = vadd.f32 %v8680_v30, %v2745_v42  ;;  %v2747_v18 = vpop.f32.mrb[11].mxu0 }
 0x22c   :  { %5542 = vst [vmem:[#allocation3 + $0x128] sm:$0xff] %v5507_v15  ;;  %v5509_v10 = vmax.f32 %v5477_v31, 0.0  ;;  %v2884_v37 = vmax.f32 %v2852_v19, 0.0  ;;  %v2854_v62 = vadd.f32 %v8682_v60, %v2747_v18 }
 0x22d   :  { %5543 = vst [vmem:[#allocation3 + $0x130] sm:$0xff] %v5508_v41  ;;  %2918 = vst [vmem:[#allocation3 + $0x40] sm:$0xff] %v2883_v12  ;;  %v2885_v9 = vmax.f32 %v2853_v40, 0.0 }
 0x22e   :  { %5544 = vst [vmem:[#allocation3 + $0x138] sm:$0xff] %v5509_v10  ;;  %v5379_v33 = vpop.f32.mrb[8].mxu1  ;;  %2919 = vst [vmem:[#allocation3 + $0x48] sm:$0xff] %v2884_v37  ;;  %v2886_v43 = vmax.f32 %v2854_v62, 0.0 }
 0x22f   :  { %v5478_v54 = vadd.f32 %v5379_v33, %v8680_v30  ;;  %v5381_v63 = vpop.f32.mrb[9].mxu1  ;;  %2920 = vst [vmem:[#allocation3 + $0x50] sm:$0xff] %v2885_v9 }
 0x230   :  { %v5479_v51 = vadd.f32 %v5381_v63, %v8682_v60  ;;  %v5383_v29 = vpop.f32.mrb[10].mxu1  ;;  %2921 = vst [vmem:[#allocation3 + $0x58] sm:$0xff] %v2886_v43  ;;  %v2751_v7 = vpop.f32.mrb[12].mxu0 }
 0x231   :  { %v5510_v1 = vmax.f32 %v5478_v54, 0.0  ;;  %v5480_v55 = vadd.f32 %v5383_v29, %v8680_v30  ;;  %v5385_v61 = vpop.f32.mrb[11].mxu1  ;;  %v2855_v25 = vadd.f32 %v8680_v30, %v2751_v7  ;;  %v2753_v13 = vpop.f32.mrb[13].mxu0 }
 0x232   :  { %v5511_v32 = vmax.f32 %v5479_v51, 0.0  ;;  %v5481_v52 = vadd.f32 %v5385_v61, %v8682_v60  ;;  %v2856_v59 = vadd.f32 %v8682_v60, %v2753_v13  ;;  %v2755_v57 = vpop.f32.mrb[14].mxu0 }
 0x233   :  { %5545 = vst [vmem:[#allocation3 + $0x140] sm:$0xff] %v5510_v1  ;;  %v5512_v14 = vmax.f32 %v5480_v55, 0.0  ;;  %v2887_v11 = vmax.f32 %v2855_v25, 0.0  ;;  %v2857_v8 = vadd.f32 %v8680_v30, %v2755_v57  ;;  %v2757_v53 = vpop.f32.mrb[15].mxu0 }
 0x234   :  { %5546 = vst [vmem:[#allocation3 + $0x148] sm:$0xff] %v5511_v32  ;;  %v5513_v38 = vmax.f32 %v5481_v52, 0.0  ;;  %v2888_v28 = vmax.f32 %v2856_v59, 0.0  ;;  %v2858_v26 = vadd.f32 %v8682_v60, %v2757_v53 }
 0x235   :  { %5547 = vst [vmem:[#allocation3 + $0x150] sm:$0xff] %v5512_v14  ;;  %2922 = vst [vmem:[#allocation3 + $0x60] sm:$0xff] %v2887_v11  ;;  %v2889_v24 = vmax.f32 %v2857_v8, 0.0 }
 0x236   :  { %5548 = vst [vmem:[#allocation3 + $0x158] sm:$0xff] %v5513_v38  ;;  %v5389_v22 = vpop.f32.mrb[12].mxu1  ;;  %2923 = vst [vmem:[#allocation3 + $0x68] sm:$0xff] %v2888_v28  ;;  %v2890_v16 = vmax.f32 %v2858_v26, 0.0 }
 0x237   :  { %v5482_v46 = vadd.f32 %v5389_v22, %v8680_v30  ;;  %v5391_v39 = vpop.f32.mrb[13].mxu1  ;;  %2924 = vst [vmem:[#allocation3 + $0x70] sm:$0xff] %v2889_v24 }
 0x238   :  { %v5483_v45 = vadd.f32 %v5391_v39, %v8682_v60  ;;  %v5393_v48 = vpop.f32.mrb[14].mxu1  ;;  %2925 = vst [vmem:[#allocation3 + $0x78] sm:$0xff] %v2890_v16  ;;  %v2761_v5 = vpop.f32.mrb[16].mxu0 }
 0x239   :  { %v5514_v47 = vmax.f32 %v5482_v46, 0.0  ;;  %v5484_v17 = vadd.f32 %v5393_v48, %v8680_v30  ;;  %v5395_v21 = vpop.f32.mrb[15].mxu1  ;;  %v2859_v2 = vadd.f32 %v8680_v30, %v2761_v5  ;;  %v2763_v56 = vpop.f32.mrb[17].mxu0 }
 0x23a   :  { %v5515_v27 = vmax.f32 %v5483_v45, 0.0  ;;  %v5485_v23 = vadd.f32 %v5395_v21, %v8682_v60  ;;  %v2860_v6 = vadd.f32 %v8682_v60, %v2763_v56  ;;  %v2765_v20 = vpop.f32.mrb[18].mxu0 }
 0x23b   :  { %5549 = vst [vmem:[#allocation3 + $0x160] sm:$0xff] %v5514_v47  ;;  %v5516_v36 = vmax.f32 %v5484_v17, 0.0  ;;  %v2891_v3 = vmax.f32 %v2859_v2, 0.0  ;;  %v2861_v44 = vadd.f32 %v8680_v30, %v2765_v20  ;;  %v2767_v34 = vpop.f32.mrb[19].mxu0 }
 0x23c   :  { %5550 = vst [vmem:[#allocation3 + $0x168] sm:$0xff] %v5515_v27  ;;  %v5517_v35 = vmax.f32 %v5485_v23, 0.0  ;;  %v2892_v0 = vmax.f32 %v2860_v6, 0.0  ;;  %v2862_v58 = vadd.f32 %v8682_v60, %v2767_v34 }
 0x23d   :  { %5551 = vst [vmem:[#allocation3 + $0x170] sm:$0xff] %v5516_v36  ;;  %2926 = vst [vmem:[#allocation3 + $0x80] sm:$0xff] %v2891_v3  ;;  %v2893_v49 = vmax.f32 %v2861_v44, 0.0 }
 0x23e   :  { %5552 = vst [vmem:[#allocation3 + $0x178] sm:$0xff] %v5517_v35  ;;  %v5399_v4 = vpop.f32.mrb[16].mxu1  ;;  %2927 = vst [vmem:[#allocation3 + $0x88] sm:$0xff] %v2892_v0  ;;  %v2894_v50 = vmax.f32 %v2862_v58, 0.0 }
 0x23f   :  { %v5486_v15 = vadd.f32 %v5399_v4, %v8680_v30  ;;  %v5401_v31 = vpop.f32.mrb[17].mxu1  ;;  %2928 = vst [vmem:[#allocation3 + $0x90] sm:$0xff] %v2893_v49 }
 0x240   :  { %v5487_v19 = vadd.f32 %v5401_v31, %v8682_v60  ;;  %v5403_v42 = vpop.f32.mrb[18].mxu1  ;;  %2929 = vst [vmem:[#allocation3 + $0x98] sm:$0xff] %v2894_v50  ;;  %v2771_v41 = vpop.f32.mrb[20].mxu0 }
 0x241   :  { %v5518_v12 = vmax.f32 %v5486_v15, 0.0  ;;  %v5488_v40 = vadd.f32 %v5403_v42, %v8680_v30  ;;  %v5405_v18 = vpop.f32.mrb[19].mxu1  ;;  %v2863_v10 = vadd.f32 %v8680_v30, %v2771_v41  ;;  %v2773_v37 = vpop.f32.mrb[21].mxu0 }
 0x242   :  { %v5519_v62 = vmax.f32 %v5487_v19, 0.0  ;;  %v5489_v9 = vadd.f32 %v5405_v18, %v8682_v60  ;;  %v2864_v33 = vadd.f32 %v8682_v60, %v2773_v37  ;;  %v2775_v43 = vpop.f32.mrb[22].mxu0 }
 0x243   :  { %5553 = vst [vmem:[#allocation3 + $0x180] sm:$0xff] %v5518_v12  ;;  %v5520_v54 = vmax.f32 %v5488_v40, 0.0  ;;  %v2895_v63 = vmax.f32 %v2863_v10, 0.0  ;;  %v2865_v51 = vadd.f32 %v8680_v30, %v2775_v43  ;;  %v2777_v29 = vpop.f32.mrb[23].mxu0 }
 0x244   :  { %5554 = vst [vmem:[#allocation3 + $0x188] sm:$0xff] %v5519_v62  ;;  %v5521_v7 = vmax.f32 %v5489_v9, 0.0  ;;  %v2896_v1 = vmax.f32 %v2864_v33, 0.0  ;;  %v2866_v55 = vadd.f32 %v8682_v60, %v2777_v29 }
 0x245   :  { %5555 = vst [vmem:[#allocation3 + $0x190] sm:$0xff] %v5520_v54  ;;  %2930 = vst [vmem:[#allocation3 + $0xa0] sm:$0xff] %v2895_v63  ;;  %v2897_v61 = vmax.f32 %v2865_v51, 0.0 }
 0x246   :  { %5556 = vst [vmem:[#allocation3 + $0x198] sm:$0xff] %v5521_v7  ;;  %v5409_v25 = vpop.f32.mrb[20].mxu1  ;;  %2931 = vst [vmem:[#allocation3 + $0xa8] sm:$0xff] %v2896_v1  ;;  %v2898_v13 = vmax.f32 %v2866_v55, 0.0 }
 0x247   :  { %v5490_v32 = vadd.f32 %v5409_v25, %v8680_v30  ;;  %v5411_v52 = vpop.f32.mrb[21].mxu1  ;;  %2932 = vst [vmem:[#allocation3 + $0xb0] sm:$0xff] %v2897_v61 }
 0x248   :  { %v5491_v59 = vadd.f32 %v5411_v52, %v8682_v60  ;;  %v5413_v57 = vpop.f32.mrb[22].mxu1  ;;  %2933 = vst [vmem:[#allocation3 + $0xb8] sm:$0xff] %v2898_v13  ;;  %v2781_v14 = vpop.f32.mrb[24].mxu0 }
 0x249   :  { %v5522_v11 = vmax.f32 %v5490_v32, 0.0  ;;  %v5492_v8 = vadd.f32 %v5413_v57, %v8680_v30  ;;  %v5415_v53 = vpop.f32.mrb[23].mxu1  ;;  %v2867_v38 = vadd.f32 %v8680_v30, %v2781_v14  ;;  %v2783_v28 = vpop.f32.mrb[25].mxu0 }
 0x24a   :  { %v5523_v26 = vmax.f32 %v5491_v59, 0.0  ;;  %v5493_v24 = vadd.f32 %v5415_v53, %v8682_v60  ;;  %v2868_v22 = vadd.f32 %v8682_v60, %v2783_v28  ;;  %v2785_v16 = vpop.f32.mrb[26].mxu0 }
 0x24b   :  { %5557 = vst [vmem:[#allocation3 + $0x1a0] sm:$0xff] %v5522_v11  ;;  %v5524_v46 = vmax.f32 %v5492_v8, 0.0  ;;  %v2899_v39 = vmax.f32 %v2867_v38, 0.0  ;;  %v2869_v45 = vadd.f32 %v8680_v30, %v2785_v16  ;;  %v2787_v48 = vpop.f32.mrb[27].mxu0 }
 0x24c   :  { %5558 = vst [vmem:[#allocation3 + $0x1a8] sm:$0xff] %v5523_v26  ;;  %v5525_v5 = vmax.f32 %v5493_v24, 0.0  ;;  %v2900_v47 = vmax.f32 %v2868_v22, 0.0  ;;  %v2870_v17 = vadd.f32 %v8682_v60, %v2787_v48 }
 0x24d   :  { %5559 = vst [vmem:[#allocation3 + $0x1b0] sm:$0xff] %v5524_v46  ;;  %2934 = vst [vmem:[#allocation3 + $0xc0] sm:$0xff] %v2899_v39  ;;  %v2901_v21 = vmax.f32 %v2869_v45, 0.0 }
 0x24e   :  { %5560 = vst [vmem:[#allocation3 + $0x1b8] sm:$0xff] %v5525_v5  ;;  %v5419_v2 = vpop.f32.mrb[24].mxu1  ;;  %2935 = vst [vmem:[#allocation3 + $0xc8] sm:$0xff] %v2900_v47  ;;  %v2902_v56 = vmax.f32 %v2870_v17, 0.0 }
 0x24f   :  { %v5494_v27 = vadd.f32 %v5419_v2, %v8680_v30  ;;  %v5421_v23 = vpop.f32.mrb[25].mxu1  ;;  %2936 = vst [vmem:[#allocation3 + $0xd0] sm:$0xff] %v2901_v21 }
 0x250   :  { %v5495_v6 = vadd.f32 %v5421_v23, %v8682_v60  ;;  %v5423_v20 = vpop.f32.mrb[26].mxu1  ;;  %2937 = vst [vmem:[#allocation3 + $0xd8] sm:$0xff] %v2902_v56  ;;  %v2791_v36 = vpop.f32.mrb[28].mxu0 }
 0x251   :  { %v5526_v3 = vmax.f32 %v5494_v27, 0.0  ;;  %v5496_v44 = vadd.f32 %v5423_v20, %v8680_v30  ;;  %v5425_v34 = vpop.f32.mrb[27].mxu1  ;;  %v2871_v35 = vadd.f32 %v8680_v30, %v2791_v36  ;;  %v2793_v0 = vpop.f32.mrb[29].mxu0 }
 0x252   :  { %v5527_v58 = vmax.f32 %v5495_v6, 0.0  ;;  %v5497_v49 = vadd.f32 %v5425_v34, %v8682_v60  ;;  %v2872_v4 = vadd.f32 %v8682_v60, %v2793_v0  ;;  %v2795_v50 = vpop.f32.mrb[30].mxu0 }
 0x253   :  { %5561 = vst [vmem:[#allocation3 + $0x1c0] sm:$0xff] %v5526_v3  ;;  %v5528_v15 = vmax.f32 %v5496_v44, 0.0  ;;  %v2903_v31 = vmax.f32 %v2871_v35, 0.0  ;;  %v2873_v19 = vadd.f32 %v8680_v30, %v2795_v50  ;;  %v2797_v42 = vpop.f32.mrb[31].mxu0 }
 0x254   :  { %5562 = vst [vmem:[#allocation3 + $0x1c8] sm:$0xff] %v5527_v58  ;;  %v5529_v41 = vmax.f32 %v5497_v49, 0.0  ;;  %v2904_v12 = vmax.f32 %v2872_v4, 0.0  ;;  %v2874_v40 = vadd.f32 %v8682_v60, %v2797_v42 }
 0x255   :  { %5563 = vst [vmem:[#allocation3 + $0x1d0] sm:$0xff] %v5528_v15  ;;  %2938 = vst [vmem:[#allocation3 + $0xe0] sm:$0xff] %v2903_v31  ;;  %v2905_v18 = vmax.f32 %v2873_v19, 0.0 }
 0x256   :  { %5564 = vst [vmem:[#allocation3 + $0x1d8] sm:$0xff] %v5529_v41  ;;  %v5429_v10 = vpop.f32.mrb[28].mxu1  ;;  %2939 = vst [vmem:[#allocation3 + $0xe8] sm:$0xff] %v2904_v12  ;;  %v2906_v37 = vmax.f32 %v2874_v40, 0.0 }
 0x257   :  { %v5498_v62 = vadd.f32 %v5429_v10, %v8680_v30  ;;  %v5431_v9 = vpop.f32.mrb[29].mxu1  ;;  %2940 = vst [vmem:[#allocation3 + $0xf0] sm:$0xff] %v2905_v18 }
 0x258   :  { %v5499_v33 = vadd.f32 %v5431_v9, %v8682_v60  ;;  %v5433_v43 = vpop.f32.mrb[30].mxu1  ;;  %2941 = vst [vmem:[#allocation3 + $0xf8] sm:$0xff] %v2906_v37 }
 0x259   :  { %v5530_v54 = vmax.f32 %v5498_v62, 0.0  ;;  %v5500_v63 = vadd.f32 %v5433_v43, %v8680_v30  ;;  %v5435_v51 = vpop.f32.mrb[31].mxu1 }
 0x25a   :  { %v5531_v29 = vmax.f32 %v5499_v33, 0.0  ;;  %v5501_v7 = vadd.f32 %v5435_v51, %v8682_v60 }
 0x25b   :  { %5565 = vst [vmem:[#allocation3 + $0x1e0] sm:$0xff] %v5530_v54  ;;  %v5532_v1 = vmax.f32 %v5500_v63, 0.0 }
 0x25c   :  { %5566 = vst [vmem:[#allocation3 + $0x1e8] sm:$0xff] %v5531_v29  ;;  %v5533_v55 = vmax.f32 %v5501_v7, 0.0 }
 0x25d   :  { %5567 = vst [vmem:[#allocation3 + $0x1f0] sm:$0xff] %v5532_v1 }
 0x25e   :  { %5568 = vst [vmem:[#allocation3 + $0x1f8] sm:$0xff] %v5533_v55 }
 0x25f   :  { %6662 = shalt.err (!%p6659_p4)
}
 0x260   :  { %s6663_s15 = scalar_lea.hbm %s8763_s3, 8192 }
 0x261   :  { %p6664_p5 = scmp.ne.s32.totalorder %s8763_s3, %s6663_s15  ;;  %p6667_p6 = scmp.lt.u32.totalorder %s6663_s15, %s8763_s3 }
 0x263   :  { %p6669_p7 = pnand %p6667_p6, %p6664_p5 }
 0x265   :  { %6672 = shalt.err (!%p6669_p7)
}
 0x266   :  { %s6677_s20 = smov 256   ;;  %s6678_s21 = smov 16  }
 0x267   :  { %5580 = dma.vmem_to_hbm [thread:$0]  %s5575_s11, 8192, %s8763_s3, [#allocation4], %s6677_s20, %s6677_s20, %s6678_s21  }
 0x268   :  { %6673 = dma.done.wait [#allocation4], 8192  }
 0x269   :  { %6674 = vsyncadd [#allocation4], 4294959104 }
 0x26a   :  { %5584 = vsyncpa [#allocation4], 1 }

</bundles_post_ra>
